<compile_context>
chip_gen: v7x
topology: tpu7x:2x2x1
jax: 0.10.0
libtpu: 0.0.40
codegen_flags: <defaults>
</compile_context>

<pallas_src>
import jax
import jax.numpy as jnp
from jax.experimental import pallas as pl
from jax.experimental.pallas import tpu as pltpu


def _round_up(x, m):
    return (x + m - 1) // m * m


def gen_lack_feature_kernel(x_ref, w1t_ref, b1_ref, w2t_ref, b2_ref, o_ref):
    # x_ref  : (TM, D)   one tile of flattened (batch*seq) tokens
    # w1t_ref: (D, H)    conv_1 weight, pre-transposed in the wrapper
    # b1_ref : (1, H)
    # w2t_ref: (H, D)    conv_2 weight, pre-transposed in the wrapper
    # b2_ref : (1, D)
    x = x_ref[...]

    # conv_1 (1x1 Conv1d == pointwise Linear): (TM, D) @ (D, H) -> (TM, H)
    h = jnp.dot(x, w1t_ref[...], preferred_element_type=jnp.float32) + b1_ref[...]

    # TODO(synk): nn.Dropout(0.1) is identity in eval/inference; training-mode
    # RNG dropout (pltpu.prng_*) is not implemented here.
    h = h.astype(x.dtype)

    # conv_2: (TM, H) @ (H, D) -> (TM, D)
    out = jnp.dot(h, w2t_ref[...], preferred_element_type=jnp.float32) + b2_ref[...]
    o_ref[...] = out.astype(o_ref.dtype)


def gen_lack_feature(x, params, *, token_tile=128):
    """x: (B, S, model_dim) -> (B, S, model_dim).

    Matches conv_2(dropout(conv_1(x.transpose(1,2)))).transpose(1,2) of the
    PyTorch module (dropout in eval mode).
    """
    B, S, D = x.shape
    w1 = params["w1"][:, :, 0]           # (H, D)  Conv1d weight squeezed
    b1 = params["b1"]                    # (H,)
    w2 = params["w2"][:, :, 0]           # (D, H)
    b2 = params["b2"]                    # (D,)
    H = w1.shape[0]

    # Pre-transpose weights at trace time so the kernel feeds the MXU directly.
    w1t = jnp.transpose(w1)              # (D, H)
    w2t = jnp.transpose(w2)              # (H, D)
    b1r = b1.reshape(1, H)
    b2r = b2.reshape(1, D)

    # Flatten batch*seq into one token axis and pad to a multiple of the tile
    # so projection matmuls see 128+ rows (MXU-filling) whenever possible.
    T = B * S
    tm = token_tile if T >= token_tile else _round_up(T, 8)
    T_pad = _round_up(T, tm)
    x_tok = x.reshape(T, D)
    if T_pad != T:
        x_tok = jnp.pad(x_tok, ((0, T_pad - T), (0, 0)))

    out = pl.pallas_call(
        gen_lack_feature_kernel,
        out_shape=jax.ShapeDtypeStruct((T_pad, D), x.dtype),
        grid=(T_pad // tm,),
        in_specs=[
            pl.BlockSpec((tm, D), lambda i: (i, 0)),   # x token tile (streamed)
            pl.BlockSpec((D, H), lambda i: (0, 0)),    # W1^T (resident in VMEM)
            pl.BlockSpec((1, H), lambda i: (0, 0)),    # b1
            pl.BlockSpec((H, D), lambda i: (0, 0)),    # W2^T (resident in VMEM)
            pl.BlockSpec((1, D), lambda i: (0, 0)),    # b2
        ],
        out_specs=pl.BlockSpec((tm, D), lambda i: (i, 0)),
        compiler_params=pltpu.CompilerParams(
            dimension_semantics=("parallel",),
            vmem_limit_bytes=48 * 1024 * 1024,
        ),
    )(x_tok, w1t, b1r, w2t, b2r)

    return out[:T].reshape(B, S, D)


def reference_gen_lack_feature(x, params):
    """Pure-JAX reference mirroring the PyTorch forward (dropout = eval)."""
    w1 = params["w1"][:, :, 0]
    b1 = params["b1"]
    w2 = params["w2"][:, :, 0]
    b2 = params["b2"]
    hp = jax.lax.Precision.HIGHEST
    h = jnp.einsum("bsd,hd->bsh", x, w1, precision=hp) + b1
    return jnp.einsum("bsh,dh->bsd", h, w2, precision=hp) + b2


def init_params(key, model_dim, hidden_dim):
    """Conv1d(in, out, 1) weights: (out, in, 1); PyTorch-style uniform init."""
    ks = jax.random.split(key, 4)
    bound1 = 1.0 / (model_dim ** 0.5)
    bound2 = 1.0 / (hidden_dim ** 0.5)
    u = lambda k, shape, b: jax.random.uniform(k, shape, jnp.float32, -b, b)
    return {
        "w1": u(ks[0], (hidden_dim, model_dim, 1), bound1),
        "b1": u(ks[1], (hidden_dim,), bound1),
        "w2": u(ks[2], (model_dim, hidden_dim, 1), bound2),
        "b2": u(ks[3], (model_dim,), bound2),
    }


if __name__ == "__main__":
    B, S = 2, 16
    model_dim = 768          # module default
    hidden_dim = 1024        # hard-coded in the module

    key = jax.random.PRNGKey(0)
    kx, kp = jax.random.split(key)
    x = jax.random.normal(kx, (B, S, model_dim), jnp.float32)
    params = init_params(kp, model_dim, hidden_dim)

    out = gen_lack_feature(x, params)
    out = jax.block_until_ready(out)

    ref = reference_gen_lack_feature(x, params)
    assert out.shape == (B, S, model_dim), out.shape
    assert jnp.allclose(out, ref, atol=2e-3, rtol=2e-3), "mismatch vs reference"

    print("KERNEL_OK")
</pallas_src>

<mosaic_0001>
module attributes {stable_mosaic.version = 11 : i64} {
  func.func @gen_lack_feature_kernel(%arg0: i32, %arg1: memref<32x768xf32, #tpu.memory_space<vmem>>, %arg2: memref<768x1024xf32, #tpu.memory_space<vmem>>, %arg3: memref<1x1024xf32, #tpu.memory_space<vmem>>, %arg4: memref<1024x768xf32, #tpu.memory_space<vmem>>, %arg5: memref<1x768xf32, #tpu.memory_space<vmem>>, %arg6: memref<32x768xf32, #tpu.memory_space<vmem>>) attributes {dimension_semantics = [#tpu.dimension_semantics<parallel>], iteration_bounds = array<i64: 1>, scalar_prefetch = 0 : i64, scratch_operands = 0 : i64, tpu.core_type = #tpu.core_type<tc>, window_params = [{transform_indices = @transform_0, window_bounds = array<i64: 32, 768>}, {pipeline_mode = #tpu.pipeline_mode<synchronous>, transform_indices = @transform_1, window_bounds = array<i64: 768, 1024>}, {pipeline_mode = #tpu.pipeline_mode<synchronous>, transform_indices = @transform_2, window_bounds = array<i64: 1, 1024>}, {pipeline_mode = #tpu.pipeline_mode<synchronous>, transform_indices = @transform_3, window_bounds = array<i64: 1024, 768>}, {pipeline_mode = #tpu.pipeline_mode<synchronous>, transform_indices = @transform_4, window_bounds = array<i64: 1, 768>}, {transform_indices = @transform_5, window_bounds = array<i64: 32, 768>}]} {
    %c0 = arith.constant 0 : index
    %c0_0 = arith.constant 0 : index
    %0 = vector.load %arg1[%c0, %c0_0] : memref<32x768xf32, #tpu.memory_space<vmem>>, vector<32x768xf32>
    %c0_1 = arith.constant 0 : index
    %c0_2 = arith.constant 0 : index
    %1 = vector.load %arg2[%c0_1, %c0_2] : memref<768x1024xf32, #tpu.memory_space<vmem>>, vector<768x1024xf32>
    %cst = arith.constant dense<0.000000e+00> : vector<32x1024xf32>
    %2 = tpu.matmul %0, %1, %cst {dimension_numbers = #tpu.dot_dimension_numbers<[1], [0], [0], [1], [0, 0, 1, 1], [], []>} : vector<32x768xf32>, vector<768x1024xf32>, vector<32x1024xf32> -> vector<32x1024xf32>
    %c0_3 = arith.constant 0 : index
    %c0_4 = arith.constant 0 : index
    %3 = vector.load %arg3[%c0_3, %c0_4] : memref<1x1024xf32, #tpu.memory_space<vmem>>, vector<1x1024xf32>
    %4 = vector.broadcast %3 : vector<1x1024xf32> to vector<32x1024xf32>
    %5 = arith.addf %2, %4 : vector<32x1024xf32>
    %c0_5 = arith.constant 0 : index
    %c0_6 = arith.constant 0 : index
    %6 = vector.load %arg4[%c0_5, %c0_6] : memref<1024x768xf32, #tpu.memory_space<vmem>>, vector<1024x768xf32>
    %cst_7 = arith.constant dense<0.000000e+00> : vector<32x768xf32>
    %7 = tpu.matmul %5, %6, %cst_7 {dimension_numbers = #tpu.dot_dimension_numbers<[1], [0], [0], [1], [0, 0, 1, 1], [], []>} : vector<32x1024xf32>, vector<1024x768xf32>, vector<32x768xf32> -> vector<32x768xf32>
    %c0_8 = arith.constant 0 : index
    %c0_9 = arith.constant 0 : index
    %8 = vector.load %arg5[%c0_8, %c0_9] : memref<1x768xf32, #tpu.memory_space<vmem>>, vector<1x768xf32>
    %9 = vector.broadcast %8 : vector<1x768xf32> to vector<32x768xf32>
    %10 = arith.addf %7, %9 : vector<32x768xf32>
    %c0_10 = arith.constant 0 : index
    %c0_11 = arith.constant 0 : index
    %11 = vector.load %arg6[%c0_10, %c0_11] : memref<32x768xf32, #tpu.memory_space<vmem>>, vector<32x768xf32>
    tpu.vector_store %arg6[%c0_10, %c0_11], %10 {strides = array<i32>} : memref<32x768xf32, #tpu.memory_space<vmem>>, vector<32x768xf32>,
    return
  }
  func.func @transform_0(%arg0: i32) -> (i32, i32) {
    %c0_i32 = arith.constant 0 : i32
    %c0_i32_0 = arith.constant 0 : i32
    return %arg0, %c0_i32 : i32, i32
  }
  func.func @transform_1(%arg0: i32) -> (i32, i32) {
    %c0_i32 = arith.constant 0 : i32
    %c0_i32_0 = arith.constant 0 : i32
    %c0_i32_1 = arith.constant 0 : i32
    return %c0_i32, %c0_i32_0 : i32, i32
  }
  func.func @transform_2(%arg0: i32) -> (i32, i32) {
    %c0_i32 = arith.constant 0 : i32
    %c0_i32_0 = arith.constant 0 : i32
    %c0_i32_1 = arith.constant 0 : i32
    return %c0_i32, %c0_i32_0 : i32, i32
  }
  func.func @transform_3(%arg0: i32) -> (i32, i32) {
    %c0_i32 = arith.constant 0 : i32
    %c0_i32_0 = arith.constant 0 : i32
    %c0_i32_1 = arith.constant 0 : i32
    return %c0_i32, %c0_i32_0 : i32, i32
  }
  func.func @transform_4(%arg0: i32) -> (i32, i32) {
    %c0_i32 = arith.constant 0 : i32
    %c0_i32_0 = arith.constant 0 : i32
    %c0_i32_1 = arith.constant 0 : i32
    return %c0_i32, %c0_i32_0 : i32, i32
  }
  func.func @transform_5(%arg0: i32) -> (i32, i32) {
    %c0_i32 = arith.constant 0 : i32
    %c0_i32_0 = arith.constant 0 : i32
    return %arg0, %c0_i32 : i32, i32
  }
}

</mosaic_0001>

<bundles_post_ra>
// kernel: tpu_custom_call.1
= control target key start
LH: loop header
LB: loop body
LE: loop exit
PB: predicated region body
PF: predicated region fallthrough
CT: control target
= control target key end

     0   :  { %10 = vsyncpa [#allocation3], 0  ;;  %s6347_s0 = inlined_call_operand.hbm [shape: f32[32,768], index: 0, kind: input, shape index: {}]   ;;  %s6348_s1 = inlined_call_operand.hbm [shape: f32[768,1024], index: 1, kind: input, shape index: {}]   ;;  %s6349_s2 = inlined_call_operand.hbm [shape: f32[1,1024], index: 2, kind: input, shape index: {}]   ;;  %s6350_s3 = inlined_call_operand.hbm [shape: f32[1024,768], index: 3, kind: input, shape index: {}]   ;;  %s6351_s4 = inlined_call_operand.hbm [shape: f32[1,768], index: 4, kind: input, shape index: {}]   ;;  %s6352_s5 = inlined_call_operand.hbm [shape: f32[32,768], index: 5, kind: output, shape index: {}]  }
   0x1   :  { %11 = vsyncpa [#allocation6], 0 }
   0x2   :  { %12 = vsyncpa [#allocation9], 0 }
   0x3   :  { %13 = vsyncpa [#allocation4], 0  ;;  %s5825_s18 = smov [#allocation5]   ;;  %s5685_s22 = scalar_lea.hbm %s6348_s1, 98304 }
   0x4   :  { %s31_s19 = sshll.u32 %s5825_s18, 4  ;;  %p5686_p0 = scmp.ne.s32.totalorder %s6348_s1, %s5685_s22  ;;  %s32_s19 = int_to_ptr.vmem [resolvable:$true] %s31_s19 }
   0x5   :  { %p5689_p1 = scmp.lt.u32.totalorder %s5685_s22, %s6348_s1 }
   0x7   :  { %p5691_p2 = pnand %p5689_p1, %p5686_p0 }
   0x9   :  { %5694 = shalt.err (!%p5691_p2)
}
   0xa   :  { %s5695_s27 = scalar_lea.vmem %s32_s19, 98304  ;;  %p5700_p4 = scmp.lt.s32.totalorder %s32_s19, %s32_s19 }
   0xb   :  { %p5696_p3 = scmp.ne.s32.totalorder %s32_s19, %s5695_s27  ;;  %p5701_p5 = scmp.lt.s32.totalorder %s5695_s27, %s5695_s27 }
   0xd   :  { %p5702_p6 = por %p5701_p5, %p5700_p4 }
   0xf   :  { %p5703_p7 = pnand %p5702_p6, %p5696_p3 }
  0x11   :  { %5706 = shalt.err (!%p5703_p7)
}
  0x12   :  { %s5826_s28 = smov 1024   ;;  %s5827_s29 = smov 64  }
  0x13   :  { %37 = dma.hbm_to_vmem [thread:$0]  %s6348_s1, 98304, %s32_s19, [#allocation6], %s5826_s28, %s5826_s28, %s5827_s29  }
  0x14   :  { %s5828_s7 = smov [#allocation8]   ;;  %s5829_s9 = smov [#allocation2]  }
  0x15   :  { %s53_s8 = sshll.u32 %s5828_s7, 4  ;;  %s19_s10 = sshll.u32 %s5829_s9, 4  ;;  %s54_s8 = int_to_ptr.vmem [resolvable:$true] %s53_s8  ;;  %s20_s10 = int_to_ptr.vmem [resolvable:$true] %s19_s10 }
  0x16   :  { %s5707_s13 = scalar_lea.hbm %s6350_s3, 98304 }
  0x17   :  { %p5708_p8 = scmp.ne.s32.totalorder %s6350_s3, %s5707_s13  ;;  %p5711_p9 = scmp.lt.u32.totalorder %s5707_s13, %s6350_s3 }
  0x19   :  { %p5713_p10 = pnand %p5711_p9, %p5708_p8 }
  0x1b   :  { %5716 = shalt.err (!%p5713_p10)
}
  0x1c   :  { %s5717_s1 = scalar_lea.vmem %s54_s8, 98304  ;;  %p5722_p12 = scmp.lt.s32.totalorder %s54_s8, %s54_s8 }
  0x1d   :  { %p5718_p11 = scmp.ne.s32.totalorder %s54_s8, %s5717_s1  ;;  %p5723_p13 = scmp.lt.s32.totalorder %s5717_s1, %s5717_s1 }
  0x1f   :  { %p5724_p0 = por %p5723_p13, %p5722_p12 }
  0x21   :  { %p5725_p1 = pnand %p5724_p0, %p5718_p11 }
  0x23   :  { %5728 = shalt.err (!%p5725_p1)
}
  0x24   :  { %s5830_s18 = smov 768   ;;  %s5831_s19 = smov 48  }
  0x25   :  { %59 = dma.hbm_to_vmem [thread:$0]  %s6350_s3, 98304, %s54_s8, [#allocation9], %s5830_s18, %s5830_s18, %s5831_s19  }
  0x26   :  { %s5729_s24 = scalar_lea.hbm %s6347_s0, 3072 }
  0x27   :  { %p5730_p2 = scmp.ne.s32.totalorder %s6347_s0, %s5729_s24  ;;  %p5733_p3 = scmp.lt.u32.totalorder %s5729_s24, %s6347_s0 }
  0x29   :  { %p5735_p4 = pnand %p5733_p3, %p5730_p2 }
  0x2b   :  { %5738 = shalt.err (!%p5735_p4)
}
  0x2c   :  { %s5739_s29 = scalar_lea.vmem %s20_s10, 3072  ;;  %p5744_p6 = scmp.lt.s32.totalorder %s20_s10, %s20_s10 }
  0x2d   :  { %p5740_p5 = scmp.ne.s32.totalorder %s20_s10, %s5739_s29  ;;  %p5745_p7 = scmp.lt.s32.totalorder %s5739_s29, %s5739_s29 }
  0x2f   :  { %p5746_p8 = por %p5745_p7, %p5744_p6 }
  0x31   :  { %p5747_p9 = pnand %p5746_p8, %p5740_p5 }
  0x33   :  { %5750 = shalt.err (!%p5747_p9)
}
  0x34   :  { %25 = dma.hbm_to_vmem [thread:$0]  %s6347_s0, 3072, %s20_s10, [#allocation3], %s5830_s18, %s5830_s18, %s5831_s19  }
  0x35   :  { %s5832_s6 = smov [#allocation7]   ;;  %s5833_s8 = smov [#allocation10]  }
  0x36   :  { %s44_s7 = sshll.u32 %s5832_s6, 4  ;;  %s66_s9 = sshll.u32 %s5833_s8, 4  ;;  %s45_s7 = int_to_ptr.vmem [resolvable:$true] %s44_s7  ;;  %s67_s9 = int_to_ptr.vmem [resolvable:$true] %s66_s9 }
  0x37   :  { %s5751_s13 = scalar_lea.hbm %s6349_s2, 128 }
  0x38   :  { %p5752_p10 = scmp.ne.s32.totalorder %s6349_s2, %s5751_s13  ;;  %p5755_p11 = scmp.lt.u32.totalorder %s5751_s13, %s6349_s2 }
  0x3a   :  { %p5757_p12 = pnand %p5755_p11, %p5752_p10 }
  0x3c   :  { %5760 = shalt.err (!%p5757_p12)
}
  0x3d   :  { %s5761_s0 = scalar_lea.vmem %s45_s7, 128  ;;  %p5766_p0 = scmp.lt.s32.totalorder %s45_s7, %s45_s7 }
  0x3e   :  { %p5762_p13 = scmp.ne.s32.totalorder %s45_s7, %s5761_s0  ;;  %p5767_p1 = scmp.lt.s32.totalorder %s5761_s0, %s5761_s0 }
  0x40   :  { %p5768_p2 = por %p5767_p1, %p5766_p0 }
  0x42   :  { %p5769_p3 = pnand %p5768_p2, %p5762_p13 }
  0x44   :  { %5772 = shalt.err (!%p5769_p3)
}
  0x45   :  { %47 = dma.hbm_to_vmem [thread:$0]  %s6349_s2, 128, %s45_s7, [#allocation6]  }
  0x46   :  { %s5773_s22 = scalar_lea.hbm %s6351_s4, 96 }
  0x47   :  { %p5774_p4 = scmp.ne.s32.totalorder %s6351_s4, %s5773_s22  ;;  %p5777_p5 = scmp.lt.u32.totalorder %s5773_s22, %s6351_s4 }
  0x49   :  { %p5779_p6 = pnand %p5777_p5, %p5774_p4 }
  0x4b   :  { %5782 = shalt.err (!%p5779_p6)
}
  0x4c   :  { %s5783_s27 = scalar_lea.vmem %s67_s9, 96  ;;  %p5788_p8 = scmp.lt.s32.totalorder %s67_s9, %s67_s9 }
  0x4d   :  { %p5784_p7 = scmp.ne.s32.totalorder %s67_s9, %s5783_s27  ;;  %p5789_p9 = scmp.lt.s32.totalorder %s5783_s27, %s5783_s27 }
  0x4f   :  { %p5790_p10 = por %p5789_p9, %p5788_p8 }
  0x51   :  { %p5791_p11 = pnand %p5790_p10, %p5784_p7 }
  0x53   :  { %5794 = shalt.err (!%p5791_p11)
}
  0x54   :  { %69 = dma.hbm_to_vmem [thread:$0]  %s6351_s4, 96, %s67_s9, [#allocation9]  }
  0x55   :  { %5817 = dma.done.wait [#allocation3], 3072  }
  0x56   :  { %5818 = vsyncadd [#allocation3], 4294964224 }
  0x57   :  { %5819 = dma.done.wait [#allocation6], 98432  }
  0x58   :  { %5820 = vsyncadd [#allocation6], 4294868864 }
  0x59   :  { %5821 = dma.done.wait [#allocation9], 98400  }
  0x5a   :  { %5822 = vsyncadd [#allocation9], 4294868896  ;;  %v110_v0 = vld [vmem:[#allocation5 + $0x8] sm:$0xff]  ;;  %v109_v2 = vld [vmem:[#allocation5] sm:$0xff]  ;;  %s5834_s4 = smov [#allocation11]  }
  0x5b   :  { %v118_v1 = vld [vmem:[#allocation5 + $0x48] sm:$0xff]  ;;  %v117_v4 = vld [vmem:[#allocation5 + $0x40] sm:$0xff]  ;;  %s3884_s29 = sshll.u32 %s5834_s4, 4  ;;  %s3885_s29 = int_to_ptr.vmem [resolvable:$true] %s3884_s29 }
  0x5c   :  { %v3898_v3 = vpack.c.bf16 %v118_v1, %v110_v0  ;;  %v126_v5 = vld [vmem:[#allocation5 + $0x88] sm:$0xff]  ;;  %v3900_v7 = vpack.c.bf16 %v117_v4, %v109_v2  ;;  %v125_v9 = vld [vmem:[#allocation5 + $0x80] sm:$0xff]  ;;  %s5795_s3 = scalar_lea.vmem %s3885_s29, 3072  ;;  %p5800_p13 = scmp.lt.s32.totalorder %s3885_s29, %s3885_s29 }
  0x5d   :  { %v134_v6 = vld [vmem:[#allocation5 + $0xc8] sm:$0xff]  ;;  %v133_v10 = vld [vmem:[#allocation5 + $0xc0] sm:$0xff]  ;;  %p5796_p12 = scmp.ne.s32.totalorder %s3885_s29, %s5795_s3  ;;  %p5801_p0 = scmp.lt.s32.totalorder %s5795_s3, %s5795_s3 }
  0x5e   :  { %v3902_v8 = vpack.c.bf16 %v134_v6, %v126_v5  ;;  %v142_v11 = vld [vmem:[#allocation5 + $0x108] sm:$0xff]  ;;  %3899 = vmatprep.subr.bf16.mxu1 %v3898_v3  ;;  %v3904_v13 = vpack.c.bf16 %v133_v10, %v125_v9  ;;  %v141_v15 = vld [vmem:[#allocation5 + $0x100] sm:$0xff] }
  0x5f   :  { %v150_v12 = vld [vmem:[#allocation5 + $0x148] sm:$0xff]  ;;  %3901 = vmatpush1.bf16.msra.mxu1 %v3900_v7  ;;  %v149_v16 = vld [vmem:[#allocation5 + $0x140] sm:$0xff]  ;;  %p5802_p1 = por %p5801_p0, %p5800_p13 }
  0x60   :  { %3903 = vmatprep.subr.bf16.mxu1 %v3902_v8  ;;  %v3906_v14 = vpack.c.bf16 %v150_v12, %v142_v11  ;;  %v158_v17 = vld [vmem:[#allocation5 + $0x188] sm:$0xff]  ;;  %v3908_v19 = vpack.c.bf16 %v149_v16, %v141_v15  ;;  %v157_v20 = vld [vmem:[#allocation5 + $0x180] sm:$0xff] }
  0x61   :  { %v166_v18 = vld [vmem:[#allocation5 + $0x1c8] sm:$0xff]  ;;  %v165_v21 = vld [vmem:[#allocation5 + $0x1c0] sm:$0xff]  ;;  %p5803_p2 = pnand %p5802_p1, %p5796_p12 }
  0x62   :  { %v3910_v22 = vpack.c.bf16 %v166_v18, %v158_v17  ;;  %v174_v23 = vld [vmem:[#allocation5 + $0x208] sm:$0xff]  ;;  %v621_v28 = vld [vmem:[#allocation5 + $0x1000] sm:$0xff]  ;;  %v3912_v31 = vpack.c.bf16 %v165_v21, %v157_v20 }
  0x63   :  { %3905 = vmatpush1.bf16.msra.mxu1 %v3904_v13  ;;  %v622_v24 = vld [vmem:[#allocation5 + $0x1008] sm:$0xff]  ;;  %v629_v29 = vld [vmem:[#allocation5 + $0x1040] sm:$0xff] }
  0x64   :  { %3907 = vmatprep.subr.bf16.mxu1 %v3906_v14  ;;  %v630_v25 = vld [vmem:[#allocation5 + $0x1048] sm:$0xff]  ;;  %v4028_v30 = vpack.c.bf16 %v629_v29, %v621_v28  ;;  %v637_v34 = vld [vmem:[#allocation5 + $0x1080] sm:$0xff] }
  0x65   :  { %v182_v26 = vld [vmem:[#allocation5 + $0x248] sm:$0xff]  ;;  %v4026_v27 = vpack.c.bf16 %v630_v25, %v622_v24  ;;  %v173_v36 = vld [vmem:[#allocation5 + $0x200] sm:$0xff] }
  0x66   :  { %v638_v32 = vld [vmem:[#allocation5 + $0x1088] sm:$0xff]  ;;  %v3914_v35 = vpack.c.bf16 %v182_v26, %v174_v23  ;;  %v181_v37 = vld [vmem:[#allocation5 + $0x240] sm:$0xff] }
  0x67   :  { %3909 = vmatpush1.bf16.msra.mxu1 %v3908_v19  ;;  %4027 = vmatprep.subr.bf16.mxu0 %v4026_v27  ;;  %v646_v33 = vld [vmem:[#allocation5 + $0x10c8] sm:$0xff]  ;;  %v645_v39 = vld [vmem:[#allocation5 + $0x10c0] sm:$0xff]  ;;  %v3916_v47 = vpack.c.bf16 %v181_v37, %v173_v36 }
  0x68   :  { %3911 = vmatprep.subr.bf16.mxu1 %v3910_v22  ;;  %4029 = vmatpush1.bf16.msra.mxu0 %v4028_v30  ;;  %v4030_v38 = vpack.c.bf16 %v646_v33, %v638_v32  ;;  %v190_v40 = vld [vmem:[#allocation5 + $0x288] sm:$0xff]  ;;  %v4032_v42 = vpack.c.bf16 %v645_v39, %v637_v34  ;;  %v653_v45 = vld [vmem:[#allocation5 + $0x1100] sm:$0xff] }
  0x69   :  { %v198_v41 = vld [vmem:[#allocation5 + $0x2c8] sm:$0xff]  ;;  %v661_v46 = vld [vmem:[#allocation5 + $0x1140] sm:$0xff] }
  0x6a   :  { %v654_v43 = vld [vmem:[#allocation5 + $0x1108] sm:$0xff]  ;;  %4031 = vmatprep.subr.bf16.mxu0 %v4030_v38  ;;  %v189_v48 = vld [vmem:[#allocation5 + $0x280] sm:$0xff]  ;;  %v3918_v51 = vpack.c.bf16 %v198_v41, %v190_v40  ;;  %v4036_v53 = vpack.c.bf16 %v661_v46, %v653_v45 }
  0x6b   :  { %v662_v44 = vld [vmem:[#allocation5 + $0x1148] sm:$0xff]  ;;  %3913 = vmatpush1.bf16.msra.mxu1 %v3912_v31  ;;  %v197_v49 = vld [vmem:[#allocation5 + $0x2c0] sm:$0xff] }
  0x6c   :  { %v4034_v50 = vpack.c.bf16 %v662_v44, %v654_v43  ;;  %3915 = vmatprep.subr.bf16.mxu1 %v3914_v35  ;;  %v206_v52 = vld [vmem:[#allocation5 + $0x308] sm:$0xff]  ;;  %4033 = vmatpush1.bf16.msra.mxu0 %v4032_v42  ;;  %v669_v58 = vld [vmem:[#allocation5 + $0x1180] sm:$0xff]  ;;  %v3920_v60 = vpack.c.bf16 %v197_v49, %v189_v48 }
  0x6d   :  { %v670_v54 = vld [vmem:[#allocation5 + $0x1188] sm:$0xff]  ;;  %v677_v59 = vld [vmem:[#allocation5 + $0x11c0] sm:$0xff] }
  0x6e   :  { %v678_v55 = vld [vmem:[#allocation5 + $0x11c8] sm:$0xff]  ;;  %4035 = vmatprep.subr.bf16.mxu0 %v4034_v50  ;;  %v205_v0 = vld [vmem:[#allocation5 + $0x300] sm:$0xff]  ;;  %v4040_v3 = vpack.c.bf16 %v677_v59, %v669_v58 }
  0x6f   :  { %v214_v56 = vld [vmem:[#allocation5 + $0x348] sm:$0xff]  ;;  %v4038_v57 = vpack.c.bf16 %v678_v55, %v670_v54  ;;  %3917 = vmatpush1.bf16.msra.mxu1 %v3916_v47  ;;  %v213_v1 = vld [vmem:[#allocation5 + $0x340] sm:$0xff] }
  0x70   :  { %v686_v61 = vld [vmem:[#allocation5 + $0x1208] sm:$0xff]  ;;  %3919 = vmatprep.subr.bf16.mxu1 %v3918_v51  ;;  %v3922_v63 = vpack.c.bf16 %v214_v56, %v206_v52  ;;  %4037 = vmatpush1.bf16.msra.mxu0 %v4036_v53  ;;  %v685_v6 = vld [vmem:[#allocation5 + $0x1200] sm:$0xff]  ;;  %v3924_v10 = vpack.c.bf16 %v213_v1, %v205_v0 }
  0x71   :  { %v694_v62 = vld [vmem:[#allocation5 + $0x1248] sm:$0xff]  ;;  %4039 = vmatprep.subr.bf16.mxu0 %v4038_v57  ;;  %v693_v7 = vld [vmem:[#allocation5 + $0x1240] sm:$0xff] }
  0x72   :  { %v222_v2 = vld [vmem:[#allocation5 + $0x388] sm:$0xff]  ;;  %v4042_v5 = vpack.c.bf16 %v694_v62, %v686_v61  ;;  %v221_v12 = vld [vmem:[#allocation5 + $0x380] sm:$0xff]  ;;  %v4044_v15 = vpack.c.bf16 %v693_v7, %v685_v6 }
  0x73   :  { %v230_v4 = vld [vmem:[#allocation5 + $0x3c8] sm:$0xff]  ;;  %3921 = vmatpush1.bf16.msra.mxu1 %v3920_v60  ;;  %v229_v13 = vld [vmem:[#allocation5 + $0x3c0] sm:$0xff] }
  0x74   :  { %v702_v8 = vld [vmem:[#allocation5 + $0x1288] sm:$0xff]  ;;  %3923 = vmatprep.subr.bf16.mxu1 %v3922_v63  ;;  %v3926_v11 = vpack.c.bf16 %v230_v4, %v222_v2  ;;  %4041 = vmatpush1.bf16.msra.mxu0 %v4040_v3  ;;  %v701_v18 = vld [vmem:[#allocation5 + $0x1280] sm:$0xff]  ;;  %v3928_v22 = vpack.c.bf16 %v229_v13, %v221_v12 }
  0x75   :  { %v710_v9 = vld [vmem:[#allocation5 + $0x12c8] sm:$0xff]  ;;  %4043 = vmatprep.subr.bf16.mxu0 %v4042_v5  ;;  %v709_v19 = vld [vmem:[#allocation5 + $0x12c0] sm:$0xff] }
  0x76   :  { %v238_v14 = vld [vmem:[#allocation5 + $0x408] sm:$0xff]  ;;  %v4046_v17 = vpack.c.bf16 %v710_v9, %v702_v8  ;;  %v237_v24 = vld [vmem:[#allocation5 + $0x400] sm:$0xff]  ;;  %v4048_v27 = vpack.c.bf16 %v709_v19, %v701_v18 }
  0x77   :  { %v246_v16 = vld [vmem:[#allocation5 + $0x448] sm:$0xff]  ;;  %3925 = vmatpush1.bf16.msra.mxu1 %v3924_v10  ;;  %v245_v25 = vld [vmem:[#allocation5 + $0x440] sm:$0xff] }
  0x78   :  { %v718_v20 = vld [vmem:[#allocation5 + $0x1308] sm:$0xff]  ;;  %3927 = vmatprep.subr.bf16.mxu1 %v3926_v11  ;;  %v3930_v23 = vpack.c.bf16 %v246_v16, %v238_v14  ;;  %4045 = vmatpush1.bf16.msra.mxu0 %v4044_v15  ;;  %v717_v30 = vld [vmem:[#allocation5 + $0x1300] sm:$0xff]  ;;  %v3932_v34 = vpack.c.bf16 %v245_v25, %v237_v24 }
  0x79   :  { %v726_v21 = vld [vmem:[#allocation5 + $0x1348] sm:$0xff]  ;;  %4047 = vmatprep.subr.bf16.mxu0 %v4046_v17  ;;  %v725_v31 = vld [vmem:[#allocation5 + $0x1340] sm:$0xff] }
  0x7a   :  { %v254_v26 = vld [vmem:[#allocation5 + $0x488] sm:$0xff]  ;;  %v4050_v29 = vpack.c.bf16 %v726_v21, %v718_v20  ;;  %v253_v35 = vld [vmem:[#allocation5 + $0x480] sm:$0xff]  ;;  %v4052_v40 = vpack.c.bf16 %v725_v31, %v717_v30 }
  0x7b   :  { %v262_v28 = vld [vmem:[#allocation5 + $0x4c8] sm:$0xff]  ;;  %3929 = vmatpush1.bf16.msra.mxu1 %v3928_v22  ;;  %v261_v37 = vld [vmem:[#allocation5 + $0x4c0] sm:$0xff] }
  0x7c   :  { %v734_v32 = vld [vmem:[#allocation5 + $0x1388] sm:$0xff]  ;;  %3931 = vmatprep.subr.bf16.mxu1 %v3930_v23  ;;  %v3934_v36 = vpack.c.bf16 %v262_v28, %v254_v26  ;;  %4049 = vmatpush1.bf16.msra.mxu0 %v4048_v27  ;;  %v733_v42 = vld [vmem:[#allocation5 + $0x1380] sm:$0xff]  ;;  %v3936_v47 = vpack.c.bf16 %v261_v37, %v253_v35 }
  0x7d   :  { %v742_v33 = vld [vmem:[#allocation5 + $0x13c8] sm:$0xff]  ;;  %4051 = vmatprep.subr.bf16.mxu0 %v4050_v29  ;;  %v741_v43 = vld [vmem:[#allocation5 + $0x13c0] sm:$0xff] }
  0x7e   :  { %v270_v38 = vld [vmem:[#allocation5 + $0x508] sm:$0xff]  ;;  %v4054_v41 = vpack.c.bf16 %v742_v33, %v734_v32  ;;  %v269_v49 = vld [vmem:[#allocation5 + $0x500] sm:$0xff]  ;;  %v4056_v52 = vpack.c.bf16 %v741_v43, %v733_v42 }
  0x7f   :  { %v278_v39 = vld [vmem:[#allocation5 + $0x548] sm:$0xff]  ;;  %3933 = vmatpush1.bf16.msra.mxu1 %v3932_v34  ;;  %v277_v50 = vld [vmem:[#allocation5 + $0x540] sm:$0xff] }
  0x80   :  { %v5931_v44 = vld [vmem:[#allocation2 + $0x8] sm:$0xff]  ;;  %3935 = vmatprep.subr.bf16.mxu1 %v3934_v36  ;;  %v3938_v48 = vpack.c.bf16 %v278_v39, %v270_v38  ;;  %4053 = vmatpush1.bf16.msra.mxu0 %v4052_v40  ;;  %v749_v55 = vld [vmem:[#allocation5 + $0x1400] sm:$0xff]  ;;  %v3940_v59 = vpack.c.bf16 %v277_v50, %v269_v49 }
  0x81   :  { %v750_v45 = vld [vmem:[#allocation5 + $0x1408] sm:$0xff]  ;;  %983 = vmatprep.mubr.f32.mxu1 %v5931_v44  ;;  %4055 = vmatprep.subr.bf16.mxu0 %v4054_v41  ;;  %v757_v56 = vld [vmem:[#allocation5 + $0x1440] sm:$0xff] }
  0x82   :  { %v758_v46 = vld [vmem:[#allocation5 + $0x1448] sm:$0xff]  ;;  %v285_v61 = vld [vmem:[#allocation5 + $0x580] sm:$0xff]  ;;  %v4060_v0 = vpack.c.bf16 %v757_v56, %v749_v55 }
  0x83   :  { %v286_v51 = vld [vmem:[#allocation5 + $0x588] sm:$0xff]  ;;  %v4058_v54 = vpack.c.bf16 %v758_v46, %v750_v45  ;;  %3937 = vmatpush1.bf16.msra.mxu1 %v3936_v47  ;;  %v293_v62 = vld [vmem:[#allocation5 + $0x5c0] sm:$0xff] }
  0x84   :  { %v294_v53 = vld [vmem:[#allocation5 + $0x5c8] sm:$0xff]  ;;  %3939 = vmatprep.subr.bf16.mxu1 %v3938_v48  ;;  %4057 = vmatpush1.bf16.msra.mxu0 %v4056_v52  ;;  %v765_v3 = vld [vmem:[#allocation5 + $0x1480] sm:$0xff]  ;;  %v3944_v7 = vpack.c.bf16 %v293_v62, %v285_v61 }
  0x85   :  { %v766_v57 = vld [vmem:[#allocation5 + $0x1488] sm:$0xff]  ;;  %v3942_v60 = vpack.c.bf16 %v294_v53, %v286_v51  ;;  %4059 = vmatprep.subr.bf16.mxu0 %v4058_v54  ;;  %v773_v4 = vld [vmem:[#allocation5 + $0x14c0] sm:$0xff] }
  0x86   :  { %v774_v58 = vld [vmem:[#allocation5 + $0x14c8] sm:$0xff]  ;;  %v301_v9 = vld [vmem:[#allocation5 + $0x600] sm:$0xff]  ;;  %v4064_v12 = vpack.c.bf16 %v773_v4, %v765_v3 }
  0x87   :  { %v302_v63 = vld [vmem:[#allocation5 + $0x608] sm:$0xff]  ;;  %v4062_v2 = vpack.c.bf16 %v774_v58, %v766_v57  ;;  %3941 = vmatpush1.bf16.msra.mxu1 %v3940_v59  ;;  %v309_v10 = vld [vmem:[#allocation5 + $0x640] sm:$0xff] }
  0x88   :  { %v310_v1 = vld [vmem:[#allocation5 + $0x648] sm:$0xff]  ;;  %3943 = vmatprep.subr.bf16.mxu1 %v3942_v60  ;;  %4061 = vmatpush1.bf16.msra.mxu0 %v4060_v0  ;;  %v781_v15 = vld [vmem:[#allocation5 + $0x1500] sm:$0xff]  ;;  %v3948_v19 = vpack.c.bf16 %v309_v10, %v301_v9 }
  0x89   :  { %v782_v5 = vld [vmem:[#allocation5 + $0x1508] sm:$0xff]  ;;  %v3946_v8 = vpack.c.bf16 %v310_v1, %v302_v63  ;;  %4063 = vmatprep.subr.bf16.mxu0 %v4062_v2  ;;  %v789_v16 = vld [vmem:[#allocation5 + $0x1540] sm:$0xff] }
  0x8a   :  { %v790_v6 = vld [vmem:[#allocation5 + $0x1548] sm:$0xff]  ;;  %v317_v21 = vld [vmem:[#allocation5 + $0x680] sm:$0xff]  ;;  %v4068_v24 = vpack.c.bf16 %v789_v16, %v781_v15 }
  0x8b   :  { %v318_v11 = vld [vmem:[#allocation5 + $0x688] sm:$0xff]  ;;  %v4066_v14 = vpack.c.bf16 %v790_v6, %v782_v5  ;;  %3945 = vmatpush1.bf16.msra.mxu1 %v3944_v7  ;;  %v325_v22 = vld [vmem:[#allocation5 + $0x6c0] sm:$0xff] }
  0x8c   :  { %v326_v13 = vld [vmem:[#allocation5 + $0x6c8] sm:$0xff]  ;;  %3947 = vmatprep.subr.bf16.mxu1 %v3946_v8  ;;  %4065 = vmatpush1.bf16.msra.mxu0 %v4064_v12  ;;  %v797_v27 = vld [vmem:[#allocation5 + $0x1580] sm:$0xff]  ;;  %v3952_v31 = vpack.c.bf16 %v325_v22, %v317_v21 }
  0x8d   :  { %v798_v17 = vld [vmem:[#allocation5 + $0x1588] sm:$0xff]  ;;  %v3950_v20 = vpack.c.bf16 %v326_v13, %v318_v11  ;;  %4067 = vmatprep.subr.bf16.mxu0 %v4066_v14  ;;  %v805_v28 = vld [vmem:[#allocation5 + $0x15c0] sm:$0xff] }
  0x8e   :  { %v806_v18 = vld [vmem:[#allocation5 + $0x15c8] sm:$0xff]  ;;  %v333_v34 = vld [vmem:[#allocation5 + $0x700] sm:$0xff]  ;;  %v4072_v37 = vpack.c.bf16 %v805_v28, %v797_v27  ;;  %v5937_v28 = vld [vmem:[#allocation2 + $0x38] sm:$0xff] }
  0x8f   :  { %v334_v23 = vld [vmem:[#allocation5 + $0x708] sm:$0xff]  ;;  %v4070_v26 = vpack.c.bf16 %v806_v18, %v798_v17  ;;  %3949 = vmatpush1.bf16.msra.mxu1 %v3948_v19  ;;  %v341_v35 = vld [vmem:[#allocation5 + $0x740] sm:$0xff] }
  0x90   :  { %v342_v25 = vld [vmem:[#allocation5 + $0x748] sm:$0xff]  ;;  %3951 = vmatprep.subr.bf16.mxu1 %v3950_v20  ;;  %4069 = vmatpush1.bf16.msra.mxu0 %v4068_v24  ;;  %v813_v40 = vld [vmem:[#allocation5 + $0x1600] sm:$0xff]  ;;  %v3956_v45 = vpack.c.bf16 %v341_v35, %v333_v34 }
  0x91   :  { %v814_v29 = vld [vmem:[#allocation5 + $0x1608] sm:$0xff]  ;;  %v3954_v33 = vpack.c.bf16 %v342_v25, %v334_v23  ;;  %4071 = vmatprep.subr.bf16.mxu0 %v4070_v26  ;;  %v821_v41 = vld [vmem:[#allocation5 + $0x1640] sm:$0xff] }
  0x92   :  { %v822_v30 = vld [vmem:[#allocation5 + $0x1648] sm:$0xff]  ;;  %v349_v47 = vld [vmem:[#allocation5 + $0x780] sm:$0xff]  ;;  %v4076_v50 = vpack.c.bf16 %v821_v41, %v813_v40 }
  0x93   :  { %v90_v32 = vld [vmem:[#allocation2 + $0x28] sm:$0xff]  ;;  %v4074_v39 = vpack.c.bf16 %v822_v30, %v814_v29  ;;  %3953 = vmatpush1.bf16.msra.mxu1 %v3952_v31  ;;  %v357_v48 = vld [vmem:[#allocation5 + $0x7c0] sm:$0xff]  ;;  %v5940_v31 = vld [vmem:[#allocation2 + $0x30] sm:$0xff] }
  0x94   :  { %v350_v36 = vld [vmem:[#allocation5 + $0x788] sm:$0xff]  ;;  %1161 = vmatprep.mubr.f32.mxu0 %v90_v32  ;;  %3955 = vmatprep.subr.bf16.mxu1 %v3954_v33  ;;  %v829_v53 = vld [vmem:[#allocation5 + $0x1680] sm:$0xff]  ;;  %v3960_v57 = vpack.c.bf16 %v357_v48, %v349_v47 }
  0x95   :  { %v358_v38 = vld [vmem:[#allocation5 + $0x7c8] sm:$0xff]  ;;  %4073 = vmatpush1.bf16.msra.mxu0 %v4072_v37  ;;  %v837_v54 = vld [vmem:[#allocation5 + $0x16c0] sm:$0xff] }
  0x96   :  { %v830_v42 = vld [vmem:[#allocation5 + $0x1688] sm:$0xff]  ;;  %v3958_v46 = vpack.c.bf16 %v358_v38, %v350_v36  ;;  %4075 = vmatprep.subr.bf16.mxu0 %v4074_v39  ;;  %v365_v59 = vld [vmem:[#allocation5 + $0x800] sm:$0xff]  ;;  %v4080_v62 = vpack.c.bf16 %v837_v54, %v829_v53 }
  0x97   :  { %v838_v43 = vld [vmem:[#allocation5 + $0x16c8] sm:$0xff]  ;;  %3957 = vmatpush1.bf16.msra.mxu1 %v3956_v45  ;;  %v373_v60 = vld [vmem:[#allocation5 + $0x840] sm:$0xff] }
  0x98   :  { %v366_v49 = vld [vmem:[#allocation5 + $0x808] sm:$0xff]  ;;  %v4078_v52 = vpack.c.bf16 %v838_v43, %v830_v42  ;;  %3959 = vmatprep.subr.bf16.mxu1 %v3958_v46  ;;  %v845_v1 = vld [vmem:[#allocation5 + $0x1700] sm:$0xff]  ;;  %v3964_v6 = vpack.c.bf16 %v373_v60, %v365_v59 }
  0x99   :  { %v374_v51 = vld [vmem:[#allocation5 + $0x848] sm:$0xff]  ;;  %4077 = vmatpush1.bf16.msra.mxu0 %v4076_v50  ;;  %v853_v2 = vld [vmem:[#allocation5 + $0x1740] sm:$0xff] }
  0x9a   :  { %v846_v55 = vld [vmem:[#allocation5 + $0x1708] sm:$0xff]  ;;  %v3962_v58 = vpack.c.bf16 %v374_v51, %v366_v49  ;;  %4079 = vmatprep.subr.bf16.mxu0 %v4078_v52  ;;  %v5934_v5 = vld [vmem:[#allocation2] sm:$0xff]  ;;  %v4084_v11 = vpack.c.bf16 %v853_v2, %v845_v1  ;;  %v5948_v49 = vld [vmem:[#allocation2 + $0x98] sm:$0xff] }
  0x9b   :  { %v854_v56 = vld [vmem:[#allocation5 + $0x1748] sm:$0xff]  ;;  %3961 = vmatpush1.bf16.msra.mxu1 %v3960_v57  ;;  %v381_v8 = vld [vmem:[#allocation5 + $0x880] sm:$0xff] }
  0x9c   :  { %v382_v61 = vld [vmem:[#allocation5 + $0x888] sm:$0xff]  ;;  %v4082_v0 = vpack.c.bf16 %v854_v56, %v846_v55  ;;  %3963 = vmatprep.subr.bf16.mxu1 %v3962_v58  ;;  %v389_v9 = vld [vmem:[#allocation5 + $0x8c0] sm:$0xff] }
  0x9d   :  { %v390_v63 = vld [vmem:[#allocation5 + $0x8c8] sm:$0xff]  ;;  %4081 = vmatpush1.bf16.msra.mxu0 %v4080_v62  ;;  %v861_v14 = vld [vmem:[#allocation5 + $0x1780] sm:$0xff]  ;;  %v3968_v18 = vpack.c.bf16 %v389_v9, %v381_v8 }
  0x9e   :  { %v862_v3 = vld [vmem:[#allocation5 + $0x1788] sm:$0xff]  ;;  %v3966_v7 = vpack.c.bf16 %v390_v63, %v382_v61  ;;  %4083 = vmatprep.subr.bf16.mxu0 %v4082_v0  ;;  %v869_v15 = vld [vmem:[#allocation5 + $0x17c0] sm:$0xff]  ;;  %984 = vmatmul.mubr.f32.vlgmr.msra.gmra.mrb[0].mxu1 %v5934_v5  ;;  %v5952_v61 = vld [vmem:[#allocation2 + $0x90] sm:$0xff] }
  0x9f   :  { %v870_v4 = vld [vmem:[#allocation5 + $0x17c8] sm:$0xff]  ;;  %3965 = vmatpush1.bf16.msra.mxu1 %v3964_v6  ;;  %v397_v19 = vld [vmem:[#allocation5 + $0x900] sm:$0xff]  ;;  %v4088_v24 = vpack.c.bf16 %v869_v15, %v861_v14  ;;  %989 = vmatprep.mubr.f32.mxu1 %v5937_v28  ;;  %v5954_v63 = vld [vmem:[#allocation2 + $0x18] sm:$0xff] }
  0xa0   :  { %v398_v10 = vld [vmem:[#allocation5 + $0x908] sm:$0xff]  ;;  %v4086_v13 = vpack.c.bf16 %v870_v4, %v862_v3  ;;  %3967 = vmatprep.subr.bf16.mxu1 %v3966_v7  ;;  %v405_v21 = vld [vmem:[#allocation5 + $0x940] sm:$0xff] }
  0xa1   :  { %v406_v12 = vld [vmem:[#allocation5 + $0x948] sm:$0xff]  ;;  %4085 = vmatpush1.bf16.msra.mxu0 %v4084_v11  ;;  %v113_v26 = vld [vmem:[#allocation5 + $0x20] sm:$0xff]  ;;  %v3972_v32 = vpack.c.bf16 %v405_v21, %v397_v19  ;;  %v96_v19 = vld [vmem:[#allocation2 + $0x58] sm:$0xff] }
  0xa2   :  { %v114_v16 = vld [vmem:[#allocation5 + $0x28] sm:$0xff]  ;;  %v3970_v20 = vpack.c.bf16 %v406_v12, %v398_v10  ;;  %4087 = vmatprep.subr.bf16.mxu0 %v4086_v13  ;;  %v121_v27 = vld [vmem:[#allocation5 + $0x60] sm:$0xff]  ;;  %990 = vmatmul.mubr.f32.gmra.mrb[2].mxu1 %v5940_v31 }
  0xa3   :  { %v122_v17 = vld [vmem:[#allocation5 + $0x68] sm:$0xff]  ;;  %3969 = vmatpush1.bf16.msra.mxu1 %v3968_v18  ;;  %v413_v33 = vld [vmem:[#allocation5 + $0x980] sm:$0xff]  ;;  %v4284_v38 = vpack.c.bf16 %v121_v27, %v113_v26 }
  0xa4   :  { %v414_v22 = vld [vmem:[#allocation5 + $0x988] sm:$0xff]  ;;  %v4282_v25 = vpack.c.bf16 %v122_v17, %v114_v16  ;;  %v421_v34 = vld [vmem:[#allocation5 + $0x9c0] sm:$0xff]  ;;  %3971 = vmatprep.subr.bf16.mxu1 %v3970_v20 }
  0xa5   :  { %v422_v23 = vld [vmem:[#allocation5 + $0x9c8] sm:$0xff]  ;;  %4089 = vmatpush1.bf16.msra.mxu0 %v4088_v24  ;;  %v89_v37 = vld [vmem:[#allocation2 + $0x20] sm:$0xff]  ;;  %v3976_v48 = vpack.c.bf16 %v421_v34, %v413_v33 }
  0xa6   :  { %v130_v29 = vld [vmem:[#allocation5 + $0xa8] sm:$0xff]  ;;  %v3974_v35 = vpack.c.bf16 %v422_v23, %v414_v22  ;;  %4283 = vmatprep.subr.bf16.mxu0 %v4282_v25  ;;  %v129_v42 = vld [vmem:[#allocation5 + $0xa0] sm:$0xff]  ;;  %v95_v23 = vld [vmem:[#allocation2 + $0x50] sm:$0xff] }
  0xa7   :  { %v138_v30 = vld [vmem:[#allocation5 + $0xe8] sm:$0xff]  ;;  %v137_v43 = vld [vmem:[#allocation5 + $0xe0] sm:$0xff]  ;;  %3973 = vmatpush1.bf16.msra.mxu1 %v3972_v32 }
  0xa8   :  { %v430_v36 = vld [vmem:[#allocation5 + $0xa08] sm:$0xff]  ;;  %v4286_v41 = vpack.c.bf16 %v138_v30, %v130_v29  ;;  %v5946_v47 = vld [vmem:[#allocation2 + $0x60] sm:$0xff]  ;;  %1162 = vmatmul.mubr.f32.vlgmr.msra.gmra.mrb[0].mxu0 %v89_v37  ;;  %3975 = vmatprep.subr.bf16.mxu1 %v3974_v35  ;;  %v4288_v54 = vpack.c.bf16 %v137_v43, %v129_v42 }
  0xa9   :  { %v5942_v39 = vld [vmem:[#allocation2 + $0x68] sm:$0xff]  ;;  %v429_v51 = vld [vmem:[#allocation5 + $0xa00] sm:$0xff]  ;;  %4285 = vmatpush1.bf16.msra.mxu0 %v4284_v38  ;;  %1167 = vmatprep.mubr.f32.mxu0 %v96_v19 }
  0xaa   :  { %v438_v40 = vld [vmem:[#allocation5 + $0xa48] sm:$0xff]  ;;  %995 = vmatprep.mubr.f32.mxu1 %v5942_v39  ;;  %v437_v52 = vld [vmem:[#allocation5 + $0xa40] sm:$0xff]  ;;  %4287 = vmatprep.subr.bf16.mxu0 %v4286_v41 }
  0xab   :  { %v146_v45 = vld [vmem:[#allocation5 + $0x128] sm:$0xff]  ;;  %v3978_v50 = vpack.c.bf16 %v438_v40, %v430_v36  ;;  %v145_v57 = vld [vmem:[#allocation5 + $0x120] sm:$0xff]  ;;  %996 = vmatmul.mubr.f32.gmra.mrb[4].mxu1 %v5946_v47  ;;  %v3980_v62 = vpack.c.bf16 %v437_v52, %v429_v51 }
  0xac   :  { %v154_v46 = vld [vmem:[#allocation5 + $0x168] sm:$0xff]  ;;  %v153_v58 = vld [vmem:[#allocation5 + $0x160] sm:$0xff]  ;;  %1001 = vmatprep.mubr.f32.mxu1 %v5948_v49  ;;  %3977 = vmatpush1.bf16.msra.mxu1 %v3976_v48 }
  0xad   :  { %v446_v53 = vld [vmem:[#allocation5 + $0xa88] sm:$0xff]  ;;  %v4290_v56 = vpack.c.bf16 %v154_v46, %v146_v45  ;;  %3979 = vmatprep.subr.bf16.mxu1 %v3978_v50  ;;  %v445_v1 = vld [vmem:[#allocation5 + $0xa80] sm:$0xff]  ;;  %4289 = vmatpush1.bf16.msra.mxu0 %v4288_v54  ;;  %v4292_v4 = vpack.c.bf16 %v153_v58, %v145_v57  ;;  %v107_v57 = vld [vmem:[#allocation2 + $0xb0] sm:$0xff] }
  0xae   :  { %v454_v55 = vld [vmem:[#allocation5 + $0xac8] sm:$0xff]  ;;  %v453_v2 = vld [vmem:[#allocation5 + $0xac0] sm:$0xff]  ;;  %1168 = vmatmul.mubr.f32.gmra.mrb[2].mxu0 %v95_v23 }
  0xaf   :  { %v162_v59 = vld [vmem:[#allocation5 + $0x1a8] sm:$0xff]  ;;  %v3982_v0 = vpack.c.bf16 %v454_v55, %v446_v53  ;;  %4291 = vmatprep.subr.bf16.mxu0 %v4290_v56  ;;  %v161_v8 = vld [vmem:[#allocation5 + $0x1a0] sm:$0xff]  ;;  %1002 = vmatmul.mubr.f32.gmra.mrb[6].mxu1 %v5952_v61  ;;  %v3984_v12 = vpack.c.bf16 %v453_v2, %v445_v1  ;;  %v108_v53 = vld [vmem:[#allocation2 + $0xb8] sm:$0xff] }
  0xb0   :  { %v170_v60 = vld [vmem:[#allocation5 + $0x1e8] sm:$0xff]  ;;  %v169_v9 = vld [vmem:[#allocation5 + $0x1e0] sm:$0xff]  ;;  %1072 = vmatprep.mubr.f32.mxu1 %v5954_v63  ;;  %3981 = vmatpush1.bf16.msra.mxu1 %v3980_v62 }
  0xb1   :  { %v462_v3 = vld [vmem:[#allocation5 + $0xb08] sm:$0xff]  ;;  %v4294_v7 = vpack.c.bf16 %v170_v60, %v162_v59  ;;  %v461_v13 = vld [vmem:[#allocation5 + $0xb00] sm:$0xff]  ;;  %3983 = vmatprep.subr.bf16.mxu1 %v3982_v0  ;;  %4293 = vmatpush1.bf16.msra.mxu0 %v4292_v4  ;;  %v4296_v18 = vpack.c.bf16 %v169_v9, %v161_v8 }
  0xb2   :  { %v470_v6 = vld [vmem:[#allocation5 + $0xb48] sm:$0xff]  ;;  %v469_v14 = vld [vmem:[#allocation5 + $0xb40] sm:$0xff] }
  0xb3   :  { %v178_v10 = vld [vmem:[#allocation5 + $0x228] sm:$0xff]  ;;  %v3986_v15 = vpack.c.bf16 %v470_v6, %v462_v3  ;;  %4295 = vmatprep.subr.bf16.mxu0 %v4294_v7  ;;  %v177_v21 = vld [vmem:[#allocation5 + $0x220] sm:$0xff]  ;;  %v3988_v26 = vpack.c.bf16 %v469_v14, %v461_v13 }
  0xb4   :  { %v186_v11 = vld [vmem:[#allocation5 + $0x268] sm:$0xff]  ;;  %v185_v22 = vld [vmem:[#allocation5 + $0x260] sm:$0xff]  ;;  %3985 = vmatpush1.bf16.msra.mxu1 %v3984_v12 }
  0xb5   :  { %v478_v16 = vld [vmem:[#allocation5 + $0xb88] sm:$0xff]  ;;  %v4298_v20 = vpack.c.bf16 %v186_v11, %v178_v10  ;;  %v477_v27 = vld [vmem:[#allocation5 + $0xb80] sm:$0xff]  ;;  %3987 = vmatprep.subr.bf16.mxu1 %v3986_v15  ;;  %4297 = vmatpush1.bf16.msra.mxu0 %v4296_v18  ;;  %v4300_v34 = vpack.c.bf16 %v185_v22, %v177_v21 }
  0xb6   :  { %v486_v17 = vld [vmem:[#allocation5 + $0xbc8] sm:$0xff]  ;;  %v485_v29 = vld [vmem:[#allocation5 + $0xbc0] sm:$0xff] }
  0xb7   :  { %v194_v24 = vld [vmem:[#allocation5 + $0x2a8] sm:$0xff]  ;;  %v3990_v30 = vpack.c.bf16 %v486_v17, %v478_v16  ;;  %4299 = vmatprep.subr.bf16.mxu0 %v4298_v20  ;;  %v193_v37 = vld [vmem:[#allocation5 + $0x2a0] sm:$0xff]  ;;  %v3992_v43 = vpack.c.bf16 %v485_v29, %v477_v27 }
  0xb8   :  { %v202_v25 = vld [vmem:[#allocation5 + $0x2e8] sm:$0xff]  ;;  %v201_v38 = vld [vmem:[#allocation5 + $0x2e0] sm:$0xff]  ;;  %3989 = vmatpush1.bf16.msra.mxu1 %v3988_v26 }
  0xb9   :  { %v494_v32 = vld [vmem:[#allocation5 + $0xc08] sm:$0xff]  ;;  %v4302_v36 = vpack.c.bf16 %v202_v25, %v194_v24  ;;  %v101_v40 = vld [vmem:[#allocation2 + $0x80] sm:$0xff]  ;;  %3991 = vmatprep.subr.bf16.mxu1 %v3990_v30  ;;  %4301 = vmatpush1.bf16.msra.mxu0 %v4300_v34  ;;  %v4304_v52 = vpack.c.bf16 %v201_v38, %v193_v37 }
  0xba   :  { %v502_v33 = vld [vmem:[#allocation5 + $0xc48] sm:$0xff]  ;;  %v493_v45 = vld [vmem:[#allocation5 + $0xc00] sm:$0xff] }
  0xbb   :  { %v102_v35 = vld [vmem:[#allocation2 + $0x88] sm:$0xff]  ;;  %v501_v46 = vld [vmem:[#allocation5 + $0xc40] sm:$0xff]  ;;  %v3994_v48 = vpack.c.bf16 %v502_v33, %v494_v32  ;;  %4303 = vmatprep.subr.bf16.mxu0 %v4302_v36 }
  0xbc   :  { %1173 = vmatprep.mubr.f32.mxu0 %v102_v35  ;;  %v210_v41 = vld [vmem:[#allocation5 + $0x328] sm:$0xff]  ;;  %v209_v55 = vld [vmem:[#allocation5 + $0x320] sm:$0xff]  ;;  %3993 = vmatpush1.bf16.msra.mxu1 %v3992_v43  ;;  %v3996_v60 = vpack.c.bf16 %v501_v46, %v493_v45 }
  0xbd   :  { %v218_v42 = vld [vmem:[#allocation5 + $0x368] sm:$0xff]  ;;  %1174 = vmatmul.mubr.f32.gmra.mrb[4].mxu0 %v101_v40  ;;  %v217_v56 = vld [vmem:[#allocation5 + $0x360] sm:$0xff]  ;;  %3995 = vmatprep.subr.bf16.mxu1 %v3994_v48 }
  0xbe   :  { %v510_v50 = vld [vmem:[#allocation5 + $0xc88] sm:$0xff]  ;;  %v4306_v54 = vpack.c.bf16 %v218_v42, %v210_v41  ;;  %1179 = vmatprep.mubr.f32.mxu0 %v108_v53  ;;  %v509_v0 = vld [vmem:[#allocation5 + $0xc80] sm:$0xff]  ;;  %4305 = vmatpush1.bf16.msra.mxu0 %v4304_v52  ;;  %v4308_v3 = vpack.c.bf16 %v217_v56, %v209_v55 }
  0xbf   :  { %v518_v51 = vld [vmem:[#allocation5 + $0xcc8] sm:$0xff]  ;;  %v517_v1 = vld [vmem:[#allocation5 + $0xcc0] sm:$0xff] }
  0xc0   :  { %v226_v58 = vld [vmem:[#allocation5 + $0x3a8] sm:$0xff]  ;;  %v3998_v62 = vpack.c.bf16 %v518_v51, %v510_v50  ;;  %4307 = vmatprep.subr.bf16.mxu0 %v4306_v54  ;;  %v225_v7 = vld [vmem:[#allocation5 + $0x3a0] sm:$0xff]  ;;  %3997 = vmatpush1.bf16.msra.mxu1 %v3996_v60  ;;  %v4000_v11 = vpack.c.bf16 %v517_v1, %v509_v0 }
  0xc1   :  { %v234_v59 = vld [vmem:[#allocation5 + $0x3e8] sm:$0xff]  ;;  %1180 = vmatmul.mubr.f32.gmra.mrb[6].mxu0 %v107_v57  ;;  %v233_v8 = vld [vmem:[#allocation5 + $0x3e0] sm:$0xff] }
  0xc2   :  { %1517 = vmatprep.mubr.f32.mxu0 %v5931_v44  ;;  %v526_v2 = vld [vmem:[#allocation5 + $0xd08] sm:$0xff]  ;;  %v4310_v6 = vpack.c.bf16 %v234_v59, %v226_v58  ;;  %3999 = vmatprep.subr.bf16.mxu1 %v3998_v62  ;;  %v525_v13 = vld [vmem:[#allocation5 + $0xd00] sm:$0xff]  ;;  %v4312_v16 = vpack.c.bf16 %v233_v8, %v225_v7 }
  0xc3   :  { %v534_v4 = vld [vmem:[#allocation5 + $0xd48] sm:$0xff]  ;;  %v533_v14 = vld [vmem:[#allocation5 + $0xd40] sm:$0xff]  ;;  %4309 = vmatpush1.bf16.msra.mxu0 %v4308_v3 }
  0xc4   :  { %v242_v9 = vld [vmem:[#allocation5 + $0x428] sm:$0xff]  ;;  %v4002_v12 = vpack.c.bf16 %v534_v4, %v526_v2  ;;  %4311 = vmatprep.subr.bf16.mxu0 %v4310_v6  ;;  %v241_v19 = vld [vmem:[#allocation5 + $0x420] sm:$0xff]  ;;  %4001 = vmatpush1.bf16.msra.mxu1 %v4000_v11  ;;  %v4004_v23 = vpack.c.bf16 %v533_v14, %v525_v13 }
  0xc5   :  { %v250_v10 = vld [vmem:[#allocation5 + $0x468] sm:$0xff]  ;;  %v249_v20 = vld [vmem:[#allocation5 + $0x460] sm:$0xff] }
  0xc6   :  { %v542_v15 = vld [vmem:[#allocation5 + $0xd88] sm:$0xff]  ;;  %v4314_v18 = vpack.c.bf16 %v250_v10, %v242_v9  ;;  %4003 = vmatprep.subr.bf16.mxu1 %v4002_v12  ;;  %v541_v25 = vld [vmem:[#allocation5 + $0xd80] sm:$0xff]  ;;  %v4316_v29 = vpack.c.bf16 %v249_v20, %v241_v19  ;;  %v112_v20 = vld [vmem:[#allocation5 + $0x18] sm:$0xff] }
  0xc7   :  { %v550_v17 = vld [vmem:[#allocation5 + $0xdc8] sm:$0xff]  ;;  %v549_v26 = vld [vmem:[#allocation5 + $0xdc0] sm:$0xff]  ;;  %4313 = vmatpush1.bf16.msra.mxu0 %v4312_v16 }
  0xc8   :  { %v258_v21 = vld [vmem:[#allocation5 + $0x4a8] sm:$0xff]  ;;  %v4006_v24 = vpack.c.bf16 %v550_v17, %v542_v15  ;;  %4315 = vmatprep.subr.bf16.mxu0 %v4314_v18  ;;  %v257_v33 = vld [vmem:[#allocation5 + $0x4a0] sm:$0xff]  ;;  %4005 = vmatpush1.bf16.msra.mxu1 %v4004_v23  ;;  %v4008_v37 = vpack.c.bf16 %v549_v26, %v541_v25 }
  0xc9   :  { %v266_v22 = vld [vmem:[#allocation5 + $0x4e8] sm:$0xff]  ;;  %v265_v34 = vld [vmem:[#allocation5 + $0x4e0] sm:$0xff] }
  0xca   :  { %v558_v27 = vld [vmem:[#allocation5 + $0xe08] sm:$0xff]  ;;  %v4318_v32 = vpack.c.bf16 %v266_v22, %v258_v21  ;;  %4007 = vmatprep.subr.bf16.mxu1 %v4006_v24  ;;  %v557_v40 = vld [vmem:[#allocation5 + $0xe00] sm:$0xff]  ;;  %v4320_v43 = vpack.c.bf16 %v265_v34, %v257_v33  ;;  %v120_v22 = vld [vmem:[#allocation5 + $0x58] sm:$0xff] }
  0xcb   :  { %v566_v30 = vld [vmem:[#allocation5 + $0xe48] sm:$0xff]  ;;  %v565_v41 = vld [vmem:[#allocation5 + $0xe40] sm:$0xff]  ;;  %4317 = vmatpush1.bf16.msra.mxu0 %v4316_v29  ;;  %v119_v33 = vld [vmem:[#allocation5 + $0x50] sm:$0xff] }
  0xcc   :  { %v274_v35 = vld [vmem:[#allocation5 + $0x528] sm:$0xff]  ;;  %v4010_v38 = vpack.c.bf16 %v566_v30, %v558_v27  ;;  %4319 = vmatprep.subr.bf16.mxu0 %v4318_v32  ;;  %v273_v48 = vld [vmem:[#allocation5 + $0x520] sm:$0xff]  ;;  %4009 = vmatpush1.bf16.msra.mxu1 %v4008_v37  ;;  %v4012_v53 = vpack.c.bf16 %v565_v41, %v557_v40  ;;  %v4090_v30 = vpack.c.bf16 %v120_v22, %v112_v20  ;;  %v111_v32 = vld [vmem:[#allocation5 + $0x10] sm:$0xff] }
  0xcd   :  { %v282_v36 = vld [vmem:[#allocation5 + $0x568] sm:$0xff]  ;;  %v281_v50 = vld [vmem:[#allocation5 + $0x560] sm:$0xff]  ;;  %v128_v34 = vld [vmem:[#allocation5 + $0x98] sm:$0xff] }
  0xce   :  { %v574_v42 = vld [vmem:[#allocation5 + $0xe88] sm:$0xff]  ;;  %v4322_v46 = vpack.c.bf16 %v282_v36, %v274_v35  ;;  %4011 = vmatprep.subr.bf16.mxu1 %v4010_v38  ;;  %v573_v55 = vld [vmem:[#allocation5 + $0xe80] sm:$0xff]  ;;  %v4324_v58 = vpack.c.bf16 %v281_v50, %v273_v48  ;;  %v136_v36 = vld [vmem:[#allocation5 + $0xd8] sm:$0xff] }
  0xcf   :  { %v582_v45 = vld [vmem:[#allocation5 + $0xec8] sm:$0xff]  ;;  %v581_v56 = vld [vmem:[#allocation5 + $0xec0] sm:$0xff]  ;;  %4321 = vmatpush1.bf16.msra.mxu0 %v4320_v43  ;;  %v5959_v43 = vld [vmem:[#allocation2 + $0x10] sm:$0xff]  ;;  %v4094_v48 = vpack.c.bf16 %v136_v36, %v128_v34 }
  0xd0   :  { %v290_v51 = vld [vmem:[#allocation5 + $0x5a8] sm:$0xff]  ;;  %v4014_v54 = vpack.c.bf16 %v582_v45, %v574_v42  ;;  %4323 = vmatprep.subr.bf16.mxu0 %v4322_v46  ;;  %v289_v62 = vld [vmem:[#allocation5 + $0x5a0] sm:$0xff]  ;;  %4013 = vmatpush1.bf16.msra.mxu1 %v4012_v53  ;;  %v4016_v3 = vpack.c.bf16 %v581_v56, %v573_v55  ;;  %v4092_v45 = vpack.c.bf16 %v119_v33, %v111_v32  ;;  %v127_v50 = vld [vmem:[#allocation5 + $0x90] sm:$0xff] }
  0xd1   :  { %v298_v52 = vld [vmem:[#allocation5 + $0x5e8] sm:$0xff]  ;;  %v297_v0 = vld [vmem:[#allocation5 + $0x5e0] sm:$0xff]  ;;  %v184_v20 = vld [vmem:[#allocation5 + $0x258] sm:$0xff] }
  0xd2   :  { %v590_v57 = vld [vmem:[#allocation5 + $0xf08] sm:$0xff]  ;;  %v4326_v60 = vpack.c.bf16 %v298_v52, %v290_v51  ;;  %4015 = vmatprep.subr.bf16.mxu1 %v4014_v54  ;;  %v589_v6 = vld [vmem:[#allocation5 + $0xf00] sm:$0xff]  ;;  %v4328_v9 = vpack.c.bf16 %v297_v0, %v289_v62  ;;  %v135_v51 = vld [vmem:[#allocation5 + $0xd0] sm:$0xff] }
  0xd3   :  { %v598_v59 = vld [vmem:[#allocation5 + $0xf48] sm:$0xff]  ;;  %v597_v7 = vld [vmem:[#allocation5 + $0xf40] sm:$0xff]  ;;  %4325 = vmatpush1.bf16.msra.mxu0 %v4324_v58  ;;  %v144_v52 = vld [vmem:[#allocation5 + $0x118] sm:$0xff]  ;;  %v4096_v62 = vpack.c.bf16 %v135_v51, %v127_v50 }
  0xd4   :  { %v306_v1 = vld [vmem:[#allocation5 + $0x628] sm:$0xff]  ;;  %v4018_v4 = vpack.c.bf16 %v598_v59, %v590_v57  ;;  %4327 = vmatprep.subr.bf16.mxu0 %v4326_v60  ;;  %v305_v12 = vld [vmem:[#allocation5 + $0x620] sm:$0xff]  ;;  %4017 = vmatpush1.bf16.msra.mxu1 %v4016_v3  ;;  %v4020_v16 = vpack.c.bf16 %v597_v7, %v589_v6  ;;  %v152_v54 = vld [vmem:[#allocation5 + $0x158] sm:$0xff] }
  0xd5   :  { %v314_v2 = vld [vmem:[#allocation5 + $0x668] sm:$0xff]  ;;  %v313_v13 = vld [vmem:[#allocation5 + $0x660] sm:$0xff]  ;;  %v5967_v0 = vld [vmem:[#allocation2 + $0x78] sm:$0xff] }
  0xd6   :  { %v606_v8 = vld [vmem:[#allocation5 + $0xf88] sm:$0xff]  ;;  %v4330_v11 = vpack.c.bf16 %v314_v2, %v306_v1  ;;  %4019 = vmatprep.subr.bf16.mxu1 %v4018_v4  ;;  %v605_v18 = vld [vmem:[#allocation5 + $0xf80] sm:$0xff]  ;;  %v4332_v21 = vpack.c.bf16 %v313_v13, %v305_v12  ;;  %v4098_v1 = vpack.c.bf16 %v152_v54, %v144_v52  ;;  %v143_v2 = vld [vmem:[#allocation5 + $0x110] sm:$0xff] }
  0xd7   :  { %v614_v10 = vld [vmem:[#allocation5 + $0xfc8] sm:$0xff]  ;;  %v613_v19 = vld [vmem:[#allocation5 + $0xfc0] sm:$0xff]  ;;  %4329 = vmatpush1.bf16.msra.mxu0 %v4328_v9  ;;  %v151_v3 = vld [vmem:[#allocation5 + $0x150] sm:$0xff] }
  0xd8   :  { %v322_v14 = vld [vmem:[#allocation5 + $0x6a8] sm:$0xff]  ;;  %v4022_v17 = vpack.c.bf16 %v614_v10, %v606_v8  ;;  %4331 = vmatprep.subr.bf16.mxu0 %v4330_v11  ;;  %v321_v24 = vld [vmem:[#allocation5 + $0x6a0] sm:$0xff]  ;;  %4021 = vmatpush1.bf16.msra.mxu1 %v4020_v16  ;;  %v4024_v29 = vpack.c.bf16 %v613_v19, %v605_v18  ;;  %v160_v6 = vld [vmem:[#allocation5 + $0x198] sm:$0xff]  ;;  %v4100_v12 = vpack.c.bf16 %v151_v3, %v143_v2 }
  0xd9   :  { %v330_v15 = vld [vmem:[#allocation5 + $0x6e8] sm:$0xff]  ;;  %v329_v25 = vld [vmem:[#allocation5 + $0x6e0] sm:$0xff]  ;;  %v168_v7 = vld [vmem:[#allocation5 + $0x1d8] sm:$0xff] }
  0xda   :  { %v4334_v23 = vpack.c.bf16 %v330_v15, %v322_v14  ;;  %v338_v26 = vld [vmem:[#allocation5 + $0x728] sm:$0xff]  ;;  %4023 = vmatprep.subr.bf16.mxu1 %v4022_v17  ;;  %v4336_v35 = vpack.c.bf16 %v329_v25, %v321_v24  ;;  %v337_v38 = vld [vmem:[#allocation5 + $0x720] sm:$0xff]  ;;  %v5971_v11 = vld [vmem:[#allocation2 + $0x70] sm:$0xff]  ;;  %v4102_v16 = vpack.c.bf16 %v168_v7, %v160_v6 }
  0xdb   :  { %v346_v27 = vld [vmem:[#allocation5 + $0x768] sm:$0xff]  ;;  %4333 = vmatpush1.bf16.msra.mxu0 %v4332_v21  ;;  %v345_v40 = vld [vmem:[#allocation5 + $0x760] sm:$0xff]  ;;  %v159_v17 = vld [vmem:[#allocation5 + $0x190] sm:$0xff] }
  0xdc   :  { %4335 = vmatprep.subr.bf16.mxu0 %v4334_v23  ;;  %v4338_v37 = vpack.c.bf16 %v346_v27, %v338_v26  ;;  %v354_v41 = vld [vmem:[#allocation5 + $0x7a8] sm:$0xff]  ;;  %4025 = vmatpush1.bf16.msra.mxu1 %v4024_v29  ;;  %v4340_v53 = vpack.c.bf16 %v345_v40, %v337_v38  ;;  %v353_v56 = vld [vmem:[#allocation5 + $0x7a0] sm:$0xff]  ;;  %v167_v18 = vld [vmem:[#allocation5 + $0x1d0] sm:$0xff] }
  0xdd   :  { %v362_v42 = vld [vmem:[#allocation5 + $0x7e8] sm:$0xff]  ;;  %4091 = vmatprep.subr.bf16.mxu1 %v4090_v30  ;;  %v361_v57 = vld [vmem:[#allocation5 + $0x7e0] sm:$0xff]  ;;  %v176_v19 = vld [vmem:[#allocation5 + $0x218] sm:$0xff]  ;;  %v4104_v26 = vpack.c.bf16 %v167_v18, %v159_v17 }
  0xde   :  { %v5961_v46 = vld [vmem:[#allocation2 + $0x48] sm:$0xff]  ;;  %v4342_v55 = vpack.c.bf16 %v362_v42, %v354_v41  ;;  %v5965_v60 = vld [vmem:[#allocation2 + $0x40] sm:$0xff]  ;;  %v4344_v4 = vpack.c.bf16 %v361_v57, %v353_v56  ;;  %v4106_v30 = vpack.c.bf16 %v184_v20, %v176_v19  ;;  %v175_v32 = vld [vmem:[#allocation5 + $0x210] sm:$0xff] }
  0xdf   :  { %4337 = vmatpush1.bf16.msra.mxu0 %v4336_v35  ;;  %1073 = vmatmul.mubr.f32.vlgmr.msra.gmra.mrb[0].mxu1 %v5959_v43  ;;  %v370_v58 = vld [vmem:[#allocation5 + $0x828] sm:$0xff]  ;;  %v369_v9 = vld [vmem:[#allocation5 + $0x820] sm:$0xff]  ;;  %v183_v33 = vld [vmem:[#allocation5 + $0x250] sm:$0xff] }
  0xe0   :  { %4339 = vmatprep.subr.bf16.mxu0 %v4338_v37  ;;  %v378_v59 = vld [vmem:[#allocation5 + $0x868] sm:$0xff]  ;;  %4093 = vmatpush1.bf16.msra.mxu1 %v4092_v45  ;;  %v377_v10 = vld [vmem:[#allocation5 + $0x860] sm:$0xff]  ;;  %v192_v34 = vld [vmem:[#allocation5 + $0x298] sm:$0xff]  ;;  %v4108_v41 = vpack.c.bf16 %v183_v33, %v175_v32 }
  0xe1   :  { %1078 = vmatprep.mubr.f32.mxu1 %v5961_v46  ;;  %4095 = vmatprep.subr.bf16.mxu1 %v4094_v48  ;;  %v4346_v8 = vpack.c.bf16 %v378_v59, %v370_v58  ;;  %v386_v13 = vld [vmem:[#allocation5 + $0x8a8] sm:$0xff]  ;;  %v4348_v21 = vpack.c.bf16 %v377_v10, %v369_v9  ;;  %v385_v23 = vld [vmem:[#allocation5 + $0x8a0] sm:$0xff]  ;;  %v200_v35 = vld [vmem:[#allocation5 + $0x2d8] sm:$0xff] }
  0xe2   :  { %v394_v14 = vld [vmem:[#allocation5 + $0x8e8] sm:$0xff]  ;;  %v393_v24 = vld [vmem:[#allocation5 + $0x8e0] sm:$0xff]  ;;  %v191_v48 = vld [vmem:[#allocation5 + $0x290] sm:$0xff] }
  0xe3   :  { %4341 = vmatpush1.bf16.msra.mxu0 %v4340_v53  ;;  %1079 = vmatmul.mubr.f32.gmra.mrb[2].mxu1 %v5965_v60  ;;  %v5973_v15 = vld [vmem:[#allocation2 + $0xa8] sm:$0xff]  ;;  %v4350_v22 = vpack.c.bf16 %v394_v14, %v386_v13  ;;  %v5977_v25 = vld [vmem:[#allocation2 + $0xa0] sm:$0xff]  ;;  %v4352_v36 = vpack.c.bf16 %v393_v24, %v385_v23  ;;  %v199_v50 = vld [vmem:[#allocation5 + $0x2d0] sm:$0xff] }
  0xe4   :  { %4343 = vmatprep.subr.bf16.mxu0 %v4342_v55  ;;  %4097 = vmatpush1.bf16.msra.mxu1 %v4096_v62  ;;  %v402_v27 = vld [vmem:[#allocation5 + $0x928] sm:$0xff]  ;;  %v401_v38 = vld [vmem:[#allocation5 + $0x920] sm:$0xff]  ;;  %v208_v51 = vld [vmem:[#allocation5 + $0x318] sm:$0xff]  ;;  %v4112_v56 = vpack.c.bf16 %v199_v50, %v191_v48 }
  0xe5   :  { %1084 = vmatprep.mubr.f32.mxu1 %v5967_v0  ;;  %4099 = vmatprep.subr.bf16.mxu1 %v4098_v1  ;;  %v410_v29 = vld [vmem:[#allocation5 + $0x968] sm:$0xff]  ;;  %v409_v40 = vld [vmem:[#allocation5 + $0x960] sm:$0xff]  ;;  %v207_v59 = vld [vmem:[#allocation5 + $0x310] sm:$0xff] }
  0xe6   :  { %v4354_v37 = vpack.c.bf16 %v410_v29, %v402_v27  ;;  %v418_v42 = vld [vmem:[#allocation5 + $0x9a8] sm:$0xff]  ;;  %v4356_v52 = vpack.c.bf16 %v409_v40, %v401_v38  ;;  %v417_v54 = vld [vmem:[#allocation5 + $0x9a0] sm:$0xff]  ;;  %v215_v62 = vld [vmem:[#allocation5 + $0x350] sm:$0xff] }
  0xe7   :  { %4345 = vmatpush1.bf16.msra.mxu0 %v4344_v4  ;;  %1085 = vmatmul.mubr.f32.gmra.mrb[4].mxu1 %v5971_v11  ;;  %v426_v45 = vld [vmem:[#allocation5 + $0x9e8] sm:$0xff]  ;;  %v425_v55 = vld [vmem:[#allocation5 + $0x9e0] sm:$0xff]  ;;  %v232_v1 = vld [vmem:[#allocation5 + $0x3d8] sm:$0xff]  ;;  %v4116_v6 = vpack.c.bf16 %v215_v62, %v207_v59 }
  0xe8   :  { %4347 = vmatprep.subr.bf16.mxu0 %v4346_v8  ;;  %4101 = vmatpush1.bf16.msra.mxu1 %v4100_v12  ;;  %v4358_v53 = vpack.c.bf16 %v426_v45, %v418_v42  ;;  %v434_v57 = vld [vmem:[#allocation5 + $0xa28] sm:$0xff]  ;;  %v4360_v2 = vpack.c.bf16 %v425_v55, %v417_v54  ;;  %v433_v3 = vld [vmem:[#allocation5 + $0xa20] sm:$0xff]  ;;  %v223_v10 = vld [vmem:[#allocation5 + $0x390] sm:$0xff] }
  0xe9   :  { %1090 = vmatprep.mubr.f32.mxu1 %v5973_v15  ;;  %4103 = vmatprep.subr.bf16.mxu1 %v4102_v16  ;;  %v441_v4 = vld [vmem:[#allocation5 + $0xa60] sm:$0xff]  ;;  %v450_v7 = vld [vmem:[#allocation5 + $0xaa8] sm:$0xff]  ;;  %v231_v12 = vld [vmem:[#allocation5 + $0x3d0] sm:$0xff] }
  0xea   :  { %1518 = vmatmul.mubr.f32.vlgmr.msra.gmra.mrb[8].mxu0 %v5934_v5  ;;  %v4110_v5 = vpack.c.bf16 %v200_v35, %v192_v34  ;;  %v458_v8 = vld [vmem:[#allocation5 + $0xae8] sm:$0xff]  ;;  %v248_v13 = vld [vmem:[#allocation5 + $0x458] sm:$0xff]  ;;  %v4364_v14 = vpack.c.bf16 %v441_v4, %v433_v3  ;;  %v449_v16 = vld [vmem:[#allocation5 + $0xaa0] sm:$0xff]  ;;  %v4120_v18 = vpack.c.bf16 %v231_v12, %v223_v10 }
  0xeb   :  { %4349 = vmatpush1.bf16.msra.mxu0 %v4348_v21  ;;  %1523 = vmatprep.mubr.f32.mxu0 %v5937_v28  ;;  %v216_v28 = vld [vmem:[#allocation5 + $0x358] sm:$0xff]  ;;  %v457_v17 = vld [vmem:[#allocation5 + $0xae0] sm:$0xff]  ;;  %v466_v19 = vld [vmem:[#allocation5 + $0xb28] sm:$0xff] }
  0xec   :  { %1091 = vmatmul.mubr.f32.gmra.mrb[6].mxu1 %v5977_v25  ;;  %4351 = vmatprep.subr.bf16.mxu0 %v4350_v22  ;;  %v4114_v58 = vpack.c.bf16 %v216_v28, %v208_v51  ;;  %v474_v20 = vld [vmem:[#allocation5 + $0xb68] sm:$0xff]  ;;  %v239_v22 = vld [vmem:[#allocation5 + $0x410] sm:$0xff]  ;;  %v256_v24 = vld [vmem:[#allocation5 + $0x498] sm:$0xff] }
  0xed   :  { %4105 = vmatpush1.bf16.msra.mxu1 %v4104_v26  ;;  %1250 = vmatprep.mubr.f32.mxu1 %v5931_v44  ;;  %v442_v44 = vld [vmem:[#allocation5 + $0xa68] sm:$0xff]  ;;  %v247_v23 = vld [vmem:[#allocation5 + $0x450] sm:$0xff]  ;;  %v4368_v26 = vpack.c.bf16 %v457_v17, %v449_v16  ;;  %v4370_v27 = vpack.c.bf16 %v474_v20, %v466_v19  ;;  %v465_v29 = vld [vmem:[#allocation5 + $0xb20] sm:$0xff] }
  0xee   :  { %4107 = vmatprep.subr.bf16.mxu1 %v4106_v30  ;;  %1524 = vmatmul.mubr.f32.gmra.mrb[10].mxu0 %v5940_v31  ;;  %v224_v31 = vld [vmem:[#allocation5 + $0x398] sm:$0xff]  ;;  %v4124_v30 = vpack.c.bf16 %v247_v23, %v239_v22  ;;  %v482_v32 = vld [vmem:[#allocation5 + $0xba8] sm:$0xff]  ;;  %v255_v35 = vld [vmem:[#allocation5 + $0x490] sm:$0xff] }
  0xef   :  { %4353 = vmatpush1.bf16.msra.mxu0 %v4352_v36  ;;  %1529 = vmatprep.mubr.f32.mxu0 %v5942_v39  ;;  %v4362_v39 = vpack.c.bf16 %v442_v44, %v434_v57  ;;  %v4118_v9 = vpack.c.bf16 %v232_v1, %v224_v31  ;;  %v490_v33 = vld [vmem:[#allocation5 + $0xbe8] sm:$0xff]  ;;  %v263_v36 = vld [vmem:[#allocation5 + $0x4d0] sm:$0xff]  ;;  %v280_v38 = vld [vmem:[#allocation5 + $0x558] sm:$0xff] }
  0xf0   :  { %4355 = vmatprep.subr.bf16.mxu0 %v4354_v37  ;;  %v272_v37 = vld [vmem:[#allocation5 + $0x518] sm:$0xff]  ;;  %v481_v42 = vld [vmem:[#allocation5 + $0xba0] sm:$0xff]  ;;  %v498_v48 = vld [vmem:[#allocation5 + $0xc28] sm:$0xff] }
  0xf1   :  { %4109 = vmatpush1.bf16.msra.mxu1 %v4108_v41  ;;  %v4374_v41 = vpack.c.bf16 %v490_v33, %v482_v32  ;;  %v489_v45 = vld [vmem:[#allocation5 + $0xbe0] sm:$0xff]  ;;  %v506_v50 = vld [vmem:[#allocation5 + $0xc68] sm:$0xff]  ;;  %v4130_v51 = vpack.c.bf16 %v280_v38, %v272_v37  ;;  %v271_v28 = vld [vmem:[#allocation5 + $0x510] sm:$0xff] }
  0xf2   :  { %4111 = vmatprep.subr.bf16.mxu1 %v4110_v5  ;;  %1530 = vmatmul.mubr.f32.gmra.mrb[12].mxu0 %v5946_v47  ;;  %v240_v47 = vld [vmem:[#allocation5 + $0x418] sm:$0xff]  ;;  %v4128_v5 = vpack.c.bf16 %v263_v36, %v255_v35  ;;  %v4376_v55 = vpack.c.bf16 %v489_v45, %v481_v42  ;;  %v497_v57 = vld [vmem:[#allocation5 + $0xc20] sm:$0xff]  ;;  %v514_v59 = vld [vmem:[#allocation5 + $0xca8] sm:$0xff] }
  0xf3   :  { %4357 = vmatpush1.bf16.msra.mxu0 %v4356_v52  ;;  %1535 = vmatprep.mubr.f32.mxu0 %v5948_v49  ;;  %v4366_v49 = vpack.c.bf16 %v458_v8, %v450_v7  ;;  %v4122_v21 = vpack.c.bf16 %v248_v13, %v240_v47  ;;  %v279_v52 = vld [vmem:[#allocation5 + $0x550] sm:$0xff]  ;;  %v296_v54 = vld [vmem:[#allocation5 + $0x5d8] sm:$0xff]  ;;  %v505_v44 = vld [vmem:[#allocation5 + $0xc60] sm:$0xff] }
  0xf4   :  { %4359 = vmatprep.subr.bf16.mxu0 %v4358_v53  ;;  %v288_v53 = vld [vmem:[#allocation5 + $0x598] sm:$0xff]  ;;  %v522_v62 = vld [vmem:[#allocation5 + $0xce8] sm:$0xff]  ;;  %v287_v1 = vld [vmem:[#allocation5 + $0x590] sm:$0xff]  ;;  %v4380_v4 = vpack.c.bf16 %v505_v44, %v497_v57 }
  0xf5   :  { %4113 = vmatpush1.bf16.msra.mxu1 %v4112_v56  ;;  %v4378_v56 = vpack.c.bf16 %v506_v50, %v498_v48  ;;  %v4134_v31 = vpack.c.bf16 %v296_v54, %v288_v53  ;;  %v312_v3 = vld [vmem:[#allocation5 + $0x658] sm:$0xff]  ;;  %v513_v7 = vld [vmem:[#allocation5 + $0xca0] sm:$0xff]  ;;  %v530_v10 = vld [vmem:[#allocation5 + $0xd28] sm:$0xff] }
  0xf6   :  { %4115 = vmatprep.subr.bf16.mxu1 %v4114_v58  ;;  %1536 = vmatmul.mubr.f32.gmra.mrb[14].mxu0 %v5952_v61  ;;  %v264_v61 = vld [vmem:[#allocation5 + $0x4d8] sm:$0xff]  ;;  %v4132_v58 = vpack.c.bf16 %v279_v52, %v271_v28  ;;  %v521_v8 = vld [vmem:[#allocation5 + $0xce0] sm:$0xff]  ;;  %v538_v12 = vld [vmem:[#allocation5 + $0xd68] sm:$0xff] }
  0xf7   :  { %4361 = vmatpush1.bf16.msra.mxu0 %v4360_v2  ;;  %1606 = vmatprep.mubr.f32.mxu0 %v5954_v63  ;;  %v473_v63 = vld [vmem:[#allocation5 + $0xb60] sm:$0xff]  ;;  %v4126_v34 = vpack.c.bf16 %v264_v61, %v256_v24  ;;  %v295_v2 = vld [vmem:[#allocation5 + $0x5d0] sm:$0xff]  ;;  %v328_v16 = vld [vmem:[#allocation5 + $0x6d8] sm:$0xff]  ;;  %v4384_v17 = vpack.c.bf16 %v521_v8, %v513_v7 }
  0xf8   :  { %4363 = vmatprep.subr.bf16.mxu0 %v4362_v39  ;;  %v4372_v40 = vpack.c.bf16 %v473_v63, %v465_v29  ;;  %v304_v39 = vld [vmem:[#allocation5 + $0x618] sm:$0xff]  ;;  %v303_v13 = vld [vmem:[#allocation5 + $0x610] sm:$0xff]  ;;  %v529_v19 = vld [vmem:[#allocation5 + $0xd20] sm:$0xff] }
  0xf9   :  { %4117 = vmatpush1.bf16.msra.mxu1 %v4116_v6  ;;  %v4382_v6 = vpack.c.bf16 %v522_v62, %v514_v59  ;;  %v4138_v47 = vpack.c.bf16 %v312_v3, %v304_v39  ;;  %v537_v20 = vld [vmem:[#allocation5 + $0xd60] sm:$0xff]  ;;  %v546_v22 = vld [vmem:[#allocation5 + $0xda8] sm:$0xff]  ;;  %v319_v61 = vld [vmem:[#allocation5 + $0x690] sm:$0xff] }
  0xfa   :  { %4119 = vmatprep.subr.bf16.mxu1 %v4118_v9  ;;  %v4136_v9 = vpack.c.bf16 %v295_v2, %v287_v1  ;;  %v554_v23 = vld [vmem:[#allocation5 + $0xde8] sm:$0xff]  ;;  %v344_v29 = vld [vmem:[#allocation5 + $0x758] sm:$0xff]  ;;  %v4388_v63 = vpack.c.bf16 %v537_v20, %v529_v19  ;;  %v545_v32 = vld [vmem:[#allocation5 + $0xda0] sm:$0xff] }
  0xfb   :  { %4365 = vmatpush1.bf16.msra.mxu0 %v4364_v14  ;;  %v311_v14 = vld [vmem:[#allocation5 + $0x650] sm:$0xff]  ;;  %v553_v33 = vld [vmem:[#allocation5 + $0xde0] sm:$0xff]  ;;  %v562_v35 = vld [vmem:[#allocation5 + $0xe28] sm:$0xff] }
  0xfc   :  { %4367 = vmatprep.subr.bf16.mxu0 %v4366_v49  ;;  %v320_v49 = vld [vmem:[#allocation5 + $0x698] sm:$0xff]  ;;  %v570_v36 = vld [vmem:[#allocation5 + $0xe68] sm:$0xff]  ;;  %v335_v38 = vld [vmem:[#allocation5 + $0x710] sm:$0xff]  ;;  %v4392_v45 = vpack.c.bf16 %v553_v33, %v545_v32 }
  0xfd   :  { %4121 = vmatpush1.bf16.msra.mxu1 %v4120_v18  ;;  %v4386_v18 = vpack.c.bf16 %v538_v12, %v530_v10  ;;  %v4142_v24 = vpack.c.bf16 %v328_v16, %v320_v49  ;;  %v360_v42 = vld [vmem:[#allocation5 + $0x7d8] sm:$0xff]  ;;  %v561_v48 = vld [vmem:[#allocation5 + $0xe20] sm:$0xff]  ;;  %v578_v28 = vld [vmem:[#allocation5 + $0xea8] sm:$0xff] }
  0xfe   :  { %4123 = vmatprep.subr.bf16.mxu1 %v4122_v21  ;;  %v4140_v21 = vpack.c.bf16 %v311_v14, %v303_v13  ;;  %v569_v50 = vld [vmem:[#allocation5 + $0xe60] sm:$0xff]  ;;  %v586_v52 = vld [vmem:[#allocation5 + $0xee8] sm:$0xff]  ;;  %v351_v54 = vld [vmem:[#allocation5 + $0x790] sm:$0xff] }
  0xff   :  { %4369 = vmatpush1.bf16.msra.mxu0 %v4368_v26  ;;  %v327_v26 = vld [vmem:[#allocation5 + $0x6d0] sm:$0xff]  ;;  %v376_v57 = vld [vmem:[#allocation5 + $0x858] sm:$0xff]  ;;  %v4396_v44 = vpack.c.bf16 %v569_v50, %v561_v48  ;;  %v577_v59 = vld [vmem:[#allocation5 + $0xea0] sm:$0xff] }
 0x100   :  { %4371 = vmatprep.subr.bf16.mxu0 %v4370_v27  ;;  %v336_v27 = vld [vmem:[#allocation5 + $0x718] sm:$0xff]  ;;  %v585_v62 = vld [vmem:[#allocation5 + $0xee0] sm:$0xff]  ;;  %v594_v1 = vld [vmem:[#allocation5 + $0xf28] sm:$0xff] }
 0x101   :  { %4125 = vmatpush1.bf16.msra.mxu1 %v4124_v30  ;;  %v4390_v30 = vpack.c.bf16 %v554_v23, %v546_v22  ;;  %v4146_v37 = vpack.c.bf16 %v344_v29, %v336_v27  ;;  %v602_v2 = vld [vmem:[#allocation5 + $0xf68] sm:$0xff]  ;;  %v367_v3 = vld [vmem:[#allocation5 + $0x810] sm:$0xff]  ;;  %v392_v7 = vld [vmem:[#allocation5 + $0x8d8] sm:$0xff]  ;;  %v4400_v8 = vpack.c.bf16 %v585_v62, %v577_v59 }
 0x102   :  { %4127 = vmatprep.subr.bf16.mxu1 %v4126_v34  ;;  %v4144_v34 = vpack.c.bf16 %v327_v26, %v319_v61  ;;  %v593_v10 = vld [vmem:[#allocation5 + $0xf20] sm:$0xff]  ;;  %v610_v13 = vld [vmem:[#allocation5 + $0xfa8] sm:$0xff]  ;;  %v383_v16 = vld [vmem:[#allocation5 + $0x890] sm:$0xff] }
 0x103   :  { %4373 = vmatpush1.bf16.msra.mxu0 %v4372_v40  ;;  %v343_v40 = vld [vmem:[#allocation5 + $0x750] sm:$0xff]  ;;  %v601_v12 = vld [vmem:[#allocation5 + $0xf60] sm:$0xff]  ;;  %v618_v14 = vld [vmem:[#allocation5 + $0xfe8] sm:$0xff] }
 0x104   :  { %4375 = vmatprep.subr.bf16.mxu0 %v4374_v41  ;;  %v352_v41 = vld [vmem:[#allocation5 + $0x798] sm:$0xff]  ;;  %v4404_v20 = vpack.c.bf16 %v601_v12, %v593_v10  ;;  %v4406_v22 = vpack.c.bf16 %v618_v14, %v610_v13  ;;  %v609_v23 = vld [vmem:[#allocation5 + $0xfa0] sm:$0xff]  ;;  %v626_v26 = vld [vmem:[#allocation5 + $0x1028] sm:$0xff] }
 0x105   :  { %4129 = vmatpush1.bf16.msra.mxu1 %v4128_v5  ;;  %v4394_v5 = vpack.c.bf16 %v570_v36, %v562_v35  ;;  %v4150_v53 = vpack.c.bf16 %v360_v42, %v352_v41  ;;  %v408_v19 = vld [vmem:[#allocation5 + $0x958] sm:$0xff]  ;;  %v634_v27 = vld [vmem:[#allocation5 + $0x1068] sm:$0xff]  ;;  %v407_v32 = vld [vmem:[#allocation5 + $0x950] sm:$0xff] }
 0x106   :  { %4131 = vmatprep.subr.bf16.mxu1 %v4130_v51  ;;  %v4148_v51 = vpack.c.bf16 %v343_v40, %v335_v38  ;;  %v5637_v29 = vld [vmem:[#allocation2 + $0x38] sm:$0xff]  ;;  %v4410_v36 = vpack.c.bf16 %v634_v27, %v626_v26  ;;  %v633_v38 = vld [vmem:[#allocation5 + $0x1060] sm:$0xff]  ;;  %v5638_v40 = vld [vmem:[#allocation2 + $0x30] sm:$0xff] }
 0x107   :  { %4377 = vmatpush1.bf16.msra.mxu0 %v4376_v55  ;;  %v359_v55 = vld [vmem:[#allocation5 + $0x7d0] sm:$0xff]  ;;  %v416_v33 = vld [vmem:[#allocation5 + $0x998] sm:$0xff]  ;;  %v642_v42 = vld [vmem:[#allocation5 + $0x10a8] sm:$0xff] }
 0x108   :  { %4379 = vmatprep.subr.bf16.mxu0 %v4378_v56  ;;  %v368_v56 = vld [vmem:[#allocation5 + $0x818] sm:$0xff]  ;;  %v415_v50 = vld [vmem:[#allocation5 + $0x990] sm:$0xff]  ;;  %v666_v59 = vld [vmem:[#allocation5 + $0x1168] sm:$0xff] }
 0x109   :  { %4133 = vmatpush1.bf16.msra.mxu1 %v4132_v58  ;;  %v4398_v58 = vpack.c.bf16 %v586_v52, %v578_v28  ;;  %v4154_v39 = vpack.c.bf16 %v376_v57, %v368_v56  ;;  %v432_v28 = vld [vmem:[#allocation5 + $0xa18] sm:$0xff]  ;;  %v649_v56 = vld [vmem:[#allocation5 + $0x10e0] sm:$0xff]  ;;  %v674_v12 = vld [vmem:[#allocation5 + $0x11a8] sm:$0xff] }
 0x10a   :  { %4135 = vmatprep.subr.bf16.mxu1 %v4134_v31  ;;  %v4152_v31 = vpack.c.bf16 %v359_v55, %v351_v54  ;;  %v440_v52 = vld [vmem:[#allocation5 + $0xa58] sm:$0xff]  ;;  %v641_v55 = vld [vmem:[#allocation5 + $0x10a0] sm:$0xff]  ;;  %v447_v14 = vld [vmem:[#allocation5 + $0xa90] sm:$0xff] }
 0x10b   :  { %4381 = vmatpush1.bf16.msra.mxu0 %v4380_v4  ;;  %v375_v4 = vld [vmem:[#allocation5 + $0x850] sm:$0xff]  ;;  %v5640_v57 = vld [vmem:[#allocation2 + $0x60] sm:$0xff]  ;;  %v5641_v62 = vld [vmem:[#allocation2 + $0x98] sm:$0xff] }
 0x10c   :  { %4383 = vmatprep.subr.bf16.mxu0 %v4382_v6  ;;  %v384_v6 = vld [vmem:[#allocation5 + $0x898] sm:$0xff]  ;;  %v471_v26 = vld [vmem:[#allocation5 + $0xb50] sm:$0xff] }
 0x10d   :  { %4137 = vmatpush1.bf16.msra.mxu1 %v4136_v9  ;;  %v4402_v9 = vpack.c.bf16 %v602_v2, %v594_v1  ;;  %v4158_v49 = vpack.c.bf16 %v392_v7, %v384_v6  ;;  %v431_v1 = vld [vmem:[#allocation5 + $0xa10] sm:$0xff]  ;;  %v657_v7 = vld [vmem:[#allocation5 + $0x1120] sm:$0xff]  ;;  %v5643_v13 = vld [vmem:[#allocation2 + $0x18] sm:$0xff] }
 0x10e   :  { %4139 = vmatprep.subr.bf16.mxu1 %v4138_v47  ;;  %v4156_v47 = vpack.c.bf16 %v375_v4, %v367_v3  ;;  %v439_v2 = vld [vmem:[#allocation5 + $0xa50] sm:$0xff]  ;;  %v456_v3 = vld [vmem:[#allocation5 + $0xad8] sm:$0xff]  ;;  %v4416_v4 = vpack.c.bf16 %v649_v56, %v641_v55  ;;  %v721_v56 = vld [vmem:[#allocation5 + $0x1320] sm:$0xff] }
 0x10f   :  { %4385 = vmatpush1.bf16.msra.mxu0 %v4384_v17  ;;  %v391_v17 = vld [vmem:[#allocation5 + $0x8d0] sm:$0xff]  ;;  %v4172_v10 = vpack.c.bf16 %v439_v2, %v431_v1  ;;  %v488_v27 = vld [vmem:[#allocation5 + $0xbd8] sm:$0xff] }
 0x110   :  { %4387 = vmatprep.subr.bf16.mxu0 %v4386_v18  ;;  %v400_v18 = vld [vmem:[#allocation5 + $0x918] sm:$0xff]  ;;  %v4160_v61 = vpack.c.bf16 %v391_v17, %v383_v16  ;;  %v519_v1 = vld [vmem:[#allocation5 + $0xcd0] sm:$0xff] }
 0x111   :  { %4141 = vmatpush1.bf16.msra.mxu1 %v4140_v21  ;;  %v5636_v21 = vld [vmem:[#allocation2] sm:$0xff]  ;;  %v464_v16 = vld [vmem:[#allocation5 + $0xb18] sm:$0xff] }
 0x112   :  { %4143 = vmatprep.subr.bf16.mxu1 %v4142_v24  ;;  %v617_v24 = vld [vmem:[#allocation5 + $0xfe0] sm:$0xff]  ;;  %v528_v2 = vld [vmem:[#allocation5 + $0xd18] sm:$0xff] }
 0x113   :  { %4389 = vmatpush1.bf16.msra.mxu0 %v4388_v63  ;;  %v4162_v63 = vpack.c.bf16 %v408_v19, %v400_v18  ;;  %v4408_v35 = vpack.c.bf16 %v617_v24, %v609_v23  ;;  %v673_v19 = vld [vmem:[#allocation5 + $0x11a0] sm:$0xff]  ;;  %v698_v23 = vld [vmem:[#allocation5 + $0x1268] sm:$0xff] }
 0x114   :  { %4391 = vmatprep.subr.bf16.mxu0 %v4390_v30  ;;  %v399_v30 = vld [vmem:[#allocation5 + $0x910] sm:$0xff] }
 0x115   :  { %4145 = vmatpush1.bf16.msra.mxu1 %v4144_v34  ;;  %v424_v34 = vld [vmem:[#allocation5 + $0x9d8] sm:$0xff]  ;;  %v4164_v41 = vpack.c.bf16 %v407_v32, %v399_v30  ;;  %v697_v30 = vld [vmem:[#allocation5 + $0x1260] sm:$0xff] }
 0x116   :  { %4147 = vmatprep.subr.bf16.mxu1 %v4146_v37  ;;  %v625_v37 = vld [vmem:[#allocation5 + $0x1020] sm:$0xff]  ;;  %v4166_v48 = vpack.c.bf16 %v424_v34, %v416_v33  ;;  %v706_v33 = vld [vmem:[#allocation5 + $0x12a8] sm:$0xff] }
 0x117   :  { %4393 = vmatpush1.bf16.msra.mxu0 %v4392_v45  ;;  %v650_v45 = vld [vmem:[#allocation5 + $0x10e8] sm:$0xff] }
 0x118   :  { %4395 = vmatprep.subr.bf16.mxu0 %v4394_v5  ;;  %v5639_v5 = vld [vmem:[#allocation2 + $0x68] sm:$0xff]  ;;  %v4414_v54 = vpack.c.bf16 %v650_v45, %v642_v42  ;;  %v705_v42 = vld [vmem:[#allocation5 + $0x12a0] sm:$0xff] }
 0x119   :  { %4149 = vmatpush1.bf16.msra.mxu1 %v4148_v51  ;;  %v423_v51 = vld [vmem:[#allocation5 + $0x9d0] sm:$0xff]  ;;  %v714_v34 = vld [vmem:[#allocation5 + $0x12e8] sm:$0xff]  ;;  %v713_v45 = vld [vmem:[#allocation5 + $0x12e0] sm:$0xff] }
 0x11a   :  { %4151 = vmatprep.subr.bf16.mxu1 %v4150_v53  ;;  %v4412_v53 = vpack.c.bf16 %v633_v38, %v625_v37  ;;  %v487_v37 = vld [vmem:[#allocation5 + $0xbd0] sm:$0xff]  ;;  %v504_v38 = vld [vmem:[#allocation5 + $0xc58] sm:$0xff] }
 0x11b   :  { %4397 = vmatpush1.bf16.msra.mxu0 %v4396_v44  ;;  %v4168_v44 = vpack.c.bf16 %v423_v51, %v415_v50  ;;  %v730_v50 = vld [vmem:[#allocation5 + $0x1368] sm:$0xff] }
 0x11c   :  { %4399 = vmatprep.subr.bf16.mxu0 %v4398_v58  ;;  %v658_v58 = vld [vmem:[#allocation5 + $0x1128] sm:$0xff] }
 0x11d   :  { %4153 = vmatpush1.bf16.msra.mxu1 %v4152_v31  ;;  %v4170_v31 = vpack.c.bf16 %v440_v52, %v432_v28  ;;  %v4418_v6 = vpack.c.bf16 %v666_v59, %v658_v58  ;;  %v495_v28 = vld [vmem:[#allocation5 + $0xc10] sm:$0xff]  ;;  %v512_v52 = vld [vmem:[#allocation5 + $0xc98] sm:$0xff]  ;;  %v738_v58 = vld [vmem:[#allocation5 + $0x13a8] sm:$0xff] }
 0x11e   :  { %4155 = vmatprep.subr.bf16.mxu1 %v4154_v39  ;;  %v448_v39 = vld [vmem:[#allocation5 + $0xa98] sm:$0xff]  ;;  %v746_v59 = vld [vmem:[#allocation5 + $0x13e8] sm:$0xff] }
 0x11f   :  { %4401 = vmatpush1.bf16.msra.mxu0 %v4400_v8  ;;  %v665_v8 = vld [vmem:[#allocation5 + $0x1160] sm:$0xff] }
 0x120   :  { %1251 = vmatmul.mubr.f32.vlgmr.msra.gmra.mrb[8].mxu1 %v5636_v21  ;;  %4403 = vmatprep.subr.bf16.mxu0 %v4402_v9  ;;  %v5642_v9 = vld [vmem:[#allocation2 + $0x90] sm:$0xff]  ;;  %v4420_v17 = vpack.c.bf16 %v665_v8, %v657_v7  ;;  %v745_v7 = vld [vmem:[#allocation5 + $0x13e0] sm:$0xff] }
 0x121   :  { %4157 = vmatpush1.bf16.msra.mxu1 %v4156_v47  ;;  %1256 = vmatprep.mubr.f32.mxu1 %v5637_v29  ;;  %v682_v47 = vld [vmem:[#allocation5 + $0x11e8] sm:$0xff] }
 0x122   :  { %4159 = vmatprep.subr.bf16.mxu1 %v4158_v49  ;;  %v455_v49 = vld [vmem:[#allocation5 + $0xad0] sm:$0xff]  ;;  %v4422_v18 = vpack.c.bf16 %v682_v47, %v674_v12 }
 0x123   :  { %4405 = vmatpush1.bf16.msra.mxu0 %v4404_v20  ;;  %v681_v20 = vld [vmem:[#allocation5 + $0x11e0] sm:$0xff]  ;;  %v4176_v21 = vpack.c.bf16 %v455_v49, %v447_v14  ;;  %v527_v47 = vld [vmem:[#allocation5 + $0xd10] sm:$0xff]  ;;  %v552_v14 = vld [vmem:[#allocation5 + $0xdd8] sm:$0xff] }
 0x124   :  { %4407 = vmatprep.subr.bf16.mxu0 %v4406_v22  ;;  %1257 = vmatmul.mubr.f32.gmra.mrb[10].mxu1 %v5638_v40  ;;  %v690_v22 = vld [vmem:[#allocation5 + $0x1228] sm:$0xff]  ;;  %v4424_v29 = vpack.c.bf16 %v681_v20, %v673_v19 }
 0x125   :  { %4161 = vmatpush1.bf16.msra.mxu1 %v4160_v61  ;;  %1262 = vmatprep.mubr.f32.mxu1 %v5639_v5  ;;  %v463_v61 = vld [vmem:[#allocation5 + $0xb10] sm:$0xff]  ;;  %v770_v19 = vld [vmem:[#allocation5 + $0x14a8] sm:$0xff] }
 0x126   :  { %4163 = vmatprep.subr.bf16.mxu1 %v4162_v63  ;;  %v689_v63 = vld [vmem:[#allocation5 + $0x1220] sm:$0xff]  ;;  %v4180_v32 = vpack.c.bf16 %v471_v26, %v463_v61  ;;  %v778_v20 = vld [vmem:[#allocation5 + $0x14e8] sm:$0xff]  ;;  %v568_v61 = vld [vmem:[#allocation5 + $0xe58] sm:$0xff] }
 0x127   :  { %4409 = vmatpush1.bf16.msra.mxu0 %v4408_v35  ;;  %v4428_v40 = vpack.c.bf16 %v697_v30, %v689_v63  ;;  %v786_v63 = vld [vmem:[#allocation5 + $0x1528] sm:$0xff] }
 0x128   :  { %4411 = vmatprep.subr.bf16.mxu0 %v4410_v36  ;;  %1263 = vmatmul.mubr.f32.gmra.mrb[12].mxu1 %v5640_v57  ;;  %v479_v36 = vld [vmem:[#allocation5 + $0xb90] sm:$0xff]  ;;  %v729_v57 = vld [vmem:[#allocation5 + $0x1360] sm:$0xff]  ;;  %v794_v30 = vld [vmem:[#allocation5 + $0x1568] sm:$0xff] }
 0x129   :  { %4165 = vmatpush1.bf16.msra.mxu1 %v4164_v41  ;;  %1268 = vmatprep.mubr.f32.mxu1 %v5641_v62  ;;  %v5996_v41 = vld [vmem:[#allocation2 + $0x28] sm:$0xff]  ;;  %v4184_v5 = vpack.c.bf16 %v487_v37, %v479_v36  ;;  %v584_v36 = vld [vmem:[#allocation5 + $0xed8] sm:$0xff] }
 0x12a   :  { %4167 = vmatprep.subr.bf16.mxu1 %v4166_v48  ;;  %1607 = vmatmul.mubr.f32.vlgmr.msra.gmra.mrb[8].mxu0 %v5959_v43  ;;  %v4174_v43 = vpack.c.bf16 %v456_v3, %v448_v39  ;;  %v722_v48 = vld [vmem:[#allocation5 + $0x1328] sm:$0xff]  ;;  %v536_v39 = vld [vmem:[#allocation5 + $0xd58] sm:$0xff]  ;;  %v4436_v3 = vpack.c.bf16 %v729_v57, %v721_v56 }
 0x12b   :  { %4413 = vmatpush1.bf16.msra.mxu0 %v4412_v53  ;;  %1612 = vmatprep.mubr.f32.mxu0 %v5961_v46  ;;  %v472_v46 = vld [vmem:[#allocation5 + $0xb58] sm:$0xff]  ;;  %v4434_v55 = vpack.c.bf16 %v730_v50, %v722_v48  ;;  %v4194_v12 = vpack.c.bf16 %v536_v39, %v528_v2  ;;  %v575_v48 = vld [vmem:[#allocation5 + $0xe90] sm:$0xff]  ;;  %v818_v56 = vld [vmem:[#allocation5 + $0x1628] sm:$0xff] }
 0x12c   :  { %4415 = vmatprep.subr.bf16.mxu0 %v4414_v54  ;;  %1269 = vmatmul.mubr.f32.gmra.mrb[14].mxu1 %v5642_v9  ;;  %v4178_v24 = vpack.c.bf16 %v472_v46, %v464_v16  ;;  %v520_v53 = vld [vmem:[#allocation5 + $0xcd8] sm:$0xff]  ;;  %v4432_v54 = vpack.c.bf16 %v713_v45, %v705_v42  ;;  %v754_v9 = vld [vmem:[#allocation5 + $0x1428] sm:$0xff]  ;;  %v753_v46 = vld [vmem:[#allocation5 + $0x1420] sm:$0xff] }
 0x12d   :  { %4169 = vmatpush1.bf16.msra.mxu1 %v4168_v44  ;;  %1339 = vmatprep.mubr.f32.mxu1 %v5643_v13  ;;  %v4190_v62 = vpack.c.bf16 %v520_v53, %v512_v52  ;;  %v535_v13 = vld [vmem:[#allocation5 + $0xd50] sm:$0xff]  ;;  %v802_v42 = vld [vmem:[#allocation5 + $0x15a8] sm:$0xff]  ;;  %v801_v53 = vld [vmem:[#allocation5 + $0x15a0] sm:$0xff] }
 0x12e   :  { %4171 = vmatprep.subr.bf16.mxu1 %v4170_v31  ;;  %1613 = vmatmul.mubr.f32.gmra.mrb[10].mxu0 %v5965_v60  ;;  %v480_v60 = vld [vmem:[#allocation5 + $0xb98] sm:$0xff]  ;;  %v511_v31 = vld [vmem:[#allocation5 + $0xc90] sm:$0xff]  ;;  %v810_v45 = vld [vmem:[#allocation5 + $0x15e8] sm:$0xff] }
 0x12f   :  { %4417 = vmatpush1.bf16.msra.mxu0 %v4416_v4  ;;  %1618 = vmatprep.mubr.f32.mxu0 %v5967_v0  ;;  %v4426_v0 = vpack.c.bf16 %v698_v23, %v690_v22  ;;  %v4182_v35 = vpack.c.bf16 %v488_v27, %v480_v60  ;;  %v4438_v4 = vpack.c.bf16 %v746_v59, %v738_v58  ;;  %v543_v22 = vld [vmem:[#allocation5 + $0xd90] sm:$0xff]  ;;  %v769_v27 = vld [vmem:[#allocation5 + $0x14a0] sm:$0xff]  ;;  %v826_v57 = vld [vmem:[#allocation5 + $0x1668] sm:$0xff] }
 0x130   :  { %4419 = vmatprep.subr.bf16.mxu0 %v4418_v6  ;;  %v737_v6 = vld [vmem:[#allocation5 + $0x13a0] sm:$0xff]  ;;  %v4192_v8 = vpack.c.bf16 %v519_v1, %v511_v31  ;;  %v551_v23 = vld [vmem:[#allocation5 + $0xdd0] sm:$0xff]  ;;  %v4446_v60 = vpack.c.bf16 %v778_v20, %v770_v19  ;;  %v4454_v52 = vpack.c.bf16 %v810_v45, %v802_v42  ;;  %v616_v31 = vld [vmem:[#allocation5 + $0xfd8] sm:$0xff]  ;;  %v4458_v2 = vpack.c.bf16 %v826_v57, %v818_v56 }
 0x131   :  { %4173 = vmatpush1.bf16.msra.mxu1 %v4172_v10  ;;  %v762_v10 = vld [vmem:[#allocation5 + $0x1468] sm:$0xff]  ;;  %v4440_v49 = vpack.c.bf16 %v745_v7, %v737_v6  ;;  %v583_v50 = vld [vmem:[#allocation5 + $0xed0] sm:$0xff]  ;;  %v817_v39 = vld [vmem:[#allocation5 + $0x1620] sm:$0xff] }
 0x132   :  { %4175 = vmatprep.subr.bf16.mxu1 %v4174_v43  ;;  %1619 = vmatmul.mubr.f32.gmra.mrb[12].mxu0 %v5971_v11  ;;  %v496_v11 = vld [vmem:[#allocation5 + $0xc18] sm:$0xff]  ;;  %v4442_v16 = vpack.c.bf16 %v762_v10, %v754_v9  ;;  %v591_v58 = vld [vmem:[#allocation5 + $0xf10] sm:$0xff]  ;;  %v834_v6 = vld [vmem:[#allocation5 + $0x16a8] sm:$0xff] }
 0x133   :  { %4421 = vmatpush1.bf16.msra.mxu0 %v4420_v17  ;;  %1624 = vmatprep.mubr.f32.mxu0 %v5973_v15  ;;  %v4430_v15 = vpack.c.bf16 %v714_v34, %v706_v33  ;;  %v4186_v51 = vpack.c.bf16 %v504_v38, %v496_v11  ;;  %v544_v43 = vld [vmem:[#allocation5 + $0xd98] sm:$0xff]  ;;  %v761_v17 = vld [vmem:[#allocation5 + $0x1460] sm:$0xff]  ;;  %v559_v33 = vld [vmem:[#allocation5 + $0xe10] sm:$0xff]  ;;  %v4450_v11 = vpack.c.bf16 %v794_v30, %v786_v63 }
 0x134   :  { %4423 = vmatprep.subr.bf16.mxu0 %v4422_v18  ;;  %v4196_v18 = vpack.c.bf16 %v535_v13, %v527_v47  ;;  %v4444_v26 = vpack.c.bf16 %v761_v17, %v753_v46  ;;  %v567_v34 = vld [vmem:[#allocation5 + $0xe50] sm:$0xff]  ;;  %v785_v38 = vld [vmem:[#allocation5 + $0x1520] sm:$0xff]  ;;  %v842_v7 = vld [vmem:[#allocation5 + $0x16e8] sm:$0xff] }
 0x135   :  { %4177 = vmatpush1.bf16.msra.mxu1 %v4176_v21  ;;  %v4198_v21 = vpack.c.bf16 %v552_v14, %v544_v43  ;;  %v599_v59 = vld [vmem:[#allocation5 + $0xf50] sm:$0xff]  ;;  %v632_v47 = vld [vmem:[#allocation5 + $0x1058] sm:$0xff]  ;;  %v4462_v43 = vpack.c.bf16 %v842_v7, %v834_v6  ;;  %v833_v14 = vld [vmem:[#allocation5 + $0x16a0] sm:$0xff] }
 0x136   :  { %4179 = vmatprep.subr.bf16.mxu1 %v4178_v24  ;;  %1625 = vmatmul.mubr.f32.gmra.mrb[14].mxu0 %v5977_v25  ;;  %v503_v25 = vld [vmem:[#allocation5 + $0xc50] sm:$0xff]  ;;  %v560_v24 = vld [vmem:[#allocation5 + $0xe18] sm:$0xff]  ;;  %v850_v46 = vld [vmem:[#allocation5 + $0x1728] sm:$0xff] }
 0x137   :  { %4425 = vmatpush1.bf16.msra.mxu0 %v4424_v29  ;;  %1695 = vmatprep.mubr.f32.mxu0 %v5996_v41  ;;  %v4188_v44 = vpack.c.bf16 %v503_v25, %v495_v28  ;;  %v777_v29 = vld [vmem:[#allocation5 + $0x14e0] sm:$0xff]  ;;  %v600_v28 = vld [vmem:[#allocation5 + $0xf58] sm:$0xff]  ;;  %v607_v9 = vld [vmem:[#allocation5 + $0xf90] sm:$0xff] }
 0x138   :  { %4427 = vmatprep.subr.bf16.mxu0 %v4426_v0  ;;  %v4200_v0 = vpack.c.bf16 %v551_v23, %v543_v22  ;;  %v4448_v37 = vpack.c.bf16 %v777_v29, %v769_v27  ;;  %v615_v10 = vld [vmem:[#allocation5 + $0xfd0] sm:$0xff]  ;;  %v858_v17 = vld [vmem:[#allocation5 + $0x1768] sm:$0xff]  ;;  %v648_v22 = vld [vmem:[#allocation5 + $0x10d8] sm:$0xff] }
 0x139   :  { %4181 = vmatpush1.bf16.msra.mxu1 %v4180_v32  ;;  %v4202_v32 = vpack.c.bf16 %v568_v61, %v560_v24  ;;  %v623_v19 = vld [vmem:[#allocation5 + $0x1010] sm:$0xff]  ;;  %v4466_v24 = vpack.c.bf16 %v858_v17, %v850_v46  ;;  %v849_v61 = vld [vmem:[#allocation5 + $0x1720] sm:$0xff]  ;;  %v866_v27 = vld [vmem:[#allocation5 + $0x17a8] sm:$0xff] }
 0x13a   :  { %4183 = vmatprep.subr.bf16.mxu1 %v4182_v35  ;;  %v576_v35 = vld [vmem:[#allocation5 + $0xe98] sm:$0xff]  ;;  %v631_v20 = vld [vmem:[#allocation5 + $0x1050] sm:$0xff]  ;;  %v874_v29 = vld [vmem:[#allocation5 + $0x17e8] sm:$0xff] }
 0x13b   :  { %4429 = vmatpush1.bf16.msra.mxu0 %v4428_v40  ;;  %v793_v40 = vld [vmem:[#allocation5 + $0x1560] sm:$0xff]  ;;  %v639_v63 = vld [vmem:[#allocation5 + $0x1090] sm:$0xff]  ;;  %v5646_v42 = vld [vmem:[#allocation2 + $0x48] sm:$0xff] }
 0x13c   :  { %4431 = vmatprep.subr.bf16.mxu0 %v4430_v15  ;;  %v4204_v15 = vpack.c.bf16 %v567_v34, %v559_v33  ;;  %v4452_v25 = vpack.c.bf16 %v793_v40, %v785_v38  ;;  %v647_v30 = vld [vmem:[#allocation5 + $0x10d0] sm:$0xff]  ;;  %v664_v33 = vld [vmem:[#allocation5 + $0x1158] sm:$0xff]  ;;  %v2006_v57 = vld [vmem:[#allocation8 + $0x98] sm:$0xff] }
 0x13d   :  { %4185 = vmatpush1.bf16.msra.mxu1 %v4184_v5  ;;  %v4206_v5 = vpack.c.bf16 %v584_v36, %v576_v35  ;;  %v5645_v35 = vld [vmem:[#allocation2 + $0x10] sm:$0xff]  ;;  %v4470_v36 = vpack.c.bf16 %v874_v29, %v866_v27  ;;  %v4224_v38 = vpack.c.bf16 %v647_v30, %v639_v63  ;;  %v6002_v46 = vld [vmem:[#allocation2 + $0x58] sm:$0xff]  ;;  %v6009_v63 = vld [vmem:[#allocation2 + $0x88] sm:$0xff] }
 0x13e   :  { %4187 = vmatprep.subr.bf16.mxu1 %v4186_v51  ;;  %v592_v51 = vld [vmem:[#allocation5 + $0xf18] sm:$0xff]  ;;  %v1988_v40 = vld [vmem:[#allocation8 + $0x8] sm:$0xff] }
 0x13f   :  { %4433 = vmatpush1.bf16.msra.mxu0 %v4432_v54  ;;  %v809_v54 = vld [vmem:[#allocation5 + $0x15e0] sm:$0xff]  ;;  %v2000_v56 = vld [vmem:[#allocation8 + $0x68] sm:$0xff]  ;;  %v720_v27 = vld [vmem:[#allocation5 + $0x1318] sm:$0xff] }
 0x140   :  { %4435 = vmatprep.subr.bf16.mxu0 %v4434_v55  ;;  %v4208_v55 = vpack.c.bf16 %v583_v50, %v575_v48  ;;  %v4456_v1 = vpack.c.bf16 %v809_v54, %v801_v53  ;;  %v663_v48 = vld [vmem:[#allocation5 + $0x1150] sm:$0xff]  ;;  %v672_v50 = vld [vmem:[#allocation5 + $0x1198] sm:$0xff]  ;;  %v5647_v54 = vld [vmem:[#allocation2 + $0x40] sm:$0xff] }
 0x141   :  { %4189 = vmatpush1.bf16.msra.mxu1 %v4188_v44  ;;  %v4210_v44 = vpack.c.bf16 %v600_v28, %v592_v51  ;;  %v680_v51 = vld [vmem:[#allocation5 + $0x11d8] sm:$0xff]  ;;  %v5649_v6 = vld [vmem:[#allocation2 + $0x70] sm:$0xff] }
 0x142   :  { %4191 = vmatprep.subr.bf16.mxu1 %v4190_v62  ;;  %v608_v62 = vld [vmem:[#allocation5 + $0xf98] sm:$0xff] }
 0x143   :  { %4437 = vmatpush1.bf16.msra.mxu0 %v4436_v3  ;;  %v825_v3 = vld [vmem:[#allocation5 + $0x1660] sm:$0xff]  ;;  %v1993_v53 = vld [vmem:[#allocation8 + $0x30] sm:$0xff] }
 0x144   :  { %4439 = vmatprep.subr.bf16.mxu0 %v4438_v4  ;;  %v4212_v4 = vpack.c.bf16 %v599_v59, %v591_v58  ;;  %v4460_v13 = vpack.c.bf16 %v825_v3, %v817_v39  ;;  %v4230_v58 = vpack.c.bf16 %v680_v51, %v672_v50  ;;  %v671_v59 = vld [vmem:[#allocation5 + $0x1190] sm:$0xff]  ;;  %v4670_v39 = vpack.c.bf16 %v2006_v57, %v2000_v56  ;;  %v1999_v3 = vld [vmem:[#allocation8 + $0x60] sm:$0xff]  ;;  %v728_v29 = vld [vmem:[#allocation5 + $0x1358] sm:$0xff] }
 0x145   :  { %4193 = vmatpush1.bf16.msra.mxu1 %v4192_v8  ;;  %v4214_v8 = vpack.c.bf16 %v616_v31, %v608_v62  ;;  %v679_v62 = vld [vmem:[#allocation5 + $0x11d0] sm:$0xff]  ;;  %v688_v31 = vld [vmem:[#allocation5 + $0x1218] sm:$0xff] }
 0x146   :  { %4195 = vmatprep.subr.bf16.mxu1 %v4194_v12  ;;  %v624_v12 = vld [vmem:[#allocation5 + $0x1018] sm:$0xff]  ;;  %v4232_v7 = vpack.c.bf16 %v679_v62, %v671_v59  ;;  %v2047_v59 = vld [vmem:[#allocation8 + $0x1e0] sm:$0xff] }
 0x147   :  { %4441 = vmatpush1.bf16.msra.mxu0 %v4440_v49  ;;  %v841_v49 = vld [vmem:[#allocation5 + $0x16e0] sm:$0xff]  ;;  %v2041_v50 = vld [vmem:[#allocation8 + $0x1b0] sm:$0xff] }
 0x148   :  { %4443 = vmatprep.subr.bf16.mxu0 %v4442_v16  ;;  %v4216_v16 = vpack.c.bf16 %v615_v10, %v607_v9  ;;  %v4464_v23 = vpack.c.bf16 %v841_v49, %v833_v14  ;;  %v2018_v9 = vld [vmem:[#allocation8 + $0xf8] sm:$0xff]  ;;  %v5650_v10 = vld [vmem:[#allocation2 + $0xa8] sm:$0xff]  ;;  %v704_v14 = vld [vmem:[#allocation5 + $0x1298] sm:$0xff] }
 0x149   :  { %4197 = vmatpush1.bf16.msra.mxu1 %v4196_v18  ;;  %v4218_v18 = vpack.c.bf16 %v632_v47, %v624_v12  ;;  %v687_v47 = vld [vmem:[#allocation5 + $0x1210] sm:$0xff]  ;;  %v712_v49 = vld [vmem:[#allocation5 + $0x12d8] sm:$0xff] }
 0x14a   :  { %4199 = vmatprep.subr.bf16.mxu1 %v4198_v21  ;;  %v640_v21 = vld [vmem:[#allocation5 + $0x1098] sm:$0xff] }
 0x14b   :  { %4445 = vmatpush1.bf16.msra.mxu0 %v4444_v26  ;;  %v857_v26 = vld [vmem:[#allocation5 + $0x1760] sm:$0xff]  ;;  %v752_v56 = vld [vmem:[#allocation5 + $0x1418] sm:$0xff] }
 0x14c   :  { %4447 = vmatprep.subr.bf16.mxu0 %v4446_v60  ;;  %v4220_v60 = vpack.c.bf16 %v631_v20, %v623_v19  ;;  %v4468_v34 = vpack.c.bf16 %v857_v26, %v849_v61  ;;  %v2017_v19 = vld [vmem:[#allocation8 + $0xf0] sm:$0xff]  ;;  %v5653_v20 = vld [vmem:[#allocation2 + $0xa0] sm:$0xff]  ;;  %v703_v61 = vld [vmem:[#allocation5 + $0x1290] sm:$0xff] }
 0x14d   :  { %4201 = vmatpush1.bf16.msra.mxu1 %v4200_v0  ;;  %v4222_v0 = vpack.c.bf16 %v648_v22, %v640_v21  ;;  %v2024_v22 = vld [vmem:[#allocation8 + $0x128] sm:$0xff]  ;;  %v760_v57 = vld [vmem:[#allocation5 + $0x1458] sm:$0xff] }
 0x14e   :  { %4203 = vmatprep.subr.bf16.mxu1 %v4202_v32  ;;  %v656_v32 = vld [vmem:[#allocation5 + $0x1118] sm:$0xff]  ;;  %v711_v26 = vld [vmem:[#allocation5 + $0x12d0] sm:$0xff] }
 0x14f   :  { %4449 = vmatpush1.bf16.msra.mxu0 %v4448_v37  ;;  %v865_v37 = vld [vmem:[#allocation5 + $0x17a0] sm:$0xff]  ;;  %v4226_v45 = vpack.c.bf16 %v664_v33, %v656_v32  ;;  %v2023_v32 = vld [vmem:[#allocation8 + $0x120] sm:$0xff]  ;;  %v4240_v33 = vpack.c.bf16 %v711_v26, %v703_v61  ;;  %v2053_v62 = vld [vmem:[#allocation8 + $0x210] sm:$0xff] }
 0x150   :  { %4451 = vmatprep.subr.bf16.mxu0 %v4450_v11  ;;  %v873_v11 = vld [vmem:[#allocation5 + $0x17e0] sm:$0xff]  ;;  %v2077_v61 = vld [vmem:[#allocation8 + $0x2d0] sm:$0xff] }
 0x151   :  { %4205 = vmatpush1.bf16.msra.mxu1 %v4204_v15  ;;  %v1994_v15 = vld [vmem:[#allocation8 + $0x38] sm:$0xff]  ;;  %v4472_v28 = vpack.c.bf16 %v873_v11, %v865_v37  ;;  %v719_v37 = vld [vmem:[#allocation5 + $0x1310] sm:$0xff] }
 0x152   :  { %4207 = vmatprep.subr.bf16.mxu1 %v4206_v5  ;;  %v655_v5 = vld [vmem:[#allocation5 + $0x1110] sm:$0xff] }
 0x153   :  { %4453 = vmatpush1.bf16.msra.mxu0 %v4452_v25  ;;  %v4666_v25 = vpack.c.bf16 %v1994_v15, %v1988_v40  ;;  %v727_v11 = vld [vmem:[#allocation5 + $0x1350] sm:$0xff]  ;;  %v736_v40 = vld [vmem:[#allocation5 + $0x1398] sm:$0xff] }
 0x154   :  { %4455 = vmatprep.subr.bf16.mxu0 %v4454_v52  ;;  %v1987_v52 = vld [vmem:[#allocation8] sm:$0xff]  ;;  %v744_v15 = vld [vmem:[#allocation5 + $0x13d8] sm:$0xff]  ;;  %v4244_v51 = vpack.c.bf16 %v727_v11, %v719_v37 }
 0x155   :  { %4209 = vmatpush1.bf16.msra.mxu1 %v4208_v55  ;;  %v4228_v55 = vpack.c.bf16 %v663_v48, %v655_v5  ;;  %v2035_v48 = vld [vmem:[#allocation8 + $0x180] sm:$0xff]  ;;  %v2089_v37 = vld [vmem:[#allocation8 + $0x330] sm:$0xff] }
 0x156   :  { %4211 = vmatprep.subr.bf16.mxu1 %v4210_v44  ;;  %v5648_v44 = vld [vmem:[#allocation2 + $0x78] sm:$0xff] }
 0x157   :  { %4457 = vmatpush1.bf16.msra.mxu0 %v4456_v1  ;;  %v696_v1 = vld [vmem:[#allocation5 + $0x1258] sm:$0xff] }
 0x158   :  { %4459 = vmatprep.subr.bf16.mxu0 %v4458_v2  ;;  %v4668_v2 = vpack.c.bf16 %v1993_v53, %v1987_v52  ;;  %v4234_v12 = vpack.c.bf16 %v696_v1, %v688_v31  ;;  %v4246_v52 = vpack.c.bf16 %v744_v15, %v736_v40  ;;  %v735_v53 = vld [vmem:[#allocation5 + $0x1390] sm:$0xff]  ;;  %v2102_v15 = vld [vmem:[#allocation8 + $0x398] sm:$0xff] }
 0x159   :  { %4213 = vmatpush1.bf16.msra.mxu1 %v4212_v4  ;;  %v2005_v4 = vld [vmem:[#allocation8 + $0x90] sm:$0xff]  ;;  %v2060_v1 = vld [vmem:[#allocation8 + $0x248] sm:$0xff] }
 0x15a   :  { %4215 = vmatprep.subr.bf16.mxu1 %v4214_v8  ;;  %v2012_v8 = vld [vmem:[#allocation8 + $0xc8] sm:$0xff] }
 0x15b   :  { %4461 = vmatpush1.bf16.msra.mxu0 %v4460_v13  ;;  %v695_v13 = vld [vmem:[#allocation5 + $0x1250] sm:$0xff]  ;;  %v4674_v17 = vpack.c.bf16 %v2018_v9, %v2012_v8  ;;  %v4688_v8 = vpack.c.bf16 %v2053_v62, %v2047_v59 }
 0x15c   :  { %4463 = vmatprep.subr.bf16.mxu0 %v4462_v43  ;;  %v5999_v43 = vld [vmem:[#allocation2 + $0x20] sm:$0xff]  ;;  %v4236_v21 = vpack.c.bf16 %v695_v13, %v687_v47  ;;  %v2096_v40 = vld [vmem:[#allocation8 + $0x368] sm:$0xff] }
 0x15d   :  { %4217 = vmatpush1.bf16.msra.mxu1 %v4216_v16  ;;  %v4672_v16 = vpack.c.bf16 %v2005_v4, %v1999_v3  ;;  %v751_v3 = vld [vmem:[#allocation5 + $0x1410] sm:$0xff] }
 0x15e   :  { %4219 = vmatprep.subr.bf16.mxu1 %v4218_v18  ;;  %v2011_v18 = vld [vmem:[#allocation8 + $0xc0] sm:$0xff]  ;;  %v759_v4 = vld [vmem:[#allocation5 + $0x1450] sm:$0xff] }
 0x15f   :  { %4465 = vmatpush1.bf16.msra.mxu0 %v4464_v23  ;;  %v2030_v23 = vld [vmem:[#allocation8 + $0x158] sm:$0xff]  ;;  %v4252_v13 = vpack.c.bf16 %v759_v4, %v751_v3  ;;  %v815_v62 = vld [vmem:[#allocation5 + $0x1610] sm:$0xff] }
 0x160   :  { %1340 = vmatmul.mubr.f32.vlgmr.msra.gmra.mrb[8].mxu1 %v5645_v35  ;;  %4467 = vmatprep.subr.bf16.mxu0 %v4466_v24  ;;  %v4238_v24 = vpack.c.bf16 %v712_v49, %v704_v14  ;;  %v4678_v30 = vpack.c.bf16 %v2030_v23, %v2024_v22  ;;  %v2042_v35 = vld [vmem:[#allocation8 + $0x1b8] sm:$0xff]  ;;  %v2072_v14 = vld [vmem:[#allocation8 + $0x2a8] sm:$0xff] }
 0x161   :  { %4221 = vmatpush1.bf16.msra.mxu1 %v4220_v60  ;;  %1345 = vmatprep.mubr.f32.mxu1 %v5646_v42  ;;  %v6006_v60 = vld [vmem:[#allocation2 + $0x50] sm:$0xff]  ;;  %v2078_v49 = vld [vmem:[#allocation8 + $0x2d8] sm:$0xff] }
 0x162   :  { %4223 = vmatprep.subr.bf16.mxu1 %v4222_v0  ;;  %v4676_v0 = vpack.c.bf16 %v2017_v19, %v2011_v18  ;;  %v767_v18 = vld [vmem:[#allocation5 + $0x1490] sm:$0xff]  ;;  %v4694_v23 = vpack.c.bf16 %v2078_v49, %v2072_v14 }
 0x163   :  { %4469 = vmatpush1.bf16.msra.mxu0 %v4468_v34  ;;  %v2036_v34 = vld [vmem:[#allocation8 + $0x188] sm:$0xff] }
 0x164   :  { %4471 = vmatprep.subr.bf16.mxu0 %v4470_v36  ;;  %1346 = vmatmul.mubr.f32.gmra.mrb[10].mxu1 %v5647_v54  ;;  %v4242_v36 = vpack.c.bf16 %v728_v29, %v720_v27  ;;  %v4682_v5 = vpack.c.bf16 %v2042_v35, %v2036_v34  ;;  %v743_v54 = vld [vmem:[#allocation5 + $0x13d0] sm:$0xff]  ;;  %v2090_v29 = vld [vmem:[#allocation8 + $0x338] sm:$0xff] }
 0x165   :  { %4225 = vmatpush1.bf16.msra.mxu1 %v4224_v38  ;;  %1351 = vmatprep.mubr.f32.mxu1 %v5648_v44  ;;  %v6012_v38 = vld [vmem:[#allocation2 + $0x80] sm:$0xff]  ;;  %v4684_v44 = vpack.c.bf16 %v2041_v50, %v2035_v48  ;;  %v4248_v31 = vpack.c.bf16 %v743_v54, %v735_v53  ;;  %v775_v19 = vld [vmem:[#allocation5 + $0x14d0] sm:$0xff]  ;;  %v816_v50 = vld [vmem:[#allocation5 + $0x1618] sm:$0xff] }
 0x166   :  { %4227 = vmatprep.subr.bf16.mxu1 %v4226_v45  ;;  %v6015_v45 = vld [vmem:[#allocation2 + $0xb8] sm:$0xff]  ;;  %v4256_v26 = vpack.c.bf16 %v775_v19, %v767_v18  ;;  %v2084_v27 = vld [vmem:[#allocation8 + $0x308] sm:$0xff]  ;;  %v2095_v53 = vld [vmem:[#allocation8 + $0x360] sm:$0xff] }
 0x167   :  { %4473 = vmatpush1.bf16.msra.mxu0 %v4472_v28  ;;  %v2048_v28 = vld [vmem:[#allocation8 + $0x1e8] sm:$0xff]  ;;  %v4698_v35 = vpack.c.bf16 %v2090_v29, %v2084_v27  ;;  %v2101_v54 = vld [vmem:[#allocation8 + $0x390] sm:$0xff]  ;;  %v2138_v27 = vld [vmem:[#allocation8 + $0x4b8] sm:$0xff] }
 0x168   :  { %4667 = vmatprep.subr.bf16.mxu0 %v4666_v25  ;;  %1352 = vmatmul.mubr.f32.gmra.mrb[12].mxu1 %v5649_v6  ;;  %v2054_v25 = vld [vmem:[#allocation8 + $0x218] sm:$0xff]  ;;  %v768_v6 = vld [vmem:[#allocation5 + $0x1498] sm:$0xff]  ;;  %v807_v48 = vld [vmem:[#allocation5 + $0x15d0] sm:$0xff] }
 0x169   :  { %4229 = vmatpush1.bf16.msra.mxu1 %v4228_v55  ;;  %1357 = vmatprep.mubr.f32.mxu1 %v5650_v10  ;;  %v6018_v55 = vld [vmem:[#allocation2 + $0xb0] sm:$0xff]  ;;  %v2059_v10 = vld [vmem:[#allocation8 + $0x240] sm:$0xff]  ;;  %v856_v18 = vld [vmem:[#allocation5 + $0x1758] sm:$0xff] }
 0x16a   :  { %4231 = vmatprep.subr.bf16.mxu1 %v4230_v58  ;;  %1696 = vmatmul.mubr.f32.vlgmr.msra.gmra.mrb[8].mxu0 %v5999_v43  ;;  %v4686_v58 = vpack.c.bf16 %v2054_v25, %v2048_v28  ;;  %v831_v14 = vld [vmem:[#allocation5 + $0x1690] sm:$0xff] }
 0x16b   :  { %4669 = vmatpush1.bf16.msra.mxu0 %v4668_v2  ;;  %1701 = vmatprep.mubr.f32.mxu0 %v6002_v46  ;;  %v2066_v2 = vld [vmem:[#allocation8 + $0x278] sm:$0xff]  ;;  %v839_v49 = vld [vmem:[#allocation5 + $0x16d0] sm:$0xff] }
 0x16c   :  { %4671 = vmatprep.subr.bf16.mxu0 %v4670_v39  ;;  %1358 = vmatmul.mubr.f32.gmra.mrb[14].mxu1 %v5653_v20  ;;  %v4250_v39 = vpack.c.bf16 %v760_v57, %v752_v56  ;;  %v4690_v9 = vpack.c.bf16 %v2066_v2, %v2060_v1  ;;  %v784_v20 = vld [vmem:[#allocation5 + $0x1518] sm:$0xff] }
 0x16d   :  { %4233 = vmatpush1.bf16.msra.mxu1 %v4232_v7  ;;  %1428 = vmatprep.mubr.f32.mxu1 %v5996_v41  ;;  %v2029_v41 = vld [vmem:[#allocation8 + $0x150] sm:$0xff] }
 0x16e   :  { %4235 = vmatprep.subr.bf16.mxu1 %v4234_v12  ;;  %1702 = vmatmul.mubr.f32.gmra.mrb[10].mxu0 %v6006_v60  ;;  %v4680_v42 = vpack.c.bf16 %v2029_v41, %v2023_v32  ;;  %v776_v7 = vld [vmem:[#allocation5 + $0x14d8] sm:$0xff]  ;;  %v791_v32 = vld [vmem:[#allocation5 + $0x1550] sm:$0xff] }
 0x16f   :  { %4673 = vmatpush1.bf16.msra.mxu0 %v4672_v16  ;;  %1707 = vmatprep.mubr.f32.mxu0 %v6009_v63  ;;  %v2065_v12 = vld [vmem:[#allocation8 + $0x270] sm:$0xff] }
 0x170   :  { %4675 = vmatprep.subr.bf16.mxu0 %v4674_v17  ;;  %v4254_v17 = vpack.c.bf16 %v776_v7, %v768_v6  ;;  %v4692_v22 = vpack.c.bf16 %v2065_v12, %v2059_v10  ;;  %v800_v41 = vld [vmem:[#allocation5 + $0x1598] sm:$0xff]  ;;  %v2107_v6 = vld [vmem:[#allocation8 + $0x3c0] sm:$0xff]  ;;  %v2120_v10 = vld [vmem:[#allocation8 + $0x428] sm:$0xff] }
 0x171   :  { %4237 = vmatpush1.bf16.msra.mxu1 %v4236_v21  ;;  %v792_v21 = vld [vmem:[#allocation5 + $0x1558] sm:$0xff]  ;;  %v2126_v12 = vld [vmem:[#allocation8 + $0x458] sm:$0xff] }
 0x172   :  { %4239 = vmatprep.subr.bf16.mxu1 %v4238_v24  ;;  %1708 = vmatmul.mubr.f32.gmra.mrb[12].mxu0 %v6012_v38  ;;  %v2071_v24 = vld [vmem:[#allocation8 + $0x2a0] sm:$0xff]  ;;  %v832_v1 = vld [vmem:[#allocation5 + $0x1698] sm:$0xff] }
 0x173   :  { %4677 = vmatpush1.bf16.msra.mxu0 %v4676_v0  ;;  %1713 = vmatprep.mubr.f32.mxu0 %v6015_v45  ;;  %v4258_v0 = vpack.c.bf16 %v792_v21, %v784_v20  ;;  %v4696_v34 = vpack.c.bf16 %v2077_v61, %v2071_v24  ;;  %v840_v2 = vld [vmem:[#allocation5 + $0x16d8] sm:$0xff]  ;;  %v4710_v21 = vpack.c.bf16 %v2126_v12, %v2120_v10  ;;  %v2174_v10 = vld [vmem:[#allocation8 + $0x5d8] sm:$0xff] }
 0x174   :  { %4679 = vmatprep.subr.bf16.mxu0 %v4678_v30  ;;  %v783_v30 = vld [vmem:[#allocation5 + $0x1510] sm:$0xff]  ;;  %v2113_v7 = vld [vmem:[#allocation8 + $0x3f0] sm:$0xff]  ;;  %v4272_v61 = vpack.c.bf16 %v839_v49, %v831_v14 }
 0x175   :  { %4241 = vmatpush1.bf16.msra.mxu1 %v4240_v33  ;;  %v808_v33 = vld [vmem:[#allocation5 + $0x15d8] sm:$0xff]  ;;  %v4260_v11 = vpack.c.bf16 %v791_v32, %v783_v30  ;;  %v4708_v19 = vpack.c.bf16 %v2113_v7, %v2107_v6  ;;  %v855_v30 = vld [vmem:[#allocation5 + $0x1750] sm:$0xff] }
 0x176   :  { %4243 = vmatprep.subr.bf16.mxu1 %v4242_v36  ;;  %1714 = vmatmul.mubr.f32.gmra.mrb[14].mxu0 %v6018_v55  ;;  %v2083_v36 = vld [vmem:[#allocation8 + $0x300] sm:$0xff]  ;;  %v864_v32 = vld [vmem:[#allocation5 + $0x1798] sm:$0xff]  ;;  %v139_v14 = vld [vmem:[#allocation5 + $0xf0] sm:$0xff] }
 0x177   :  { %4681 = vmatpush1.bf16.msra.mxu0 %v4680_v42  ;;  %v4262_v42 = vpack.c.bf16 %v808_v33, %v800_v41  ;;  %v4700_v28 = vpack.c.bf16 %v2089_v37, %v2083_v36  ;;  %v872_v41 = vld [vmem:[#allocation5 + $0x17d8] sm:$0xff] }
 0x178   :  { %4683 = vmatprep.subr.bf16.mxu0 %v4682_v5  ;;  %v799_v5 = vld [vmem:[#allocation5 + $0x1590] sm:$0xff]  ;;  %v2137_v36 = vld [vmem:[#allocation8 + $0x4b0] sm:$0xff] }
 0x179   :  { %4245 = vmatpush1.bf16.msra.mxu1 %v4244_v51  ;;  %v824_v51 = vld [vmem:[#allocation5 + $0x1658] sm:$0xff]  ;;  %v4264_v57 = vpack.c.bf16 %v807_v48, %v799_v5  ;;  %v871_v5 = vld [vmem:[#allocation5 + $0x17d0] sm:$0xff] }
 0x17a   :  { %4247 = vmatprep.subr.bf16.mxu1 %v4246_v52  ;;  %v4702_v52 = vpack.c.bf16 %v2102_v15, %v2096_v40  ;;  %v4266_v59 = vpack.c.bf16 %v824_v51, %v816_v50  ;;  %v2150_v40 = vld [vmem:[#allocation8 + $0x518] sm:$0xff]  ;;  %v4278_v15 = vpack.c.bf16 %v872_v41, %v864_v32  ;;  %v116_v48 = vld [vmem:[#allocation5 + $0x38] sm:$0xff]  ;;  %v879_v32 = vlaneseq }
 0x17b   :  { %4685 = vmatpush1.bf16.msra.mxu0 %v4684_v44  ;;  %v6021_v47 = vpop.f32.mrb[0].mxu0  ;;  %v2108_v44 = vld [vmem:[#allocation8 + $0x3c8] sm:$0xff]  ;;  %v124_v50 = vld [vmem:[#allocation5 + $0x78] sm:$0xff] }
 0x17c   :  { %4687 = vmatprep.subr.bf16.mxu0 %v4686_v58  ;;  %v6023_v16 = vpop.f32.mrb[1].mxu0  ;;  %v2114_v58 = vld [vmem:[#allocation8 + $0x3f8] sm:$0xff]  ;;  %v2161_v6 = vld [vmem:[#allocation8 + $0x570] sm:$0xff] }
 0x17d   :  { %4249 = vmatpush1.bf16.msra.mxu1 %v4248_v31  ;;  %v823_v31 = vld [vmem:[#allocation5 + $0x1650] sm:$0xff]  ;;  %v4706_v4 = vpack.c.bf16 %v2114_v58, %v2108_v44  ;;  %v2162_v44 = vld [vmem:[#allocation8 + $0x578] sm:$0xff]  ;;  %v4474_v58 = vpack.c.bf16 %v124_v50, %v116_v48  ;;  %v148_v49 = vld [vmem:[#allocation5 + $0x138] sm:$0xff] }
 0x17e   :  { %4251 = vmatprep.subr.bf16.mxu1 %v4250_v39  ;;  %v4704_v39 = vpack.c.bf16 %v2101_v54, %v2095_v53  ;;  %v2149_v53 = vld [vmem:[#allocation8 + $0x510] sm:$0xff]  ;;  %v877_v48 = vld [vmem:[#allocation7] sm:$0xff]  ;;  %v5659_v50 = vld [vmem:[#allocation2 + $0x8] sm:$0xff] }
 0x17f   :  { %4689 = vmatpush1.bf16.msra.mxu0 %v4688_v8 }
 0x180   :  { %4691 = vmatprep.subr.bf16.mxu0 %v4690_v9  ;;  %v4268_v9 = vpack.c.bf16 %v823_v31, %v815_v62  ;;  %v123_v62 = vld [vmem:[#allocation5 + $0x70] sm:$0xff]  ;;  %v132_v31 = vld [vmem:[#allocation5 + $0xb8] sm:$0xff] }
 0x181   :  { %4253 = vmatpush1.bf16.msra.mxu1 %v4252_v13  ;;  %v6025_v25 = vpop.f32.mrb[2].mxu0  ;;  %v4270_v13 = vpack.c.bf16 %v840_v2, %v832_v1  ;;  %v140_v1 = vld [vmem:[#allocation5 + $0xf8] sm:$0xff] }
 0x182   :  { %4255 = vmatprep.subr.bf16.mxu1 %v4254_v17  ;;  %v6027_v56 = vpop.f32.mrb[3].mxu0  ;;  %v848_v17 = vld [vmem:[#allocation5 + $0x1718] sm:$0xff]  ;;  %v4478_v12 = vpack.c.bf16 %v140_v1, %v132_v31 }
 0x183   :  { %4693 = vmatpush1.bf16.msra.mxu0 %v4692_v22  ;;  %v2119_v22 = vld [vmem:[#allocation8 + $0x420] sm:$0xff]  ;;  %v4274_v29 = vpack.c.bf16 %v856_v18, %v848_v17  ;;  %v156_v17 = vld [vmem:[#allocation5 + $0x178] sm:$0xff] }
 0x184   :  { %4695 = vmatprep.subr.bf16.mxu0 %v4694_v23  ;;  %v2125_v23 = vld [vmem:[#allocation8 + $0x450] sm:$0xff] }
 0x185   :  { %4257 = vmatpush1.bf16.msra.mxu1 %v4256_v26  ;;  %v2132_v26 = vld [vmem:[#allocation8 + $0x488] sm:$0xff]  ;;  %v4712_v33 = vpack.c.bf16 %v2125_v23, %v2119_v22  ;;  %v2173_v22 = vld [vmem:[#allocation8 + $0x5d0] sm:$0xff] }
 0x186   :  { %4259 = vmatprep.subr.bf16.mxu1 %v4258_v0  ;;  %v847_v0 = vld [vmem:[#allocation5 + $0x1710] sm:$0xff]  ;;  %v228_v31 = vld [vmem:[#allocation5 + $0x3b8] sm:$0xff] }
 0x187   :  { %4697 = vmatpush1.bf16.msra.mxu0 %v4696_v34  ;;  %v4714_v34 = vpack.c.bf16 %v2138_v27, %v2132_v26  ;;  %v4276_v37 = vpack.c.bf16 %v855_v30, %v847_v0  ;;  %v147_v26 = vld [vmem:[#allocation5 + $0x130] sm:$0xff]  ;;  %v172_v0 = vld [vmem:[#allocation5 + $0x1f8] sm:$0xff] }
 0x188   :  { %4699 = vmatprep.subr.bf16.mxu0 %v4698_v35  ;;  %v2131_v35 = vld [vmem:[#allocation8 + $0x480] sm:$0xff]  ;;  %v155_v27 = vld [vmem:[#allocation5 + $0x170] sm:$0xff]  ;;  %v236_v1 = vld [vmem:[#allocation5 + $0x3f8] sm:$0xff] }
 0x189   :  { %4261 = vmatpush1.bf16.msra.mxu1 %v4260_v11  ;;  %v2144_v11 = vld [vmem:[#allocation8 + $0x4e8] sm:$0xff]  ;;  %v4716_v51 = vpack.c.bf16 %v2137_v36, %v2131_v35  ;;  %v188_v35 = vld [vmem:[#allocation5 + $0x278] sm:$0xff]  ;;  %v6042_v36 = vshrl.u32 %v879_v32, 7 }
 0x18a   :  { %4263 = vmatprep.subr.bf16.mxu1 %v4262_v42  ;;  %v863_v42 = vld [vmem:[#allocation5 + $0x1790] sm:$0xff] }
 0x18b   :  { %4701 = vmatpush1.bf16.msra.mxu0 %v4700_v28  ;;  %v4718_v28 = vpack.c.bf16 %v2150_v40, %v2144_v11  ;;  %v4280_v54 = vpack.c.bf16 %v871_v5, %v863_v42  ;;  %v179_v11 = vld [vmem:[#allocation5 + $0x230] sm:$0xff]  ;;  %v196_v40 = vld [vmem:[#allocation5 + $0x2b8] sm:$0xff]  ;;  %v881_v42 = vsub.s32 0, %v6042_v36 }
 0x18c   :  { %4703 = vmatprep.subr.bf16.mxu0 %v4702_v52  ;;  %v2143_v52 = vld [vmem:[#allocation8 + $0x4e0] sm:$0xff] }
 0x18d   :  { %4265 = vmatpush1.bf16.msra.mxu1 %v4264_v57  ;;  %v2156_v57 = vld [vmem:[#allocation8 + $0x548] sm:$0xff]  ;;  %v4720_v2 = vpack.c.bf16 %v2149_v53, %v2143_v52  ;;  %v212_v52 = vld [vmem:[#allocation5 + $0x338] sm:$0xff] }
 0x18e   :  { %4267 = vmatprep.subr.bf16.mxu1 %v4266_v59  ;;  %v115_v59 = vld [vmem:[#allocation5 + $0x30] sm:$0xff]  ;;  %v220_v53 = vld [vmem:[#allocation5 + $0x378] sm:$0xff] }
 0x18f   :  { %4705 = vmatpush1.bf16.msra.mxu0 %v4704_v39  ;;  %v4722_v39 = vpack.c.bf16 %v2162_v44, %v2156_v57  ;;  %v4476_v7 = vpack.c.bf16 %v123_v62, %v115_v59  ;;  %v4498_v44 = vpack.c.bf16 %v220_v53, %v212_v52  ;;  %v219_v59 = vld [vmem:[#allocation5 + $0x370] sm:$0xff] }
 0x190   :  { %v6029_v3 = vpop.f32.mrb[4].mxu0  ;;  %4707 = vmatprep.subr.bf16.mxu0 %v4706_v4  ;;  %v2155_v4 = vld [vmem:[#allocation8 + $0x540] sm:$0xff]  ;;  %v259_v52 = vld [vmem:[#allocation5 + $0x4b0] sm:$0xff] }
 0x191   :  { %v6031_v8 = vpop.f32.mrb[5].mxu0  ;;  %4269 = vmatpush1.bf16.msra.mxu1 %v4268_v9  ;;  %v2168_v9 = vld [vmem:[#allocation8 + $0x5a8] sm:$0xff]  ;;  %v4724_v18 = vpack.c.bf16 %v2161_v6, %v2155_v4  ;;  %v2186_v6 = vld [vmem:[#allocation8 + $0x638] sm:$0xff] }
 0x192   :  { %4271 = vmatprep.subr.bf16.mxu1 %v4270_v13  ;;  %v131_v13 = vld [vmem:[#allocation5 + $0xb0] sm:$0xff] }
 0x193   :  { %4709 = vmatpush1.bf16.msra.mxu0 %v4708_v19  ;;  %v4726_v19 = vpack.c.bf16 %v2174_v10, %v2168_v9  ;;  %v4480_v23 = vpack.c.bf16 %v139_v14, %v131_v13  ;;  %v2180_v4 = vld [vmem:[#allocation8 + $0x608] sm:$0xff]  ;;  %v4502_v14 = vpack.c.bf16 %v236_v1, %v228_v31 }
 0x194   :  { %v6033_v20 = vpop.f32.mrb[6].mxu0  ;;  %4711 = vmatprep.subr.bf16.mxu0 %v4710_v21  ;;  %v2167_v21 = vld [vmem:[#allocation8 + $0x5a0] sm:$0xff]  ;;  %v4730_v10 = vpack.c.bf16 %v2186_v6, %v2180_v4  ;;  %v267_v53 = vld [vmem:[#allocation5 + $0x4f0] sm:$0xff] }
 0x195   :  { %v6035_v24 = vpop.f32.mrb[7].mxu0  ;;  %4273 = vmatpush1.bf16.msra.mxu1 %v4272_v61  ;;  %v4482_v61 = vpack.c.bf16 %v156_v17, %v148_v49  ;;  %v4728_v30 = vpack.c.bf16 %v2173_v22, %v2167_v21  ;;  %v227_v49 = vld [vmem:[#allocation5 + $0x3b0] sm:$0xff]  ;;  %v244_v22 = vld [vmem:[#allocation5 + $0x438] sm:$0xff]  ;;  %v4512_v6 = vpack.c.bf16 %v267_v53, %v259_v52 }
 0x196   :  { %4275 = vmatprep.subr.bf16.mxu1 %v4274_v29  ;;  %v164_v29 = vld [vmem:[#allocation5 + $0x1b8] sm:$0xff]  ;;  %v235_v17 = vld [vmem:[#allocation5 + $0x3f0] sm:$0xff] }
 0x197   :  { %4713 = vmatpush1.bf16.msra.mxu0 %v4712_v33  ;;  %v4486_v41 = vpack.c.bf16 %v172_v0, %v164_v29  ;;  %v171_v33 = vld [vmem:[#allocation5 + $0x1f0] sm:$0xff]  ;;  %v2198_v0 = vld [vmem:[#allocation8 + $0x698] sm:$0xff]  ;;  %v2257_v53 = vld [vmem:[#allocation8 + $0x870] sm:$0xff] }
 0x198   :  { %4715 = vmatprep.subr.bf16.mxu0 %v4714_v34  ;;  %v180_v34 = vld [vmem:[#allocation5 + $0x238] sm:$0xff]  ;;  %v2192_v29 = vld [vmem:[#allocation8 + $0x668] sm:$0xff] }
 0x199   :  { %4277 = vmatpush1.bf16.msra.mxu1 %v4276_v37  ;;  %v4490_v37 = vpack.c.bf16 %v188_v35, %v180_v34  ;;  %v4734_v32 = vpack.c.bf16 %v2198_v0, %v2192_v29  ;;  %v2197_v34 = vld [vmem:[#allocation8 + $0x690] sm:$0xff]  ;;  %v331_v52 = vld [vmem:[#allocation5 + $0x6f0] sm:$0xff] }
 0x19a   :  { %4279 = vmatprep.subr.bf16.mxu1 %v4278_v15  ;;  %v204_v15 = vld [vmem:[#allocation5 + $0x2f8] sm:$0xff] }
 0x19b   :  { %4717 = vmatpush1.bf16.msra.mxu0 %v4716_v51  ;;  %v195_v51 = vld [vmem:[#allocation5 + $0x2b0] sm:$0xff]  ;;  %v2233_v29 = vld [vmem:[#allocation8 + $0x7b0] sm:$0xff] }
 0x19c   :  { %4719 = vmatprep.subr.bf16.mxu0 %v4718_v28  ;;  %v203_v28 = vld [vmem:[#allocation5 + $0x2f0] sm:$0xff]  ;;  %v308_v0 = vld [vmem:[#allocation5 + $0x638] sm:$0xff] }
 0x19d   :  { %4281 = vmatpush1.bf16.msra.mxu1 %v4280_v54  ;;  %v6050_v54 = vrot.slane %v877_v48, %v881_v42  ;;  %v4496_v57 = vpack.c.bf16 %v203_v28, %v195_v51 }
 0x19e   :  { %4475 = vmatprep.subr.bf16.mxu1 %v4474_v58  ;;  %v211_v58 = vld [vmem:[#allocation5 + $0x330] sm:$0xff] }
 0x19f   :  { %4721 = vmatpush1.bf16.msra.mxu0 %v4720_v2  ;;  %v4500_v9 = vpack.c.bf16 %v219_v59, %v211_v58  ;;  %v276_v59 = vld [vmem:[#allocation5 + $0x538] sm:$0xff] }
 0x1a0   :  { %1429 = vmatmul.mubr.f32.vlgmr.msra.gmra.mrb[8].mxu1 %v5999_v43  ;;  %4723 = vmatprep.subr.bf16.mxu0 %v4722_v39  ;;  %v4484_v43 = vpack.c.bf16 %v155_v27, %v147_v26 }
 0x1a1   :  { %4477 = vmatpush1.bf16.msra.mxu1 %v4476_v7  ;;  %1434 = vmatprep.mubr.f32.mxu1 %v6002_v46  ;;  %v163_v46 = vld [vmem:[#allocation5 + $0x1b0] sm:$0xff] }
 0x1a2   :  { %4479 = vmatprep.subr.bf16.mxu1 %v4478_v12  ;;  %v2179_v12 = vld [vmem:[#allocation8 + $0x600] sm:$0xff] }
 0x1a3   :  { %4725 = vmatpush1.bf16.msra.mxu0 %v4724_v18  ;;  %v2185_v18 = vld [vmem:[#allocation8 + $0x630] sm:$0xff] }
 0x1a4   :  { %1435 = vmatmul.mubr.f32.gmra.mrb[10].mxu1 %v6006_v60  ;;  %4727 = vmatprep.subr.bf16.mxu0 %v4726_v19  ;;  %v4488_v60 = vpack.c.bf16 %v171_v33, %v163_v46  ;;  %v243_v46 = vld [vmem:[#allocation5 + $0x430] sm:$0xff] }
 0x1a5   :  { %4481 = vmatpush1.bf16.msra.mxu1 %v4480_v23  ;;  %1440 = vmatprep.mubr.f32.mxu1 %v6009_v63  ;;  %v187_v63 = vld [vmem:[#allocation5 + $0x270] sm:$0xff]  ;;  %v252_v23 = vld [vmem:[#allocation5 + $0x478] sm:$0xff] }
 0x1a6   :  { %4483 = vmatprep.subr.bf16.mxu1 %v4482_v61  ;;  %v4492_v5 = vpack.c.bf16 %v187_v63, %v179_v11  ;;  %v4732_v61 = vpack.c.bf16 %v2185_v18, %v2179_v12  ;;  %v251_v33 = vld [vmem:[#allocation5 + $0x470] sm:$0xff]  ;;  %v268_v11 = vld [vmem:[#allocation5 + $0x4f8] sm:$0xff] }
 0x1a7   :  { %4729 = vmatpush1.bf16.msra.mxu0 %v4728_v30  ;;  %v4504_v30 = vpack.c.bf16 %v235_v17, %v227_v49  ;;  %v283_v12 = vld [vmem:[#allocation5 + $0x570] sm:$0xff]  ;;  %v300_v17 = vld [vmem:[#allocation5 + $0x5f8] sm:$0xff] }
 0x1a8   :  { %1441 = vmatmul.mubr.f32.gmra.mrb[12].mxu1 %v6012_v38  ;;  %v885_v38 = vsub.s32 1, %v6042_v36  ;;  %4731 = vmatprep.subr.bf16.mxu0 %v4730_v10 }
 0x1a9   :  { %4485 = vmatpush1.bf16.msra.mxu1 %v4484_v43  ;;  %1446 = vmatprep.mubr.f32.mxu1 %v6015_v45  ;;  %v4494_v45 = vpack.c.bf16 %v204_v15, %v196_v40  ;;  %v2191_v43 = vld [vmem:[#allocation8 + $0x660] sm:$0xff] }
 0x1aa   :  { %4487 = vmatprep.subr.bf16.mxu1 %v4486_v41  ;;  %v4506_v41 = vpack.c.bf16 %v252_v23, %v244_v22  ;;  %v4736_v63 = vpack.c.bf16 %v2197_v34, %v2191_v43  ;;  %v2234_v22 = vld [vmem:[#allocation8 + $0x7b8] sm:$0xff] }
 0x1ab   :  { %v2246_v43 = vld [vmem:[#allocation8 + $0x818] sm:$0xff] }
 0x1ac   :  { %1447 = vmatmul.mubr.f32.gmra.mrb[14].mxu1 %v6018_v55  ;;  %v6054_v55 = vrot.slane %v877_v48, %v885_v38 }
 0x1ad   :  { %4489 = vmatpush1.bf16.msra.mxu1 %v4488_v60  ;;  %1784 = vmatprep.mubr.f32.mxu1 %v5659_v50  ;;  %v4508_v50 = vpack.c.bf16 %v251_v33, %v243_v46  ;;  %v2239_v33 = vld [vmem:[#allocation8 + $0x7e0] sm:$0xff] }
 0x1ae   :  { %4491 = vmatprep.subr.bf16.mxu1 %v4490_v37  ;;  %v260_v37 = vld [vmem:[#allocation5 + $0x4b8] sm:$0xff] }
 0x1af   :  { %v4510_v28 = vpack.c.bf16 %v268_v11, %v260_v37  ;;  %v315_v37 = vld [vmem:[#allocation5 + $0x670] sm:$0xff]  ;;  %v2245_v11 = vld [vmem:[#allocation8 + $0x810] sm:$0xff] }
 0x1b1   :  { %4493 = vmatpush1.bf16.msra.mxu1 %v4492_v5  ;;  %v2210_v5 = vld [vmem:[#allocation8 + $0x6f8] sm:$0xff] }
 0x1b2   :  { %4495 = vmatprep.subr.bf16.mxu1 %v4494_v45  ;;  %v1074_v62 = vpop.f32.mrb[0].mxu1 }
 0x1b3   :  { %v5434_v2 = vadd.f32 %v1074_v62, %v6050_v54  ;;  %v1076_v39 = vpop.f32.mrb[1].mxu1  ;;  %v284_v62 = vld [vmem:[#allocation5 + $0x578] sm:$0xff] }
 0x1b4   :  { %v5436_v7 = vadd.f32 %v1076_v39, %v6054_v55  ;;  %v2222_v39 = vld [vmem:[#allocation8 + $0x758] sm:$0xff]  ;;  %v4514_v10 = vpack.c.bf16 %v284_v62, %v276_v59  ;;  %v2264_v62 = vld [vmem:[#allocation8 + $0x8a8] sm:$0xff] }
 0x1b5   :  { %4497 = vmatpush1.bf16.msra.mxu1 %v4496_v57  ;;  %v6059_v13 = vadd.f32 %v5434_v2, %v6021_v47  ;;  %v2209_v57 = vld [vmem:[#allocation8 + $0x6f0] sm:$0xff] }
 0x1b6   :  { %4499 = vmatprep.subr.bf16.mxu1 %v4498_v44  ;;  %v6062_v19 = vadd.f32 %v5436_v7, %v6023_v16  ;;  %v1080_v21 = vpop.f32.mrb[2].mxu1 }
 0x1b7   :  { %v5438_v26 = vadd.f32 %v1080_v21, %v6050_v54  ;;  %v1082_v27 = vpop.f32.mrb[3].mxu1  ;;  %v2228_v21 = vld [vmem:[#allocation8 + $0x788] sm:$0xff] }
 0x1b8   :  { %v5440_v47 = vadd.f32 %v1082_v27, %v6054_v55  ;;  %2851 = vmatprep.mubr.f32.mxu0 %v6062_v19  ;;  %v4746_v23 = vpack.c.bf16 %v2234_v22, %v2228_v21  ;;  %v291_v27 = vld [vmem:[#allocation5 + $0x5b0] sm:$0xff] }
 0x1b9   :  { %4501 = vmatpush1.bf16.msra.mxu1 %v4500_v9  ;;  %v6068_v16 = vadd.f32 %v5438_v26, %v6025_v25  ;;  %2852 = vmatmul.mubr.f32.vlgmr.msra.gmra.mrb[16].mxu0 %v6059_v13  ;;  %v2204_v25 = vld [vmem:[#allocation8 + $0x6c8] sm:$0xff] }
 0x1ba   :  { %4503 = vmatprep.subr.bf16.mxu1 %v4502_v14  ;;  %v6072_v35 = vadd.f32 %v5440_v47, %v6027_v56  ;;  %v1086_v60 = vpop.f32.mrb[4].mxu1  ;;  %4733 = vmatpush1.bf16.msra.mxu0 %v4732_v61  ;;  %v4738_v45 = vpack.c.bf16 %v2210_v5, %v2204_v25  ;;  %v2203_v56 = vld [vmem:[#allocation8 + $0x6c0] sm:$0xff]  ;;  %v2221_v14 = vld [vmem:[#allocation8 + $0x750] sm:$0xff]  ;;  %v2252_v25 = vld [vmem:[#allocation8 + $0x848] sm:$0xff] }
 0x1bb   :  { %v5442_v40 = vadd.f32 %v1086_v60, %v6050_v54  ;;  %v1088_v15 = vpop.f32.mrb[5].mxu1  ;;  %4735 = vmatprep.subr.bf16.mxu0 %v4734_v32  ;;  %v4740_v31 = vpack.c.bf16 %v2209_v57, %v2203_v56  ;;  %v2227_v61 = vld [vmem:[#allocation8 + $0x780] sm:$0xff]  ;;  %v316_v47 = vld [vmem:[#allocation5 + $0x678] sm:$0xff]  ;;  %v2240_v32 = vld [vmem:[#allocation8 + $0x7e8] sm:$0xff] }
 0x1bc   :  { %v5444_v48 = vadd.f32 %v1088_v15, %v6054_v55  ;;  %2857 = vmatprep.mubr.f32.mxu0 %v6072_v35  ;;  %v4750_v46 = vpack.c.bf16 %v2246_v43, %v2240_v32  ;;  %v4522_v34 = vpack.c.bf16 %v316_v47, %v308_v0  ;;  %v307_v60 = vld [vmem:[#allocation5 + $0x630] sm:$0xff]  ;;  %v4752_v15 = vpack.c.bf16 %v2245_v11, %v2239_v33  ;;  %v2258_v5 = vld [vmem:[#allocation8 + $0x878] sm:$0xff]  ;;  %v340_v57 = vld [vmem:[#allocation5 + $0x738] sm:$0xff] }
 0x1bd   :  { %4505 = vmatpush1.bf16.msra.mxu1 %v4504_v30  ;;  %v6078_v51 = vadd.f32 %v5442_v40, %v6029_v3  ;;  %2858 = vmatmul.mubr.f32.gmra.mrb[18].mxu0 %v6068_v16  ;;  %v2216_v3 = vld [vmem:[#allocation8 + $0x728] sm:$0xff]  ;;  %v4748_v30 = vpack.c.bf16 %v2233_v29, %v2227_v61  ;;  %v332_v40 = vld [vmem:[#allocation5 + $0x6f8] sm:$0xff]  ;;  %v2294_v29 = vld [vmem:[#allocation8 + $0x998] sm:$0xff] }
 0x1be   :  { %4507 = vmatprep.subr.bf16.mxu1 %v4506_v41  ;;  %v6082_v44 = vadd.f32 %v5444_v48, %v6031_v8  ;;  %4737 = vmatpush1.bf16.msra.mxu0 %v4736_v63  ;;  %v4742_v7 = vpack.c.bf16 %v2222_v39, %v2216_v3  ;;  %v2215_v8 = vld [vmem:[#allocation8 + $0x720] sm:$0xff]  ;;  %v324_v63 = vld [vmem:[#allocation5 + $0x6b8] sm:$0xff]  ;;  %v4524_v48 = vpack.c.bf16 %v315_v37, %v307_v60  ;;  %v355_v22 = vld [vmem:[#allocation5 + $0x7b0] sm:$0xff] }
 0x1bf   :  { %v1092_v58 = vpop.f32.mrb[6].mxu1  ;;  %4739 = vmatprep.subr.bf16.mxu0 %v4738_v45  ;;  %v4744_v18 = vpack.c.bf16 %v2221_v14, %v2215_v8  ;;  %v2251_v45 = vld [vmem:[#allocation8 + $0x840] sm:$0xff]  ;;  %v4526_v56 = vpack.c.bf16 %v332_v40, %v324_v63  ;;  %v356_v8 = vld [vmem:[#allocation5 + $0x7b8] sm:$0xff]  ;;  %v2282_v14 = vld [vmem:[#allocation8 + $0x938] sm:$0xff] }
 0x1c0   :  { %v5446_v1 = vadd.f32 %v1092_v58, %v6050_v54  ;;  %v1094_v2 = vpop.f32.mrb[7].mxu1  ;;  %2863 = vmatprep.mubr.f32.mxu0 %v6082_v44  ;;  %v275_v54 = vld [vmem:[#allocation5 + $0x530] sm:$0xff]  ;;  %v348_v58 = vld [vmem:[#allocation5 + $0x778] sm:$0xff]  ;;  %v4756_v59 = vpack.c.bf16 %v2257_v53, %v2251_v45  ;;  %v2263_v3 = vld [vmem:[#allocation8 + $0x8a0] sm:$0xff] }
 0x1c1   :  { %v5448_v4 = vadd.f32 %v1094_v2, %v6054_v55  ;;  %4509 = vmatpush1.bf16.msra.mxu1 %v4508_v50  ;;  %2864 = vmatmul.mubr.f32.gmra.mrb[20].mxu0 %v6078_v51  ;;  %v292_v55 = vld [vmem:[#allocation5 + $0x5b8] sm:$0xff]  ;;  %v4754_v50 = vpack.c.bf16 %v2258_v5, %v2252_v25  ;;  %v4530_v39 = vpack.c.bf16 %v348_v58, %v340_v57  ;;  %v371_v43 = vld [vmem:[#allocation5 + $0x830] sm:$0xff]  ;;  %v2306_v11 = vld [vmem:[#allocation8 + $0x9f8] sm:$0xff] }
 0x1c2   :  { %v6088_v9 = vadd.f32 %v5446_v1, %v6033_v20  ;;  %4511 = vmatprep.subr.bf16.mxu1 %v4510_v28  ;;  %4741 = vmatpush1.bf16.msra.mxu0 %v4740_v31  ;;  %v4516_v20 = vpack.c.bf16 %v283_v12, %v275_v54  ;;  %v4518_v26 = vpack.c.bf16 %v300_v17, %v292_v55  ;;  %v323_v28 = vld [vmem:[#allocation5 + $0x6b0] sm:$0xff]  ;;  %v2270_v31 = vld [vmem:[#allocation8 + $0x8d8] sm:$0xff]  ;;  %v372_v61 = vld [vmem:[#allocation5 + $0x838] sm:$0xff] }
 0x1c3   :  { %v6092_v49 = vadd.f32 %v5448_v4, %v6035_v24  ;;  %4743 = vmatprep.subr.bf16.mxu0 %v4742_v7  ;;  %v299_v24 = vld [vmem:[#allocation5 + $0x5f0] sm:$0xff]  ;;  %v4528_v1 = vpack.c.bf16 %v331_v52, %v323_v28  ;;  %v4758_v2 = vpack.c.bf16 %v2270_v31, %v2264_v62  ;;  %v2269_v7 = vld [vmem:[#allocation8 + $0x8d0] sm:$0xff]  ;;  %v5660_v52 = vld [vmem:[#allocation2] sm:$0xff] }
 0x1c4   :  { %v4520_v41 = vpack.c.bf16 %v299_v24, %v291_v27  ;;  %v339_v4 = vld [vmem:[#allocation5 + $0x730] sm:$0xff]  ;;  %v4760_v54 = vpack.c.bf16 %v2269_v7, %v2263_v3  ;;  %v388_v33 = vld [vmem:[#allocation5 + $0x8b8] sm:$0xff]  ;;  %v2318_v57 = vld [vmem:[#allocation8 + $0xa58] sm:$0xff] }
 0x1c5   :  { %4513 = vmatpush1.bf16.msra.mxu1 %v4512_v6  ;;  %2869 = vmatprep.mubr.f32.mxu0 %v6092_v49  ;;  %v347_v6 = vld [vmem:[#allocation5 + $0x770] sm:$0xff]  ;;  %v2305_v25 = vld [vmem:[#allocation8 + $0x9f0] sm:$0xff]  ;;  %v2311_v31 = vld [vmem:[#allocation8 + $0xa20] sm:$0xff] }
 0x1c6   :  { %2870 = vmatmul.mubr.f32.gmra.mrb[22].mxu0 %v6088_v9  ;;  %4515 = vmatprep.subr.bf16.mxu1 %v4514_v10  ;;  %v364_v10 = vld [vmem:[#allocation5 + $0x7f8] sm:$0xff]  ;;  %v2276_v12 = vld [vmem:[#allocation8 + $0x908] sm:$0xff]  ;;  %v4532_v55 = vpack.c.bf16 %v347_v6, %v339_v4 }
 0x1c7   :  { %4745 = vmatpush1.bf16.msra.mxu0 %v4744_v18  ;;  %v4762_v17 = vpack.c.bf16 %v2282_v14, %v2276_v12  ;;  %v2275_v18 = vld [vmem:[#allocation8 + $0x900] sm:$0xff]  ;;  %v4534_v21 = vpack.c.bf16 %v364_v10, %v356_v8  ;;  %v2288_v24 = vld [vmem:[#allocation8 + $0x968] sm:$0xff]  ;;  %v404_v45 = vld [vmem:[#allocation5 + $0x938] sm:$0xff] }
 0x1c8   :  { %4747 = vmatprep.subr.bf16.mxu0 %v4746_v23  ;;  %v2281_v23 = vld [vmem:[#allocation8 + $0x930] sm:$0xff]  ;;  %v4766_v47 = vpack.c.bf16 %v2294_v29, %v2288_v24  ;;  %v2300_v37 = vld [vmem:[#allocation8 + $0x9c8] sm:$0xff]  ;;  %v5663_v14 = vld [vmem:[#allocation2 + $0x68] sm:$0xff] }
 0x1c9   :  { %4517 = vmatpush1.bf16.msra.mxu1 %v4516_v20  ;;  %v363_v20 = vld [vmem:[#allocation5 + $0x7f0] sm:$0xff]  ;;  %v4764_v27 = vpack.c.bf16 %v2281_v23, %v2275_v18  ;;  %v4770_v40 = vpack.c.bf16 %v2306_v11, %v2300_v37  ;;  %v420_v4 = vld [vmem:[#allocation5 + $0x9b8] sm:$0xff]  ;;  %v2342_v29 = vld [vmem:[#allocation8 + $0xb18] sm:$0xff] }
 0x1ca   :  { %4519 = vmatprep.subr.bf16.mxu1 %v4518_v26  ;;  %v380_v26 = vld [vmem:[#allocation5 + $0x878] sm:$0xff]  ;;  %v4536_v0 = vpack.c.bf16 %v363_v20, %v355_v22  ;;  %v2312_v53 = vld [vmem:[#allocation8 + $0xa28] sm:$0xff] }
 0x1cb   :  { %4749 = vmatpush1.bf16.msra.mxu0 %v4748_v30  ;;  %v2287_v30 = vld [vmem:[#allocation8 + $0x960] sm:$0xff]  ;;  %v4538_v32 = vpack.c.bf16 %v380_v26, %v372_v61  ;;  %v4774_v62 = vpack.c.bf16 %v2318_v57, %v2312_v53  ;;  %v403_v3 = vld [vmem:[#allocation5 + $0x930] sm:$0xff]  ;;  %v428_v6 = vld [vmem:[#allocation5 + $0x9f8] sm:$0xff] }
 0x1cc   :  { %4751 = vmatprep.subr.bf16.mxu0 %v4750_v46  ;;  %v2293_v46 = vld [vmem:[#allocation8 + $0x990] sm:$0xff]  ;;  %v5662_v8 = vld [vmem:[#allocation2 + $0x30] sm:$0xff] }
 0x1cd   :  { %4521 = vmatpush1.bf16.msra.mxu1 %v4520_v41  ;;  %v379_v41 = vld [vmem:[#allocation5 + $0x870] sm:$0xff]  ;;  %v4768_v60 = vpack.c.bf16 %v2293_v46, %v2287_v30  ;;  %v2329_v18 = vld [vmem:[#allocation8 + $0xab0] sm:$0xff] }
 0x1ce   :  { %4523 = vmatprep.subr.bf16.mxu1 %v4522_v34  ;;  %v396_v34 = vld [vmem:[#allocation5 + $0x8f8] sm:$0xff]  ;;  %v4540_v63 = vpack.c.bf16 %v379_v41, %v371_v43  ;;  %v2324_v10 = vld [vmem:[#allocation8 + $0xa88] sm:$0xff] }
 0x1cf   :  { %4753 = vmatpush1.bf16.msra.mxu0 %v4752_v15  ;;  %v2299_v15 = vld [vmem:[#allocation8 + $0x9c0] sm:$0xff]  ;;  %v4542_v5 = vpack.c.bf16 %v396_v34, %v388_v33  ;;  %v419_v22 = vld [vmem:[#allocation5 + $0x9b0] sm:$0xff]  ;;  %v436_v23 = vld [vmem:[#allocation5 + $0xa38] sm:$0xff] }
 0x1d0   :  { %4755 = vmatprep.subr.bf16.mxu0 %v4754_v50  ;;  %v395_v50 = vld [vmem:[#allocation5 + $0x8f0] sm:$0xff]  ;;  %v4772_v28 = vpack.c.bf16 %v2305_v25, %v2299_v15  ;;  %v444_v61 = vld [vmem:[#allocation5 + $0xa78] sm:$0xff] }
 0x1d1   :  { %4525 = vmatpush1.bf16.msra.mxu1 %v4524_v48  ;;  %v387_v48 = vld [vmem:[#allocation5 + $0x8b0] sm:$0xff]  ;;  %v2341_v43 = vld [vmem:[#allocation8 + $0xb10] sm:$0xff]  ;;  %v4554_v41 = vpack.c.bf16 %v444_v61, %v436_v23 }
 0x1d2   :  { %4527 = vmatprep.subr.bf16.mxu1 %v4526_v56  ;;  %v412_v56 = vld [vmem:[#allocation5 + $0x978] sm:$0xff]  ;;  %v4544_v58 = vpack.c.bf16 %v395_v50, %v387_v48  ;;  %v427_v20 = vld [vmem:[#allocation5 + $0x9f0] sm:$0xff]  ;;  %v2347_v48 = vld [vmem:[#allocation8 + $0xb40] sm:$0xff] }
 0x1d3   :  { %4757 = vmatpush1.bf16.msra.mxu0 %v4756_v59  ;;  %v5661_v59 = vld [vmem:[#allocation2 + $0x38] sm:$0xff]  ;;  %v2336_v24 = vld [vmem:[#allocation8 + $0xae8] sm:$0xff] }
 0x1d4   :  { %4759 = vmatprep.subr.bf16.mxu0 %v4758_v2  ;;  %v4546_v2 = vpack.c.bf16 %v412_v56, %v404_v45  ;;  %v4782_v30 = vpack.c.bf16 %v2342_v29, %v2336_v24  ;;  %v435_v46 = vld [vmem:[#allocation5 + $0xa30] sm:$0xff]  ;;  %v452_v34 = vld [vmem:[#allocation5 + $0xab8] sm:$0xff] }
 0x1d5   :  { %4529 = vmatpush1.bf16.msra.mxu1 %v4528_v1  ;;  %v2317_v1 = vld [vmem:[#allocation8 + $0xa50] sm:$0xff]  ;;  %v443_v33 = vld [vmem:[#allocation5 + $0xa70] sm:$0xff] }
 0x1d6   :  { %4531 = vmatprep.subr.bf16.mxu1 %v4530_v39  ;;  %v411_v39 = vld [vmem:[#allocation5 + $0x970] sm:$0xff]  ;;  %v4776_v7 = vpack.c.bf16 %v2317_v1, %v2311_v31  ;;  %v4556_v15 = vpack.c.bf16 %v443_v33, %v435_v46  ;;  %v5667_v25 = vld [vmem:[#allocation2 + $0x18] sm:$0xff]  ;;  %v2359_v1 = vld [vmem:[#allocation8 + $0xba0] sm:$0xff] }
 0x1d7   :  { %4761 = vmatpush1.bf16.msra.mxu0 %v4760_v54  ;;  %v2330_v54 = vld [vmem:[#allocation8 + $0xab8] sm:$0xff]  ;;  %v4548_v12 = vpack.c.bf16 %v411_v39, %v403_v3  ;;  %v5666_v11 = vld [vmem:[#allocation2 + $0x90] sm:$0xff]  ;;  %v2353_v50 = vld [vmem:[#allocation8 + $0xb70] sm:$0xff] }
 0x1d8   :  { %4763 = vmatprep.subr.bf16.mxu0 %v4762_v17  ;;  %v2323_v17 = vld [vmem:[#allocation8 + $0xa80] sm:$0xff]  ;;  %v451_v56 = vld [vmem:[#allocation5 + $0xab0] sm:$0xff]  ;;  %v476_v53 = vld [vmem:[#allocation5 + $0xb78] sm:$0xff]  ;;  %v4788_v57 = vpack.c.bf16 %v2353_v50, %v2347_v48 }
 0x1d9   :  { %4533 = vmatpush1.bf16.msra.mxu1 %v4532_v55  ;;  %v4778_v55 = vpack.c.bf16 %v2330_v54, %v2324_v10  ;;  %v4780_v26 = vpack.c.bf16 %v2329_v18, %v2323_v17  ;;  %v467_v39 = vld [vmem:[#allocation5 + $0xb30] sm:$0xff]  ;;  %v2378_v54 = vld [vmem:[#allocation8 + $0xc38] sm:$0xff]  ;;  %v524_v24 = vld [vmem:[#allocation5 + $0xcf8] sm:$0xff] }
 0x1da   :  { %4535 = vmatprep.subr.bf16.mxu1 %v4534_v21  ;;  %v4550_v21 = vpack.c.bf16 %v428_v6, %v420_v4  ;;  %v475_v4 = vld [vmem:[#allocation5 + $0xb70] sm:$0xff]  ;;  %v484_v6 = vld [vmem:[#allocation5 + $0xbb8] sm:$0xff] }
 0x1db   :  { %4765 = vmatpush1.bf16.msra.mxu0 %v4764_v27  ;;  %v5664_v27 = vld [vmem:[#allocation2 + $0x60] sm:$0xff]  ;;  %v2372_v10 = vld [vmem:[#allocation8 + $0xc08] sm:$0xff] }
 0x1dc   :  { %4767 = vmatprep.subr.bf16.mxu0 %v4766_v47  ;;  %v5665_v47 = vld [vmem:[#allocation2 + $0x98] sm:$0xff]  ;;  %v483_v17 = vld [vmem:[#allocation5 + $0xbb0] sm:$0xff] }
 0x1dd   :  { %4537 = vmatpush1.bf16.msra.mxu1 %v4536_v0  ;;  %v4552_v0 = vpack.c.bf16 %v427_v20, %v419_v22  ;;  %v491_v18 = vld [vmem:[#allocation5 + $0xbf0] sm:$0xff]  ;;  %v508_v22 = vld [vmem:[#allocation5 + $0xc78] sm:$0xff] }
 0x1de   :  { %4539 = vmatprep.subr.bf16.mxu1 %v4538_v32  ;;  %v2335_v32 = vld [vmem:[#allocation8 + $0xae0] sm:$0xff]  ;;  %v4568_v20 = vpack.c.bf16 %v491_v18, %v483_v17  ;;  %v499_v61 = vld [vmem:[#allocation5 + $0xc30] sm:$0xff] }
 0x1df   :  { %4769 = vmatpush1.bf16.msra.mxu0 %v4768_v60  ;;  %v460_v60 = vld [vmem:[#allocation5 + $0xaf8] sm:$0xff]  ;;  %v4784_v37 = vpack.c.bf16 %v2341_v43, %v2335_v32  ;;  %v531_v33 = vld [vmem:[#allocation5 + $0xd30] sm:$0xff] }
 0x1e0   :  { %1785 = vmatmul.mubr.f32.vlgmr.msra.gmra.mrb[16].mxu1 %v5660_v52  ;;  %4771 = vmatprep.subr.bf16.mxu0 %v4770_v40  ;;  %v2354_v40 = vld [vmem:[#allocation8 + $0xb78] sm:$0xff]  ;;  %v4558_v45 = vpack.c.bf16 %v460_v60, %v452_v34  ;;  %v468_v52 = vld [vmem:[#allocation5 + $0xb38] sm:$0xff]  ;;  %v539_v34 = vld [vmem:[#allocation5 + $0xd70] sm:$0xff] }
 0x1e1   :  { %4541 = vmatpush1.bf16.msra.mxu1 %v4540_v63  ;;  %1790 = vmatprep.mubr.f32.mxu1 %v5661_v59  ;;  %v2348_v63 = vld [vmem:[#allocation8 + $0xb48] sm:$0xff]  ;;  %v2366_v59 = vld [vmem:[#allocation8 + $0xbd8] sm:$0xff]  ;;  %v4562_v3 = vpack.c.bf16 %v476_v53, %v468_v52  ;;  %v532_v32 = vld [vmem:[#allocation5 + $0xd38] sm:$0xff] }
 0x1e2   :  { %4543 = vmatprep.subr.bf16.mxu1 %v4542_v5  ;;  %v4786_v5 = vpack.c.bf16 %v2354_v40, %v2348_v63  ;;  %v540_v43 = vld [vmem:[#allocation5 + $0xd78] sm:$0xff]  ;;  %v547_v40 = vld [vmem:[#allocation5 + $0xdb0] sm:$0xff] }
 0x1e3   :  { %4773 = vmatpush1.bf16.msra.mxu0 %v4772_v28  ;;  %v459_v28 = vld [vmem:[#allocation5 + $0xaf0] sm:$0xff]  ;;  %v4578_v46 = vpack.c.bf16 %v540_v43, %v532_v32  ;;  %v548_v60 = vld [vmem:[#allocation5 + $0xdb8] sm:$0xff] }
 0x1e4   :  { %1791 = vmatmul.mubr.f32.gmra.mrb[18].mxu1 %v5662_v8  ;;  %4775 = vmatprep.subr.bf16.mxu0 %v4774_v62  ;;  %v4560_v62 = vpack.c.bf16 %v459_v28, %v451_v56  ;;  %v571_v56 = vld [vmem:[#allocation5 + $0xe70] sm:$0xff]  ;;  %v580_v28 = vld [vmem:[#allocation5 + $0xeb8] sm:$0xff] }
 0x1e5   :  { %4545 = vmatpush1.bf16.msra.mxu1 %v4544_v58  ;;  %1796 = vmatprep.mubr.f32.mxu1 %v5663_v14  ;;  %v2360_v58 = vld [vmem:[#allocation8 + $0xba8] sm:$0xff]  ;;  %v4794_v14 = vpack.c.bf16 %v2378_v54, %v2372_v10  ;;  %v588_v52 = vld [vmem:[#allocation5 + $0xef8] sm:$0xff] }
 0x1e6   :  { %4547 = vmatprep.subr.bf16.mxu1 %v4546_v2  ;;  %v4790_v31 = vpack.c.bf16 %v2366_v59, %v2360_v58  ;;  %v2365_v2 = vld [vmem:[#allocation8 + $0xbd0] sm:$0xff]  ;;  %v579_v58 = vld [vmem:[#allocation5 + $0xeb0] sm:$0xff] }
 0x1e7   :  { %4777 = vmatpush1.bf16.msra.mxu0 %v4776_v7  ;;  %v492_v7 = vld [vmem:[#allocation5 + $0xbf8] sm:$0xff]  ;;  %v4792_v8 = vpack.c.bf16 %v2365_v2, %v2359_v1  ;;  %v587_v59 = vld [vmem:[#allocation5 + $0xef0] sm:$0xff] }
 0x1e8   :  { %1797 = vmatmul.mubr.f32.gmra.mrb[20].mxu1 %v5664_v27  ;;  %4779 = vmatprep.subr.bf16.mxu0 %v4778_v55  ;;  %v4566_v55 = vpack.c.bf16 %v492_v7, %v484_v6  ;;  %v516_v27 = vld [vmem:[#allocation5 + $0xcb8] sm:$0xff]  ;;  %v4592_v1 = vpack.c.bf16 %v587_v59, %v579_v58  ;;  %v611_v10 = vld [vmem:[#allocation5 + $0xfb0] sm:$0xff]  ;;  %v5675_v59 = vld [vmem:[#allocation2 + $0x28] sm:$0xff] }
 0x1e9   :  { %4549 = vmatpush1.bf16.msra.mxu1 %v4548_v12  ;;  %1802 = vmatprep.mubr.f32.mxu1 %v5665_v47  ;;  %v4564_v12 = vpack.c.bf16 %v475_v4, %v467_v39  ;;  %v515_v47 = vld [vmem:[#allocation5 + $0xcb0] sm:$0xff]  ;;  %v612_v4 = vld [vmem:[#allocation5 + $0xfb8] sm:$0xff] }
 0x1ea   :  { %4551 = vmatprep.subr.bf16.mxu1 %v4550_v21  ;;  %v500_v21 = vld [vmem:[#allocation5 + $0xc38] sm:$0xff]  ;;  %v603_v39 = vld [vmem:[#allocation5 + $0xf70] sm:$0xff] }
 0x1eb   :  { %4781 = vmatpush1.bf16.msra.mxu0 %v4780_v26  ;;  %v4570_v23 = vpack.c.bf16 %v508_v22, %v500_v21  ;;  %v507_v26 = vld [vmem:[#allocation5 + $0xc70] sm:$0xff]  ;;  %v620_v6 = vld [vmem:[#allocation5 + $0xff8] sm:$0xff] }
 0x1ec   :  { %1803 = vmatmul.mubr.f32.gmra.mrb[22].mxu1 %v5666_v11  ;;  %4783 = vmatprep.subr.bf16.mxu0 %v4782_v30  ;;  %v4572_v29 = vpack.c.bf16 %v507_v26, %v499_v61  ;;  %v523_v30 = vld [vmem:[#allocation5 + $0xcf0] sm:$0xff]  ;;  %v4580_v11 = vpack.c.bf16 %v539_v34, %v531_v33  ;;  %v644_v22 = vld [vmem:[#allocation5 + $0x10b8] sm:$0xff]  ;;  %v5670_v34 = vld [vmem:[#allocation2 + $0x40] sm:$0xff] }
 0x1ed   :  { %4553 = vmatpush1.bf16.msra.mxu1 %v4552_v0  ;;  %1873 = vmatprep.mubr.f32.mxu1 %v5667_v25  ;;  %v4574_v0 = vpack.c.bf16 %v524_v24, %v516_v27  ;;  %v564_v25 = vld [vmem:[#allocation5 + $0xe38] sm:$0xff]  ;;  %v619_v54 = vld [vmem:[#allocation5 + $0xff0] sm:$0xff] }
 0x1ee   :  { %4555 = vmatprep.subr.bf16.mxu1 %v4554_v41  ;;  %v4576_v41 = vpack.c.bf16 %v523_v30, %v515_v47  ;;  %v627_v18 = vld [vmem:[#allocation5 + $0x1030] sm:$0xff]  ;;  %v660_v24 = vld [vmem:[#allocation5 + $0x1138] sm:$0xff]  ;;  %v5669_v30 = vld [vmem:[#allocation2 + $0x48] sm:$0xff] }
 0x1ef   :  { %4785 = vmatpush1.bf16.msra.mxu0 %v4784_v37  ;;  %v556_v37 = vld [vmem:[#allocation5 + $0xdf8] sm:$0xff]  ;;  %v635_v21 = vld [vmem:[#allocation5 + $0x1070] sm:$0xff] }
 0x1f0   :  { %4787 = vmatprep.subr.bf16.mxu0 %v4786_v5  ;;  %v4582_v63 = vpack.c.bf16 %v556_v37, %v548_v60  ;;  %v572_v5 = vld [vmem:[#allocation5 + $0xe78] sm:$0xff]  ;;  %v643_v26 = vld [vmem:[#allocation5 + $0x10b0] sm:$0xff] }
 0x1f1   :  { %4557 = vmatpush1.bf16.msra.mxu1 %v4556_v15  ;;  %v555_v15 = vld [vmem:[#allocation5 + $0xdf0] sm:$0xff]  ;;  %v4586_v50 = vpack.c.bf16 %v572_v5, %v564_v25  ;;  %v684_v33 = vld [vmem:[#allocation5 + $0x11f8] sm:$0xff] }
 0x1f2   :  { %4559 = vmatprep.subr.bf16.mxu1 %v4558_v45  ;;  %v4584_v48 = vpack.c.bf16 %v555_v15, %v547_v40  ;;  %v563_v45 = vld [vmem:[#allocation5 + $0xe30] sm:$0xff]  ;;  %v5671_v37 = vld [vmem:[#allocation2 + $0x78] sm:$0xff] }
 0x1f3   :  { %4789 = vmatpush1.bf16.msra.mxu0 %v4788_v57  ;;  %v4588_v53 = vpack.c.bf16 %v571_v56, %v563_v45  ;;  %v4590_v57 = vpack.c.bf16 %v588_v52, %v580_v28  ;;  %v651_v27 = vld [vmem:[#allocation5 + $0x10f0] sm:$0xff]  ;;  %v692_v15 = vld [vmem:[#allocation5 + $0x1238] sm:$0xff] }
 0x1f4   :  { %4791 = vmatprep.subr.bf16.mxu0 %v4790_v31  ;;  %v604_v31 = vld [vmem:[#allocation5 + $0xf78] sm:$0xff]  ;;  %v4608_v47 = vpack.c.bf16 %v651_v27, %v643_v26  ;;  %v659_v43 = vld [vmem:[#allocation5 + $0x1130] sm:$0xff] }
 0x1f5   :  { %4561 = vmatpush1.bf16.msra.mxu1 %v4560_v62  ;;  %v596_v62 = vld [vmem:[#allocation5 + $0xf38] sm:$0xff]  ;;  %v683_v40 = vld [vmem:[#allocation5 + $0x11f0] sm:$0xff] }
 0x1f6   :  { %4563 = vmatprep.subr.bf16.mxu1 %v4562_v3  ;;  %v4594_v2 = vpack.c.bf16 %v604_v31, %v596_v62  ;;  %v595_v3 = vld [vmem:[#allocation5 + $0xf30] sm:$0xff]  ;;  %v700_v25 = vld [vmem:[#allocation5 + $0x1278] sm:$0xff] }
 0x1f7   :  { %4793 = vmatpush1.bf16.msra.mxu0 %v4792_v8  ;;  %v4596_v7 = vpack.c.bf16 %v603_v39, %v595_v3  ;;  %v4598_v8 = vpack.c.bf16 %v620_v6, %v612_v4  ;;  %v5672_v5 = vld [vmem:[#allocation2 + $0x70] sm:$0xff]  ;;  %v4618_v45 = vpack.c.bf16 %v700_v25, %v692_v15  ;;  %v708_v52 = vld [vmem:[#allocation5 + $0x12b8] sm:$0xff] }
 0x1f8   :  { %4795 = vmatprep.subr.bf16.mxu0 %v4794_v14  ;;  %v636_v14 = vld [vmem:[#allocation5 + $0x1078] sm:$0xff]  ;;  %v691_v56 = vld [vmem:[#allocation5 + $0x1230] sm:$0xff] }
 0x1f9   :  { %4565 = vmatpush1.bf16.msra.mxu1 %v4564_v12  ;;  %v628_v12 = vld [vmem:[#allocation5 + $0x1038] sm:$0xff]  ;;  %v699_v28 = vld [vmem:[#allocation5 + $0x1270] sm:$0xff] }
 0x1fa   :  { %4567 = vmatprep.subr.bf16.mxu1 %v4566_v55  ;;  %v4600_v55 = vpack.c.bf16 %v619_v54, %v611_v10  ;;  %v4602_v17 = vpack.c.bf16 %v636_v14, %v628_v12  ;;  %v4620_v58 = vpack.c.bf16 %v699_v28, %v691_v56  ;;  %v707_v31 = vld [vmem:[#allocation5 + $0x12b0] sm:$0xff]  ;;  %v732_v3 = vld [vmem:[#allocation5 + $0x1378] sm:$0xff] }
 0x1fb   :  { %v723_v6 = vld [vmem:[#allocation5 + $0x1330] sm:$0xff]  ;;  %v748_v10 = vld [vmem:[#allocation5 + $0x13f8] sm:$0xff] }
 0x1fc   :  { %v739_v14 = vld [vmem:[#allocation5 + $0x13b0] sm:$0xff]  ;;  %v780_v26 = vld [vmem:[#allocation5 + $0x14f8] sm:$0xff] }
 0x1fd   :  { %4569 = vmatpush1.bf16.msra.mxu1 %v4568_v20  ;;  %v652_v20 = vld [vmem:[#allocation5 + $0x10f8] sm:$0xff] }
 0x1fe   :  { %4571 = vmatprep.subr.bf16.mxu1 %v4570_v23  ;;  %v4604_v23 = vpack.c.bf16 %v635_v21, %v627_v18  ;;  %v4606_v61 = vpack.c.bf16 %v652_v20, %v644_v22  ;;  %v764_v18 = vld [vmem:[#allocation5 + $0x1478] sm:$0xff]  ;;  %v755_v20 = vld [vmem:[#allocation5 + $0x1430] sm:$0xff] }
 0x1ff   :  { %v828_v56 = vld [vmem:[#allocation5 + $0x1678] sm:$0xff] }
 0x201   :  { %4573 = vmatpush1.bf16.msra.mxu1 %v4572_v29  ;;  %v668_v29 = vld [vmem:[#allocation5 + $0x1178] sm:$0xff] }
 0x202   :  { %4575 = vmatprep.subr.bf16.mxu1 %v4574_v0  ;;  %v5668_v0 = vld [vmem:[#allocation2 + $0x10] sm:$0xff]  ;;  %v4610_v32 = vpack.c.bf16 %v668_v29, %v660_v24 }
 0x205   :  { %4577 = vmatpush1.bf16.msra.mxu1 %v4576_v41  ;;  %v667_v41 = vld [vmem:[#allocation5 + $0x1170] sm:$0xff] }
 0x206   :  { %4579 = vmatprep.subr.bf16.mxu1 %v4578_v46  ;;  %v676_v46 = vld [vmem:[#allocation5 + $0x11b8] sm:$0xff]  ;;  %v4612_v60 = vpack.c.bf16 %v667_v41, %v659_v43 }
 0x207   :  { %v796_v43 = vld [vmem:[#allocation5 + $0x1578] sm:$0xff] }
 0x209   :  { %4581 = vmatpush1.bf16.msra.mxu1 %v4580_v11  ;;  %v4614_v11 = vpack.c.bf16 %v684_v33, %v676_v46 }
 0x20a   :  { %4583 = vmatprep.subr.bf16.mxu1 %v4582_v63  ;;  %v675_v63 = vld [vmem:[#allocation5 + $0x11b0] sm:$0xff] }
 0x20d   :  { %4585 = vmatpush1.bf16.msra.mxu1 %v4584_v48  ;;  %v4616_v48 = vpack.c.bf16 %v683_v40, %v675_v63  ;;  %v812_v63 = vld [vmem:[#allocation5 + $0x15f8] sm:$0xff] }
 0x20e   :  { %4587 = vmatprep.subr.bf16.mxu1 %v4586_v50  ;;  %v5673_v50 = vld [vmem:[#allocation2 + $0xa8] sm:$0xff] }
 0x211   :  { %4589 = vmatpush1.bf16.msra.mxu1 %v4588_v53  ;;  %v716_v53 = vld [vmem:[#allocation5 + $0x12f8] sm:$0xff] }
 0x212   :  { %4591 = vmatprep.subr.bf16.mxu1 %v4590_v57  ;;  %v5674_v57 = vld [vmem:[#allocation2 + $0xa0] sm:$0xff]  ;;  %v4622_v62 = vpack.c.bf16 %v716_v53, %v708_v52 }
 0x215   :  { %4593 = vmatpush1.bf16.msra.mxu1 %v4592_v1  ;;  %v715_v1 = vld [vmem:[#allocation5 + $0x12f0] sm:$0xff] }
 0x216   :  { %4595 = vmatprep.subr.bf16.mxu1 %v4594_v2  ;;  %v724_v2 = vld [vmem:[#allocation5 + $0x1338] sm:$0xff]  ;;  %v4624_v39 = vpack.c.bf16 %v715_v1, %v707_v31 }
 0x217   :  { %v4626_v4 = vpack.c.bf16 %v732_v3, %v724_v2  ;;  %v844_v31 = vld [vmem:[#allocation5 + $0x16f8] sm:$0xff]  ;;  %v835_v3 = vld [vmem:[#allocation5 + $0x16b0] sm:$0xff] }
 0x219   :  { %4597 = vmatpush1.bf16.msra.mxu1 %v4596_v7  ;;  %v731_v7 = vld [vmem:[#allocation5 + $0x1370] sm:$0xff] }
 0x21a   :  { %4599 = vmatprep.subr.bf16.mxu1 %v4598_v8  ;;  %v740_v8 = vld [vmem:[#allocation5 + $0x13b8] sm:$0xff]  ;;  %v4628_v54 = vpack.c.bf16 %v731_v7, %v723_v6 }
 0x21b   :  { %v4630_v12 = vpack.c.bf16 %v748_v10, %v740_v8  ;;  %v860_v6 = vld [vmem:[#allocation5 + $0x1778] sm:$0xff]  ;;  %v851_v10 = vld [vmem:[#allocation5 + $0x1730] sm:$0xff] }
 0x21d   :  { %4601 = vmatpush1.bf16.msra.mxu1 %v4600_v55  ;;  %v747_v55 = vld [vmem:[#allocation5 + $0x13f0] sm:$0xff] }
 0x21e   :  { %4603 = vmatprep.subr.bf16.mxu1 %v4602_v17  ;;  %v756_v17 = vld [vmem:[#allocation5 + $0x1438] sm:$0xff]  ;;  %v4632_v21 = vpack.c.bf16 %v747_v55, %v739_v14 }
 0x21f   :  { %v4634_v22 = vpack.c.bf16 %v764_v18, %v756_v17  ;;  %v876_v14 = vld [vmem:[#allocation5 + $0x17f8] sm:$0xff]  ;;  %v867_v18 = vld [vmem:[#allocation5 + $0x17b0] sm:$0xff] }
 0x220   :  { %1874 = vmatmul.mubr.f32.vlgmr.msra.gmra.mrb[16].mxu1 %v5668_v0  ;;  %v771_v0 = vld [vmem:[#allocation5 + $0x14b0] sm:$0xff] }
 0x221   :  { %4605 = vmatpush1.bf16.msra.mxu1 %v4604_v23  ;;  %1879 = vmatprep.mubr.f32.mxu1 %v5669_v30  ;;  %v763_v23 = vld [vmem:[#allocation5 + $0x1470] sm:$0xff] }
 0x222   :  { %4607 = vmatprep.subr.bf16.mxu1 %v4606_v61  ;;  %v772_v61 = vld [vmem:[#allocation5 + $0x14b8] sm:$0xff]  ;;  %v4636_v27 = vpack.c.bf16 %v763_v23, %v755_v20  ;;  %v1996_v20 = vld [vmem:[#allocation8 + $0x48] sm:$0xff] }
 0x223   :  { %v4638_v29 = vpack.c.bf16 %v780_v26, %v772_v61  ;;  %v1989_v26 = vld [vmem:[#allocation8 + $0x10] sm:$0xff] }
 0x224   :  { %1880 = vmatmul.mubr.f32.gmra.mrb[18].mxu1 %v5670_v34  ;;  %v787_v34 = vld [vmem:[#allocation5 + $0x1530] sm:$0xff] }
 0x225   :  { %4609 = vmatpush1.bf16.msra.mxu1 %v4608_v47  ;;  %1885 = vmatprep.mubr.f32.mxu1 %v5671_v37  ;;  %v779_v47 = vld [vmem:[#allocation5 + $0x14f0] sm:$0xff] }
 0x226   :  { %4611 = vmatprep.subr.bf16.mxu1 %v4610_v32  ;;  %v788_v32 = vld [vmem:[#allocation5 + $0x1538] sm:$0xff]  ;;  %v4640_v41 = vpack.c.bf16 %v779_v47, %v771_v0  ;;  %v2008_v0 = vld [vmem:[#allocation8 + $0xa8] sm:$0xff] }
 0x227   :  { %v4642_v33 = vpack.c.bf16 %v796_v43, %v788_v32  ;;  %v2001_v43 = vld [vmem:[#allocation8 + $0x70] sm:$0xff] }
 0x228   :  { %1886 = vmatmul.mubr.f32.gmra.mrb[20].mxu1 %v5672_v5  ;;  %v803_v5 = vld [vmem:[#allocation5 + $0x15b0] sm:$0xff] }
 0x229   :  { %4613 = vmatpush1.bf16.msra.mxu1 %v4612_v60  ;;  %1891 = vmatprep.mubr.f32.mxu1 %v5673_v50  ;;  %v795_v60 = vld [vmem:[#allocation5 + $0x1570] sm:$0xff] }
 0x22a   :  { %4615 = vmatprep.subr.bf16.mxu1 %v4614_v11  ;;  %v804_v11 = vld [vmem:[#allocation5 + $0x15b8] sm:$0xff]  ;;  %v4644_v40 = vpack.c.bf16 %v795_v60, %v787_v34  ;;  %v2020_v34 = vld [vmem:[#allocation8 + $0x108] sm:$0xff]  ;;  %v5676_v60 = vld [vmem:[#allocation2 + $0x20] sm:$0xff] }
 0x22b   :  { %v4646_v25 = vpack.c.bf16 %v812_v63, %v804_v11  ;;  %v5677_v11 = vld [vmem:[#allocation2 + $0x58] sm:$0xff] }
 0x22c   :  { %1892 = vmatmul.mubr.f32.gmra.mrb[22].mxu1 %v5674_v57  ;;  %v819_v57 = vld [vmem:[#allocation5 + $0x1630] sm:$0xff] }
 0x22d   :  { %4617 = vmatpush1.bf16.msra.mxu1 %v4616_v48  ;;  %1962 = vmatprep.mubr.f32.mxu1 %v5675_v59  ;;  %v811_v48 = vld [vmem:[#allocation5 + $0x15f0] sm:$0xff] }
 0x22e   :  { %4619 = vmatprep.subr.bf16.mxu1 %v4618_v45  ;;  %v820_v45 = vld [vmem:[#allocation5 + $0x1638] sm:$0xff]  ;;  %v4648_v28 = vpack.c.bf16 %v811_v48, %v803_v5  ;;  %v2019_v5 = vld [vmem:[#allocation8 + $0x100] sm:$0xff]  ;;  %v2026_v48 = vld [vmem:[#allocation8 + $0x138] sm:$0xff] }
 0x22f   :  { %v4650_v53 = vpack.c.bf16 %v828_v56, %v820_v45  ;;  %v2032_v45 = vld [vmem:[#allocation8 + $0x168] sm:$0xff] }
 0x230   :  { %v5678_v56 = vld [vmem:[#allocation2 + $0x50] sm:$0xff] }
 0x231   :  { %4621 = vmatpush1.bf16.msra.mxu1 %v4620_v58  ;;  %v827_v58 = vld [vmem:[#allocation5 + $0x1670] sm:$0xff] }
 0x232   :  { %4623 = vmatprep.subr.bf16.mxu1 %v4622_v62  ;;  %v836_v62 = vld [vmem:[#allocation5 + $0x16b8] sm:$0xff]  ;;  %v4652_v1 = vpack.c.bf16 %v827_v58, %v819_v57  ;;  %v4934_v57 = vpack.c.bf16 %v2032_v45, %v2026_v48  ;;  %v2383_v48 = vld [vmem:[#allocation8 + $0xc60] sm:$0xff] }
 0x233   :  { %v4654_v2 = vpack.c.bf16 %v844_v31, %v836_v62  ;;  %v2025_v58 = vld [vmem:[#allocation8 + $0x130] sm:$0xff]  ;;  %v2031_v62 = vld [vmem:[#allocation8 + $0x160] sm:$0xff]  ;;  %v2038_v31 = vld [vmem:[#allocation8 + $0x198] sm:$0xff] }
 0x234   :  { %v2389_v45 = vld [vmem:[#allocation8 + $0xc90] sm:$0xff] }
 0x235   :  { %4625 = vmatpush1.bf16.msra.mxu1 %v4624_v39  ;;  %v843_v39 = vld [vmem:[#allocation5 + $0x16f0] sm:$0xff] }
 0x236   :  { %4627 = vmatprep.subr.bf16.mxu1 %v4626_v4  ;;  %v852_v4 = vld [vmem:[#allocation5 + $0x1738] sm:$0xff]  ;;  %v4656_v7 = vpack.c.bf16 %v843_v39, %v835_v3  ;;  %v4936_v39 = vpack.c.bf16 %v2031_v62, %v2025_v58  ;;  %v2079_v58 = vld [vmem:[#allocation8 + $0x2e0] sm:$0xff]  ;;  %v2396_v62 = vld [vmem:[#allocation8 + $0xcc8] sm:$0xff] }
 0x237   :  { %v4658_v8 = vpack.c.bf16 %v860_v6, %v852_v4  ;;  %v5681_v3 = vld [vmem:[#allocation2 + $0xb8] sm:$0xff] }
 0x238   :  { %v2037_v6 = vld [vmem:[#allocation8 + $0x190] sm:$0xff] }
 0x239   :  { %4629 = vmatpush1.bf16.msra.mxu1 %v4628_v54  ;;  %v859_v54 = vld [vmem:[#allocation5 + $0x1770] sm:$0xff] }
 0x23a   :  { %4631 = vmatprep.subr.bf16.mxu1 %v4630_v12  ;;  %v868_v12 = vld [vmem:[#allocation5 + $0x17b8] sm:$0xff]  ;;  %v4660_v55 = vpack.c.bf16 %v859_v54, %v851_v10  ;;  %v2056_v10 = vld [vmem:[#allocation8 + $0x228] sm:$0xff] }
 0x23b   :  { %v4662_v17 = vpack.c.bf16 %v876_v14, %v868_v12  ;;  %v5682_v54 = vld [vmem:[#allocation2 + $0xb0] sm:$0xff]  ;;  %v893_v14 = vsub.s32 3, %v6042_v36 }
 0x23d   :  { %4633 = vmatpush1.bf16.msra.mxu1 %v4632_v21  ;;  %v6096_v24 = vpop.f32.mrb[8].mxu0  ;;  %v875_v21 = vld [vmem:[#allocation5 + $0x17f0] sm:$0xff] }
 0x23e   :  { %4635 = vmatprep.subr.bf16.mxu1 %v4634_v22  ;;  %v6098_v30 = vpop.f32.mrb[9].mxu0  ;;  %v1990_v22 = vld [vmem:[#allocation8 + $0x18] sm:$0xff]  ;;  %v4664_v23 = vpack.c.bf16 %v875_v21, %v867_v18  ;;  %v2049_v18 = vld [vmem:[#allocation8 + $0x1f0] sm:$0xff]  ;;  %v2055_v21 = vld [vmem:[#allocation8 + $0x220] sm:$0xff] }
 0x23f   :  { %v4922_v61 = vpack.c.bf16 %v1996_v20, %v1990_v22  ;;  %v2062_v22 = vld [vmem:[#allocation8 + $0x258] sm:$0xff]  ;;  %v2068_v20 = vld [vmem:[#allocation8 + $0x288] sm:$0xff] }
 0x241   :  { %4637 = vmatpush1.bf16.msra.mxu1 %v4636_v27  ;;  %v6100_v46 = vpop.f32.mrb[10].mxu0  ;;  %v1995_v27 = vld [vmem:[#allocation8 + $0x40] sm:$0xff] }
 0x242   :  { %4639 = vmatprep.subr.bf16.mxu1 %v4638_v29  ;;  %v6102_v37 = vpop.f32.mrb[11].mxu0  ;;  %v2002_v29 = vld [vmem:[#allocation8 + $0x78] sm:$0xff]  ;;  %v4924_v47 = vpack.c.bf16 %v1995_v27, %v1989_v26  ;;  %v4944_v26 = vpack.c.bf16 %v2055_v21, %v2049_v18  ;;  %v2371_v27 = vld [vmem:[#allocation8 + $0xc00] sm:$0xff]  ;;  %v2085_v18 = vld [vmem:[#allocation8 + $0x310] sm:$0xff] }
 0x243   :  { %v4926_v32 = vpack.c.bf16 %v2008_v0, %v2002_v29  ;;  %v2377_v29 = vld [vmem:[#allocation8 + $0xc30] sm:$0xff]  ;;  %v2091_v21 = vld [vmem:[#allocation8 + $0x340] sm:$0xff] }
 0x245   :  { %4641 = vmatpush1.bf16.msra.mxu1 %v4640_v41  ;;  %v6104_v15 = vpop.f32.mrb[12].mxu0  ;;  %v2007_v41 = vld [vmem:[#allocation8 + $0xa0] sm:$0xff] }
 0x246   :  { %4643 = vmatprep.subr.bf16.mxu1 %v4642_v33  ;;  %v6106_v50 = vpop.f32.mrb[13].mxu0  ;;  %v2014_v33 = vld [vmem:[#allocation8 + $0xd8] sm:$0xff]  ;;  %v4928_v63 = vpack.c.bf16 %v2007_v41, %v2001_v43  ;;  %v2067_v43 = vld [vmem:[#allocation8 + $0x280] sm:$0xff]  ;;  %v2384_v41 = vld [vmem:[#allocation8 + $0xc68] sm:$0xff] }
 0x249   :  { %4645 = vmatpush1.bf16.msra.mxu1 %v4644_v40  ;;  %v6108_v52 = vpop.f32.mrb[14].mxu0  ;;  %v4930_v40 = vpack.c.bf16 %v2020_v34, %v2014_v33  ;;  %v2390_v34 = vld [vmem:[#allocation8 + $0xc98] sm:$0xff] }
 0x24a   :  { %4647 = vmatprep.subr.bf16.mxu1 %v4646_v25  ;;  %v6110_v59 = vpop.f32.mrb[15].mxu0  ;;  %v2013_v25 = vld [vmem:[#allocation8 + $0xd0] sm:$0xff] }
 0x24d   :  { %4649 = vmatpush1.bf16.msra.mxu1 %v4648_v28  ;;  %v5679_v28 = vld [vmem:[#allocation2 + $0x88] sm:$0xff] }
 0x24e   :  { %4651 = vmatprep.subr.bf16.mxu1 %v4650_v53  ;;  %v4932_v53 = vpack.c.bf16 %v2019_v5, %v2013_v25  ;;  %v4796_v25 = vpack.c.bf16 %v2377_v29, %v2371_v27  ;;  %v2414_v27 = vld [vmem:[#allocation8 + $0xd58] sm:$0xff] }
 0x24f   :  { %v2098_v29 = vld [vmem:[#allocation8 + $0x378] sm:$0xff] }
 0x251   :  { %4653 = vmatpush1.bf16.msra.mxu1 %v4652_v1  ;;  %v2044_v1 = vld [vmem:[#allocation8 + $0x1c8] sm:$0xff] }
 0x252   :  { %4655 = vmatprep.subr.bf16.mxu1 %v4654_v2  ;;  %v5680_v2 = vld [vmem:[#allocation2 + $0x80] sm:$0xff]  ;;  %v4938_v4 = vpack.c.bf16 %v2044_v1, %v2038_v31 }
 0x253   :  { %v2402_v1 = vld [vmem:[#allocation8 + $0xcf8] sm:$0xff] }
 0x255   :  { %4657 = vmatpush1.bf16.msra.mxu1 %v4656_v7  ;;  %v2043_v7 = vld [vmem:[#allocation8 + $0x1c0] sm:$0xff] }
 0x256   :  { %4659 = vmatprep.subr.bf16.mxu1 %v4658_v8  ;;  %v2050_v8 = vld [vmem:[#allocation8 + $0x1f8] sm:$0xff]  ;;  %v4940_v12 = vpack.c.bf16 %v2043_v7, %v2037_v6  ;;  %v4800_v6 = vpack.c.bf16 %v2389_v45, %v2383_v48 }
 0x259   :  { %4661 = vmatpush1.bf16.msra.mxu1 %v4660_v55  ;;  %v889_v55 = vsub.s32 2, %v6042_v36 }
 0x25a   :  { %4663 = vmatprep.subr.bf16.mxu1 %v4662_v17  ;;  %v4942_v17 = vpack.c.bf16 %v2056_v10, %v2050_v8  ;;  %v2395_v8 = vld [vmem:[#allocation8 + $0xcc0] sm:$0xff]  ;;  %v2401_v10 = vld [vmem:[#allocation8 + $0xcf0] sm:$0xff] }
 0x25d   :  { %4665 = vmatpush1.bf16.msra.mxu1 %v4664_v23  ;;  %v6115_v23 = vld [vmem:[#allocation7] sm:$0xff] }
 0x25e   :  { %4923 = vmatprep.subr.bf16.mxu1 %v4922_v61  ;;  %v6120_v61 = vrot.slane %v6115_v23, %v893_v14  ;;  %v6125_v0 = vrot.slane %v6115_v23, %v889_v55 }
 0x260   :  { %1963 = vmatmul.mubr.f32.vlgmr.msra.gmra.mrb[16].mxu1 %v5676_v60  ;;  %v2074_v60 = vld [vmem:[#allocation8 + $0x2b8] sm:$0xff] }
 0x261   :  { %4925 = vmatpush1.bf16.msra.mxu1 %v4924_v47  ;;  %1968 = vmatprep.mubr.f32.mxu1 %v5677_v11  ;;  %v4946_v47 = vpack.c.bf16 %v2068_v20, %v2062_v22  ;;  %v2080_v11 = vld [vmem:[#allocation8 + $0x2e8] sm:$0xff]  ;;  %v901_v20 = vsub.s32 5, %v6042_v36 }
 0x262   :  { %4927 = vmatprep.subr.bf16.mxu1 %v4926_v32  ;;  %v2061_v32 = vld [vmem:[#allocation8 + $0x250] sm:$0xff]  ;;  %v2408_v22 = vld [vmem:[#allocation8 + $0xd28] sm:$0xff] }
 0x263   :  { %v4948_v5 = vpack.c.bf16 %v2067_v43, %v2061_v32  ;;  %v6153_v48 = vrot.slane %v6115_v23, %v901_v20 }
 0x264   :  { %1969 = vmatmul.mubr.f32.gmra.mrb[18].mxu1 %v5678_v56 }
 0x265   :  { %4929 = vmatpush1.bf16.msra.mxu1 %v4928_v63  ;;  %1974 = vmatprep.mubr.f32.mxu1 %v5679_v28  ;;  %v4798_v28 = vpack.c.bf16 %v2390_v34, %v2384_v41  ;;  %v4804_v41 = vpack.c.bf16 %v2401_v10, %v2395_v8  ;;  %v2425_v8 = vld [vmem:[#allocation8 + $0xdb0] sm:$0xff] }
 0x266   :  { %4931 = vmatprep.subr.bf16.mxu1 %v4930_v40  ;;  %v2109_v10 = vld [vmem:[#allocation8 + $0x3d0] sm:$0xff] }
 0x268   :  { %1975 = vmatmul.mubr.f32.gmra.mrb[20].mxu1 %v5680_v2  ;;  %v2086_v2 = vld [vmem:[#allocation8 + $0x318] sm:$0xff] }
 0x269   :  { %4933 = vmatpush1.bf16.msra.mxu1 %v4932_v53  ;;  %1980 = vmatprep.mubr.f32.mxu1 %v5681_v3  ;;  %v4950_v53 = vpack.c.bf16 %v2080_v11, %v2074_v60  ;;  %v2092_v3 = vld [vmem:[#allocation8 + $0x348] sm:$0xff]  ;;  %v4806_v60 = vpack.c.bf16 %v2414_v27, %v2408_v22  ;;  %v2407_v11 = vld [vmem:[#allocation8 + $0xd20] sm:$0xff] }
 0x26a   :  { %4935 = vmatprep.subr.bf16.mxu1 %v4934_v57  ;;  %v2073_v57 = vld [vmem:[#allocation8 + $0x2b0] sm:$0xff]  ;;  %v2128_v22 = vld [vmem:[#allocation8 + $0x468] sm:$0xff] }
 0x26b   :  { %v4952_v7 = vpack.c.bf16 %v2079_v58, %v2073_v57  ;;  %v2426_v57 = vld [vmem:[#allocation8 + $0xdb8] sm:$0xff] }
 0x26c   :  { %1981 = vmatmul.mubr.f32.gmra.mrb[22].mxu1 %v5682_v54 }
 0x26d   :  { %4937 = vmatpush1.bf16.msra.mxu1 %v4936_v39  ;;  %3207 = vmatprep.mubr.f32.mxu1 %v6062_v19 }
 0x26e   :  { %4939 = vmatprep.subr.bf16.mxu1 %v4938_v4 }
 0x271   :  { %4941 = vmatpush1.bf16.msra.mxu1 %v4940_v12  ;;  %v4802_v12 = vpack.c.bf16 %v2402_v1, %v2396_v62  ;;  %v2110_v62 = vld [vmem:[#allocation8 + $0x3d8] sm:$0xff] }
 0x272   :  { %4943 = vmatprep.subr.bf16.mxu1 %v4942_v17  ;;  %v4954_v17 = vpack.c.bf16 %v2092_v3, %v2086_v2 }
 0x273   :  { %v1430_v33 = vpop.f32.mrb[8].mxu1 }
 0x274   :  { %v1432_v63 = vpop.f32.mrb[9].mxu1  ;;  %v6131_v56 = vadd.f32 %v1430_v33, %v6125_v0  ;;  %v4956_v33 = vpack.c.bf16 %v2091_v21, %v2085_v18  ;;  %v2432_v18 = vld [vmem:[#allocation8 + $0xde8] sm:$0xff]  ;;  %v2438_v21 = vld [vmem:[#allocation8 + $0xe18] sm:$0xff] }
 0x275   :  { %v6128_v40 = vadd.f32 %v1432_v63, %v6120_v61  ;;  %4945 = vmatpush1.bf16.msra.mxu1 %v4944_v26  ;;  %v2413_v63 = vld [vmem:[#allocation8 + $0xd50] sm:$0xff] }
 0x276   :  { %4947 = vmatprep.subr.bf16.mxu1 %v4946_v47  ;;  %v2104_v47 = vld [vmem:[#allocation8 + $0x3a8] sm:$0xff]  ;;  %v4808_v2 = vpack.c.bf16 %v2413_v63, %v2407_v11  ;;  %v2450_v11 = vld [vmem:[#allocation8 + $0xe78] sm:$0xff] }
 0x277   :  { %v1436_v31 = vpop.f32.mrb[10].mxu1  ;;  %2940 = vmatprep.mubr.f32.mxu0 %v6128_v40  ;;  %v2134_v63 = vld [vmem:[#allocation8 + $0x498] sm:$0xff] }
 0x278   :  { %v1438_v39 = vpop.f32.mrb[11].mxu1  ;;  %2941 = vmatmul.mubr.f32.vlgmr.msra.gmra.mrb[16].mxu0 %v6131_v56  ;;  %v6139_v54 = vadd.f32 %v1436_v31, %v6125_v0  ;;  %v2116_v31 = vld [vmem:[#allocation8 + $0x408] sm:$0xff] }
 0x279   :  { %v6136_v4 = vadd.f32 %v1438_v39, %v6120_v61  ;;  %4797 = vmatpush1.bf16.msra.mxu0 %v4796_v25  ;;  %4949 = vmatpush1.bf16.msra.mxu1 %v4948_v5  ;;  %v4958_v25 = vpack.c.bf16 %v2104_v47, %v2098_v29  ;;  %v2097_v5 = vld [vmem:[#allocation8 + $0x370] sm:$0xff]  ;;  %v4814_v29 = vpack.c.bf16 %v2438_v21, %v2432_v18 }
 0x27a   :  { %4799 = vmatprep.subr.bf16.mxu0 %v4798_v28  ;;  %4951 = vmatprep.subr.bf16.mxu1 %v4950_v53  ;;  %v2103_v28 = vld [vmem:[#allocation8 + $0x3a0] sm:$0xff]  ;;  %v2420_v53 = vld [vmem:[#allocation8 + $0xd88] sm:$0xff]  ;;  %v2437_v47 = vld [vmem:[#allocation8 + $0xe10] sm:$0xff] }
 0x27b   :  { %v1442_v26 = vpop.f32.mrb[12].mxu1  ;;  %2946 = vmatprep.mubr.f32.mxu0 %v6136_v4  ;;  %v4960_v39 = vpack.c.bf16 %v2103_v28, %v2097_v5  ;;  %v2461_v18 = vld [vmem:[#allocation8 + $0xed0] sm:$0xff] }
 0x27c   :  { %v1444_v32 = vpop.f32.mrb[13].mxu1  ;;  %2947 = vmatmul.mubr.f32.gmra.mrb[18].mxu0 %v6139_v54  ;;  %v6148_v34 = vadd.f32 %v1442_v26, %v6125_v0  ;;  %v2145_v21 = vld [vmem:[#allocation8 + $0x4f0] sm:$0xff] }
 0x27d   :  { %v6145_v43 = vadd.f32 %v1444_v32, %v6120_v61  ;;  %4801 = vmatpush1.bf16.msra.mxu0 %v4800_v6  ;;  %4953 = vmatpush1.bf16.msra.mxu1 %v4952_v7  ;;  %v4810_v6 = vpack.c.bf16 %v2426_v57, %v2420_v53  ;;  %v2419_v7 = vld [vmem:[#allocation8 + $0xd80] sm:$0xff]  ;;  %v2121_v32 = vld [vmem:[#allocation8 + $0x430] sm:$0xff] }
 0x27e   :  { %4803 = vmatprep.subr.bf16.mxu0 %v4802_v12  ;;  %4955 = vmatprep.subr.bf16.mxu1 %v4954_v17  ;;  %v6165_v12 = vadd.f32 %v6098_v30, %v6153_v48  ;;  %v2115_v17 = vld [vmem:[#allocation8 + $0x400] sm:$0xff]  ;;  %v4812_v26 = vpack.c.bf16 %v2425_v8, %v2419_v7  ;;  %v2449_v57 = vld [vmem:[#allocation8 + $0xe70] sm:$0xff]  ;;  %v2152_v7 = vld [vmem:[#allocation8 + $0x528] sm:$0xff] }
 0x27f   :  { %v1448_v45 = vpop.f32.mrb[14].mxu1  ;;  %2952 = vmatprep.mubr.f32.mxu0 %v6145_v43  ;;  %v4964_v27 = vpack.c.bf16 %v2115_v17, %v2109_v10  ;;  %v2431_v30 = vld [vmem:[#allocation8 + $0xde0] sm:$0xff] }
 0x280   :  { %v1450_v58 = vpop.f32.mrb[15].mxu1  ;;  %2953 = vmatmul.mubr.f32.gmra.mrb[20].mxu0 %v6148_v34  ;;  %v6161_v3 = vadd.f32 %v1448_v45, %v6125_v0  ;;  %v2122_v0 = vld [vmem:[#allocation8 + $0x438] sm:$0xff]  ;;  %v4816_v5 = vpack.c.bf16 %v2437_v47, %v2431_v30  ;;  %v2443_v53 = vld [vmem:[#allocation8 + $0xe40] sm:$0xff]  ;;  %v2164_v30 = vld [vmem:[#allocation8 + $0x588] sm:$0xff] }
 0x281   :  { %v6158_v1 = vadd.f32 %v1450_v58, %v6120_v61  ;;  %4805 = vmatpush1.bf16.msra.mxu0 %v4804_v41  ;;  %4957 = vmatpush1.bf16.msra.mxu1 %v4956_v33  ;;  %v4962_v61 = vpack.c.bf16 %v2116_v31, %v2110_v62  ;;  %v4966_v41 = vpack.c.bf16 %v2128_v22, %v2122_v0  ;;  %v2127_v33 = vld [vmem:[#allocation8 + $0x460] sm:$0xff]  ;;  %v2133_v58 = vld [vmem:[#allocation8 + $0x490] sm:$0xff] }
 0x282   :  { %4807 = vmatprep.subr.bf16.mxu0 %v4806_v60  ;;  %4959 = vmatprep.subr.bf16.mxu1 %v4958_v25  ;;  %v2444_v60 = vld [vmem:[#allocation8 + $0xe48] sm:$0xff]  ;;  %v4968_v45 = vpack.c.bf16 %v2127_v33, %v2121_v32  ;;  %v2139_v31 = vld [vmem:[#allocation8 + $0x4c0] sm:$0xff]  ;;  %v4820_v8 = vpack.c.bf16 %v2449_v57, %v2443_v53 }
 0x283   :  { %2958 = vmatprep.mubr.f32.mxu0 %v6158_v1  ;;  %v2140_v25 = vld [vmem:[#allocation8 + $0x4c8] sm:$0xff]  ;;  %v4818_v28 = vpack.c.bf16 %v2450_v11, %v2444_v60  ;;  %v4972_v10 = vpack.c.bf16 %v2139_v31, %v2133_v58  ;;  %v2455_v17 = vld [vmem:[#allocation8 + $0xea0] sm:$0xff]  ;;  %v2473_v60 = vld [vmem:[#allocation8 + $0xf30] sm:$0xff] }
 0x284   :  { %2959 = vmatmul.mubr.f32.gmra.mrb[22].mxu0 %v6161_v3  ;;  %v4970_v62 = vpack.c.bf16 %v2140_v25, %v2134_v63  ;;  %v2151_v22 = vld [vmem:[#allocation8 + $0x520] sm:$0xff]  ;;  %v4824_v47 = vpack.c.bf16 %v2461_v18, %v2455_v17  ;;  %v2157_v11 = vld [vmem:[#allocation8 + $0x550] sm:$0xff]  ;;  %v2176_v53 = vld [vmem:[#allocation8 + $0x5e8] sm:$0xff] }
 0x285   :  { %4809 = vmatpush1.bf16.msra.mxu0 %v4808_v2  ;;  %3029 = vmatprep.mubr.f32.mxu0 %v6165_v12  ;;  %v2456_v2 = vld [vmem:[#allocation8 + $0xea8] sm:$0xff]  ;;  %v4976_v32 = vpack.c.bf16 %v2151_v22, %v2145_v21  ;;  %v2467_v33 = vld [vmem:[#allocation8 + $0xf00] sm:$0xff] }
 0x286   :  { %4961 = vmatpush1.bf16.msra.mxu1 %v4960_v39  ;;  %4811 = vmatprep.subr.bf16.mxu0 %v4810_v6  ;;  %v2462_v39 = vld [vmem:[#allocation8 + $0xed8] sm:$0xff]  ;;  %v2163_v25 = vld [vmem:[#allocation8 + $0x580] sm:$0xff]  ;;  %v4828_v57 = vpack.c.bf16 %v2473_v60, %v2467_v33  ;;  %v2188_v17 = vld [vmem:[#allocation8 + $0x648] sm:$0xff] }
 0x287   :  { %4963 = vmatprep.subr.bf16.mxu1 %v4962_v61  ;;  %v2146_v6 = vld [vmem:[#allocation8 + $0x4f8] sm:$0xff]  ;;  %v4822_v61 = vpack.c.bf16 %v2462_v39, %v2456_v2  ;;  %v4980_v58 = vpack.c.bf16 %v2163_v25, %v2157_v11  ;;  %v2479_v31 = vld [vmem:[#allocation8 + $0xf60] sm:$0xff]  ;;  %v2485_v2 = vld [vmem:[#allocation8 + $0xf90] sm:$0xff] }
 0x288   :  { %v4974_v0 = vpack.c.bf16 %v2152_v7, %v2146_v6  ;;  %v2169_v39 = vld [vmem:[#allocation8 + $0x5b0] sm:$0xff]  ;;  %v2175_v7 = vld [vmem:[#allocation8 + $0x5e0] sm:$0xff]  ;;  %v4832_v18 = vpack.c.bf16 %v2485_v2, %v2479_v31  ;;  %v2200_v33 = vld [vmem:[#allocation8 + $0x6a8] sm:$0xff] }
 0x289   :  { %4813 = vmatpush1.bf16.msra.mxu0 %v4812_v26  ;;  %v2468_v26 = vld [vmem:[#allocation8 + $0xf08] sm:$0xff]  ;;  %v4984_v21 = vpack.c.bf16 %v2175_v7, %v2169_v39  ;;  %v2491_v22 = vld [vmem:[#allocation8 + $0xfc0] sm:$0xff]  ;;  %v2509_v25 = vld [vmem:[#allocation8 + $0x1050] sm:$0xff] }
 0x28a   :  { %4965 = vmatpush1.bf16.msra.mxu1 %v4964_v27  ;;  %4815 = vmatprep.subr.bf16.mxu0 %v4814_v29  ;;  %v2474_v27 = vld [vmem:[#allocation8 + $0xf38] sm:$0xff]  ;;  %v2212_v31 = vld [vmem:[#allocation8 + $0x708] sm:$0xff]  ;;  %v2521_v7 = vld [vmem:[#allocation8 + $0x10b0] sm:$0xff] }
 0x28b   :  { %4967 = vmatprep.subr.bf16.mxu1 %v4966_v41  ;;  %v2158_v29 = vld [vmem:[#allocation8 + $0x558] sm:$0xff]  ;;  %v4826_v41 = vpack.c.bf16 %v2474_v27, %v2468_v26  ;;  %v2497_v26 = vld [vmem:[#allocation8 + $0xff0] sm:$0xff] }
 0x28c   :  { %v4978_v63 = vpack.c.bf16 %v2164_v30, %v2158_v29  ;;  %v2181_v29 = vld [vmem:[#allocation8 + $0x610] sm:$0xff]  ;;  %v2187_v30 = vld [vmem:[#allocation8 + $0x640] sm:$0xff]  ;;  %v4836_v60 = vpack.c.bf16 %v2497_v26, %v2491_v22  ;;  %v2224_v22 = vld [vmem:[#allocation8 + $0x768] sm:$0xff] }
 0x28d   :  { %4817 = vmatpush1.bf16.msra.mxu0 %v4816_v5  ;;  %v2480_v5 = vld [vmem:[#allocation8 + $0xf68] sm:$0xff]  ;;  %v4988_v11 = vpack.c.bf16 %v2187_v30, %v2181_v29  ;;  %v2527_v29 = vld [vmem:[#allocation8 + $0x10e0] sm:$0xff]  ;;  %v2533_v30 = vld [vmem:[#allocation8 + $0x1110] sm:$0xff] }
 0x28e   :  { %4969 = vmatpush1.bf16.msra.mxu1 %v4968_v45  ;;  %4819 = vmatprep.subr.bf16.mxu0 %v4818_v28  ;;  %v2486_v45 = vld [vmem:[#allocation8 + $0xf98] sm:$0xff] }
 0x28f   :  { %4971 = vmatprep.subr.bf16.mxu1 %v4970_v62  ;;  %v2170_v28 = vld [vmem:[#allocation8 + $0x5b8] sm:$0xff]  ;;  %v4830_v62 = vpack.c.bf16 %v2486_v45, %v2480_v5 }
 0x290   :  { %v4982_v6 = vpack.c.bf16 %v2176_v53, %v2170_v28  ;;  %v2193_v28 = vld [vmem:[#allocation8 + $0x670] sm:$0xff]  ;;  %v2199_v53 = vld [vmem:[#allocation8 + $0x6a0] sm:$0xff] }
 0x291   :  { %4821 = vmatpush1.bf16.msra.mxu0 %v4820_v8  ;;  %v2492_v8 = vld [vmem:[#allocation8 + $0xfc8] sm:$0xff]  ;;  %v4992_v39 = vpack.c.bf16 %v2199_v53, %v2193_v28  ;;  %v2539_v28 = vld [vmem:[#allocation8 + $0x1140] sm:$0xff]  ;;  %v2545_v53 = vld [vmem:[#allocation8 + $0x1170] sm:$0xff] }
 0x292   :  { %4973 = vmatpush1.bf16.msra.mxu1 %v4972_v10  ;;  %4823 = vmatprep.subr.bf16.mxu0 %v4822_v61  ;;  %v2498_v10 = vld [vmem:[#allocation8 + $0xff8] sm:$0xff] }
 0x293   :  { %4975 = vmatprep.subr.bf16.mxu1 %v4974_v0  ;;  %v2182_v61 = vld [vmem:[#allocation8 + $0x618] sm:$0xff]  ;;  %v4834_v0 = vpack.c.bf16 %v2498_v10, %v2492_v8 }
 0x294   :  { %v4986_v27 = vpack.c.bf16 %v2188_v17, %v2182_v61  ;;  %v2205_v61 = vld [vmem:[#allocation8 + $0x6d0] sm:$0xff]  ;;  %v2211_v17 = vld [vmem:[#allocation8 + $0x700] sm:$0xff] }
 0x295   :  { %4825 = vmatpush1.bf16.msra.mxu0 %v4824_v47  ;;  %v2504_v47 = vld [vmem:[#allocation8 + $0x1028] sm:$0xff] }
 0x296   :  { %4977 = vmatpush1.bf16.msra.mxu1 %v4976_v32  ;;  %4827 = vmatprep.subr.bf16.mxu0 %v4826_v41  ;;  %v2510_v32 = vld [vmem:[#allocation8 + $0x1058] sm:$0xff] }
 0x297   :  { %4979 = vmatprep.subr.bf16.mxu1 %v4978_v63  ;;  %v2194_v41 = vld [vmem:[#allocation8 + $0x678] sm:$0xff]  ;;  %v2503_v63 = vld [vmem:[#allocation8 + $0x1020] sm:$0xff]  ;;  %v4838_v5 = vpack.c.bf16 %v2510_v32, %v2504_v47 }
 0x298   :  { %v4990_v45 = vpack.c.bf16 %v2200_v33, %v2194_v41  ;;  %v4840_v2 = vpack.c.bf16 %v2509_v25, %v2503_v63  ;;  %v2217_v41 = vld [vmem:[#allocation8 + $0x730] sm:$0xff]  ;;  %v2223_v33 = vld [vmem:[#allocation8 + $0x760] sm:$0xff]  ;;  %v2230_v63 = vld [vmem:[#allocation8 + $0x798] sm:$0xff] }
 0x299   :  { %4829 = vmatpush1.bf16.msra.mxu0 %v4828_v57  ;;  %v2516_v57 = vld [vmem:[#allocation8 + $0x1088] sm:$0xff] }
 0x29a   :  { %4981 = vmatpush1.bf16.msra.mxu1 %v4980_v58  ;;  %4831 = vmatprep.subr.bf16.mxu0 %v4830_v62  ;;  %v2522_v58 = vld [vmem:[#allocation8 + $0x10b8] sm:$0xff]  ;;  %v2236_v25 = vld [vmem:[#allocation8 + $0x7c8] sm:$0xff] }
 0x29b   :  { %4983 = vmatprep.subr.bf16.mxu1 %v4982_v6  ;;  %v2206_v62 = vld [vmem:[#allocation8 + $0x6d8] sm:$0xff]  ;;  %v2515_v6 = vld [vmem:[#allocation8 + $0x1080] sm:$0xff]  ;;  %v4842_v8 = vpack.c.bf16 %v2522_v58, %v2516_v57  ;;  %v2229_v57 = vld [vmem:[#allocation8 + $0x790] sm:$0xff] }
 0x29c   :  { %v4994_v10 = vpack.c.bf16 %v2212_v31, %v2206_v62  ;;  %v4844_v26 = vpack.c.bf16 %v2521_v7, %v2515_v6  ;;  %v5002_v62 = vpack.c.bf16 %v2236_v25, %v2230_v63  ;;  %v2235_v31 = vld [vmem:[#allocation8 + $0x7c0] sm:$0xff]  ;;  %v2242_v6 = vld [vmem:[#allocation8 + $0x7f8] sm:$0xff]  ;;  %v2248_v7 = vld [vmem:[#allocation8 + $0x828] sm:$0xff] }
 0x29d   :  { %4833 = vmatpush1.bf16.msra.mxu0 %v4832_v18  ;;  %v2528_v18 = vld [vmem:[#allocation8 + $0x10e8] sm:$0xff]  ;;  %v2563_v63 = vld [vmem:[#allocation8 + $0x1200] sm:$0xff]  ;;  %v2569_v25 = vld [vmem:[#allocation8 + $0x1230] sm:$0xff] }
 0x29e   :  { %4985 = vmatpush1.bf16.msra.mxu1 %v4984_v21  ;;  %4835 = vmatprep.subr.bf16.mxu0 %v4834_v0  ;;  %v2534_v21 = vld [vmem:[#allocation8 + $0x1118] sm:$0xff] }
 0x29f   :  { %4987 = vmatprep.subr.bf16.mxu1 %v4986_v27  ;;  %v2218_v0 = vld [vmem:[#allocation8 + $0x738] sm:$0xff]  ;;  %v4996_v27 = vpack.c.bf16 %v2211_v17, %v2205_v61  ;;  %v4846_v47 = vpack.c.bf16 %v2534_v21, %v2528_v18  ;;  %v5004_v61 = vpack.c.bf16 %v2235_v31, %v2229_v57  ;;  %v2551_v18 = vld [vmem:[#allocation8 + $0x11a0] sm:$0xff]  ;;  %v2557_v21 = vld [vmem:[#allocation8 + $0x11d0] sm:$0xff] }
 0x2a0   :  { %v4998_v32 = vpack.c.bf16 %v2224_v22, %v2218_v0  ;;  %v2241_v0 = vld [vmem:[#allocation8 + $0x7f0] sm:$0xff]  ;;  %v5006_v22 = vpack.c.bf16 %v2248_v7, %v2242_v6  ;;  %v2266_v57 = vld [vmem:[#allocation8 + $0x8b8] sm:$0xff]  ;;  %v2575_v6 = vld [vmem:[#allocation8 + $0x1260] sm:$0xff] }
 0x2a1   :  { %4837 = vmatpush1.bf16.msra.mxu0 %v4836_v60  ;;  %3208 = vmatmul.mubr.f32.vlgmr.msra.gmra.mrb[24].mxu1 %v6059_v13  ;;  %v2540_v60 = vld [vmem:[#allocation8 + $0x1148] sm:$0xff]  ;;  %v2581_v7 = vld [vmem:[#allocation8 + $0x1290] sm:$0xff] }
 0x2a2   :  { %3213 = vmatprep.mubr.f32.mxu1 %v6072_v35  ;;  %4989 = vmatpush1.bf16.msra.mxu1 %v4988_v11  ;;  %v2546_v11 = vld [vmem:[#allocation8 + $0x1178] sm:$0xff] }
 0x2a3   :  { %4839 = vmatprep.subr.bf16.mxu0 %v4838_v5  ;;  %4991 = vmatprep.subr.bf16.mxu1 %v4990_v45  ;;  %v4848_v5 = vpack.c.bf16 %v2533_v30, %v2527_v29  ;;  %v5000_v45 = vpack.c.bf16 %v2223_v33, %v2217_v41  ;;  %v4850_v58 = vpack.c.bf16 %v2546_v11, %v2540_v60  ;;  %v2570_v29 = vld [vmem:[#allocation8 + $0x1238] sm:$0xff]  ;;  %v2253_v60 = vld [vmem:[#allocation8 + $0x850] sm:$0xff] }
 0x2a4   :  { %v2254_v30 = vld [vmem:[#allocation8 + $0x858] sm:$0xff] }
 0x2a5   :  { %4841 = vmatpush1.bf16.msra.mxu0 %v4840_v2  ;;  %3214 = vmatmul.mubr.f32.gmra.mrb[26].mxu1 %v6068_v16  ;;  %v2552_v2 = vld [vmem:[#allocation8 + $0x11a8] sm:$0xff] }
 0x2a6   :  { %3219 = vmatprep.mubr.f32.mxu1 %v6082_v44  ;;  %4993 = vmatpush1.bf16.msra.mxu1 %v4992_v39  ;;  %v2558_v39 = vld [vmem:[#allocation8 + $0x11d8] sm:$0xff] }
 0x2a7   :  { %4843 = vmatprep.subr.bf16.mxu0 %v4842_v8  ;;  %4995 = vmatprep.subr.bf16.mxu1 %v4994_v10  ;;  %v4852_v8 = vpack.c.bf16 %v2545_v53, %v2539_v28  ;;  %v897_v10 = vsub.s32 4, %v6042_v36  ;;  %v4854_v17 = vpack.c.bf16 %v2558_v39, %v2552_v2  ;;  %v2576_v28 = vld [vmem:[#allocation8 + $0x1268] sm:$0xff]  ;;  %v2582_v53 = vld [vmem:[#allocation8 + $0x1298] sm:$0xff]  ;;  %v2265_v2 = vld [vmem:[#allocation8 + $0x8b0] sm:$0xff] }
 0x2a8   :  { %v4862_v39 = vpack.c.bf16 %v2582_v53, %v2576_v28  ;;  %v2289_v28 = vld [vmem:[#allocation8 + $0x970] sm:$0xff] }
 0x2a9   :  { %4845 = vmatpush1.bf16.msra.mxu0 %v4844_v26  ;;  %3220 = vmatmul.mubr.f32.gmra.mrb[28].mxu1 %v6078_v51  ;;  %v2247_v26 = vld [vmem:[#allocation8 + $0x820] sm:$0xff]  ;;  %v6182_v41 = vrot.slane %v6115_v23, %v897_v10 }
 0x2aa   :  { %3225 = vmatprep.mubr.f32.mxu1 %v6092_v49  ;;  %4997 = vmatpush1.bf16.msra.mxu1 %v4996_v27  ;;  %v2564_v27 = vld [vmem:[#allocation8 + $0x1208] sm:$0xff]  ;;  %v5008_v33 = vpack.c.bf16 %v2247_v26, %v2241_v0 }
 0x2ab   :  { %4847 = vmatprep.subr.bf16.mxu0 %v4846_v47  ;;  %4999 = vmatprep.subr.bf16.mxu1 %v4998_v32  ;;  %v2260_v47 = vld [vmem:[#allocation8 + $0x888] sm:$0xff]  ;;  %v4856_v32 = vpack.c.bf16 %v2557_v21, %v2551_v18  ;;  %v4858_v11 = vpack.c.bf16 %v2570_v29, %v2564_v27  ;;  %v6186_v23 = vadd.f32 %v6096_v24, %v6182_v41  ;;  %v2594_v21 = vld [vmem:[#allocation8 + $0x12f8] sm:$0xff]  ;;  %v2277_v27 = vld [vmem:[#allocation8 + $0x910] sm:$0xff] }
 0x2ac   :  { %v2588_v18 = vld [vmem:[#allocation8 + $0x12c8] sm:$0xff]  ;;  %v2278_v24 = vld [vmem:[#allocation8 + $0x918] sm:$0xff]  ;;  %v6196_v26 = vadd.f32 %v6100_v46, %v6182_v41 }
 0x2ad   :  { %4849 = vmatpush1.bf16.msra.mxu0 %v4848_v5  ;;  %3226 = vmatmul.mubr.f32.gmra.mrb[30].mxu1 %v6088_v9  ;;  %v5010_v5 = vpack.c.bf16 %v2260_v47, %v2254_v30  ;;  %v2284_v0 = vld [vmem:[#allocation8 + $0x948] sm:$0xff]  ;;  %v4866_v29 = vpack.c.bf16 %v2594_v21, %v2588_v18  ;;  %v2587_v30 = vld [vmem:[#allocation8 + $0x12c0] sm:$0xff]  ;;  %v2593_v47 = vld [vmem:[#allocation8 + $0x12f0] sm:$0xff] }
 0x2ae   :  { %5001 = vmatpush1.bf16.msra.mxu1 %v5000_v45  ;;  %3296 = vmatprep.mubr.f32.mxu1 %v6128_v40  ;;  %v2259_v45 = vld [vmem:[#allocation8 + $0x880] sm:$0xff]  ;;  %v2290_v46 = vld [vmem:[#allocation8 + $0x978] sm:$0xff] }
 0x2af   :  { %4851 = vmatprep.subr.bf16.mxu0 %v4850_v58  ;;  %5003 = vmatprep.subr.bf16.mxu1 %v5002_v62  ;;  %v2272_v58 = vld [vmem:[#allocation8 + $0x8e8] sm:$0xff]  ;;  %v4860_v62 = vpack.c.bf16 %v2569_v25, %v2563_v63  ;;  %v5012_v31 = vpack.c.bf16 %v2259_v45, %v2253_v60  ;;  %v2283_v60 = vld [vmem:[#allocation8 + $0x940] sm:$0xff]  ;;  %v2606_v63 = vld [vmem:[#allocation8 + $0x1358] sm:$0xff]  ;;  %v6206_v45 = vadd.f32 %v6104_v15, %v6182_v41 }
 0x2b0   :  { %v2296_v25 = vld [vmem:[#allocation8 + $0x9a8] sm:$0xff]  ;;  %v2302_v15 = vld [vmem:[#allocation8 + $0x9d8] sm:$0xff]  ;;  %v2611_v21 = vld [vmem:[#allocation8 + $0x1380] sm:$0xff] }
 0x2b1   :  { %4853 = vmatpush1.bf16.msra.mxu0 %v4852_v8  ;;  %v6190_v8 = vadd.f32 %v6102_v37, %v6153_v48 }
 0x2b2   :  { %5005 = vmatpush1.bf16.msra.mxu1 %v5004_v61  ;;  %4855 = vmatprep.subr.bf16.mxu0 %v4854_v17  ;;  %v5014_v61 = vpack.c.bf16 %v2272_v58, %v2266_v57  ;;  %v2271_v17 = vld [vmem:[#allocation8 + $0x8e0] sm:$0xff]  ;;  %v2605_v58 = vld [vmem:[#allocation8 + $0x1350] sm:$0xff] }
 0x2b3   :  { %5007 = vmatprep.subr.bf16.mxu1 %v5006_v22  ;;  %v4864_v22 = vpack.c.bf16 %v2581_v7, %v2575_v6  ;;  %v5016_v37 = vpack.c.bf16 %v2271_v17, %v2265_v2  ;;  %v2599_v57 = vld [vmem:[#allocation8 + $0x1320] sm:$0xff]  ;;  %v2618_v6 = vld [vmem:[#allocation8 + $0x13b8] sm:$0xff]  ;;  %v2308_v7 = vld [vmem:[#allocation8 + $0xa08] sm:$0xff]  ;;  %v6216_v17 = vadd.f32 %v6108_v52, %v6182_v41 }
 0x2b4   :  { %v2295_v2 = vld [vmem:[#allocation8 + $0x9a0] sm:$0xff]  ;;  %v2313_v41 = vld [vmem:[#allocation8 + $0xa30] sm:$0xff] }
 0x2b5   :  { %4857 = vmatpush1.bf16.msra.mxu0 %v4856_v32  ;;  %v6200_v32 = vadd.f32 %v6106_v50, %v6153_v48  ;;  %v5020_v50 = vpack.c.bf16 %v2283_v60, %v2277_v27  ;;  %v2630_v27 = vld [vmem:[#allocation8 + $0x1418] sm:$0xff]  ;;  %v2623_v60 = vld [vmem:[#allocation8 + $0x13e0] sm:$0xff] }
 0x2b6   :  { %5009 = vmatpush1.bf16.msra.mxu1 %v5008_v33  ;;  %4859 = vmatprep.subr.bf16.mxu0 %v4858_v11  ;;  %v5018_v33 = vpack.c.bf16 %v2284_v0, %v2278_v24  ;;  %v2600_v11 = vld [vmem:[#allocation8 + $0x1328] sm:$0xff]  ;;  %v2617_v24 = vld [vmem:[#allocation8 + $0x13b0] sm:$0xff]  ;;  %v5026_v0 = vpack.c.bf16 %v2308_v7, %v2302_v15  ;;  %v2331_v15 = vld [vmem:[#allocation8 + $0xac0] sm:$0xff] }
 0x2b7   :  { %5011 = vmatprep.subr.bf16.mxu1 %v5010_v5  ;;  %v4868_v5 = vpack.c.bf16 %v2593_v47, %v2587_v30  ;;  %v4870_v53 = vpack.c.bf16 %v2606_v63, %v2600_v11  ;;  %v2320_v30 = vld [vmem:[#allocation8 + $0xa68] sm:$0xff]  ;;  %v4876_v47 = vpack.c.bf16 %v2617_v24, %v2611_v21  ;;  %v2629_v11 = vld [vmem:[#allocation8 + $0x1410] sm:$0xff] }
 0x2b8   :  { %3030 = vmatmul.mubr.f32.vlgmr.msra.gmra.mrb[16].mxu0 %v6186_v23  ;;  %v2648_v7 = vld [vmem:[#allocation8 + $0x14a8] sm:$0xff]  ;;  %v2337_v24 = vld [vmem:[#allocation8 + $0xaf0] sm:$0xff] }
 0x2b9   :  { %3035 = vmatprep.mubr.f32.mxu0 %v6190_v8  ;;  %4861 = vmatpush1.bf16.msra.mxu0 %v4860_v62  ;;  %v6210_v62 = vadd.f32 %v6110_v59, %v6153_v48  ;;  %v5024_v59 = vpack.c.bf16 %v2295_v2, %v2289_v28  ;;  %v2301_v48 = vld [vmem:[#allocation8 + $0x9d0] sm:$0xff]  ;;  %v2332_v28 = vld [vmem:[#allocation8 + $0xac8] sm:$0xff]  ;;  %v2635_v2 = vld [vmem:[#allocation8 + $0x1440] sm:$0xff] }
 0x2ba   :  { %5013 = vmatpush1.bf16.msra.mxu1 %v5012_v31  ;;  %4863 = vmatprep.subr.bf16.mxu0 %v4862_v39  ;;  %v5022_v31 = vpack.c.bf16 %v2296_v25, %v2290_v46  ;;  %v2612_v39 = vld [vmem:[#allocation8 + $0x1388] sm:$0xff]  ;;  %v2319_v46 = vld [vmem:[#allocation8 + $0xa60] sm:$0xff] }
 0x2bb   :  { %5015 = vmatprep.subr.bf16.mxu1 %v5014_v61  ;;  %v4872_v61 = vpack.c.bf16 %v2605_v58, %v2599_v57  ;;  %v4874_v18 = vpack.c.bf16 %v2618_v6, %v2612_v39  ;;  %v2636_v25 = vld [vmem:[#allocation8 + $0x1448] sm:$0xff]  ;;  %v5032_v57 = vpack.c.bf16 %v2319_v46, %v2313_v41  ;;  %v2325_v58 = vld [vmem:[#allocation8 + $0xa90] sm:$0xff]  ;;  %v2659_v46 = vld [vmem:[#allocation8 + $0x1500] sm:$0xff] }
 0x2bc   :  { %3036 = vmatmul.mubr.f32.gmra.mrb[18].mxu0 %v6196_v26  ;;  %v2641_v39 = vld [vmem:[#allocation8 + $0x1470] sm:$0xff]  ;;  %v5036_v21 = vpack.c.bf16 %v2331_v15, %v2325_v58  ;;  %v2356_v41 = vld [vmem:[#allocation8 + $0xb88] sm:$0xff]  ;;  %v2671_v15 = vld [vmem:[#allocation8 + $0x1560] sm:$0xff] }
 0x2bd   :  { %3041 = vmatprep.mubr.f32.mxu0 %v6200_v32  ;;  %4865 = vmatpush1.bf16.msra.mxu0 %v4864_v22  ;;  %v2307_v22 = vld [vmem:[#allocation8 + $0xa00] sm:$0xff]  ;;  %v2368_v58 = vld [vmem:[#allocation8 + $0xbe8] sm:$0xff] }
 0x2be   :  { %5017 = vmatpush1.bf16.msra.mxu1 %v5016_v37  ;;  %4867 = vmatprep.subr.bf16.mxu0 %v4866_v29  ;;  %v2624_v37 = vld [vmem:[#allocation8 + $0x13e8] sm:$0xff]  ;;  %v2314_v29 = vld [vmem:[#allocation8 + $0xa38] sm:$0xff]  ;;  %v5028_v52 = vpack.c.bf16 %v2307_v22, %v2301_v48  ;;  %v2647_v22 = vld [vmem:[#allocation8 + $0x14a0] sm:$0xff] }
 0x2bf   :  { %5019 = vmatprep.subr.bf16.mxu1 %v5018_v33  ;;  %v4878_v33 = vpack.c.bf16 %v2630_v27, %v2624_v37  ;;  %v5030_v63 = vpack.c.bf16 %v2320_v30, %v2314_v29  ;;  %v2344_v48 = vld [vmem:[#allocation8 + $0xb28] sm:$0xff]  ;;  %v2653_v37 = vld [vmem:[#allocation8 + $0x14d0] sm:$0xff]  ;;  %v2343_v29 = vld [vmem:[#allocation8 + $0xb20] sm:$0xff] }
 0x2c0   :  { %3042 = vmatmul.mubr.f32.gmra.mrb[20].mxu0 %v6206_v45  ;;  %v2660_v30 = vld [vmem:[#allocation8 + $0x1508] sm:$0xff] }
 0x2c1   :  { %3047 = vmatprep.mubr.f32.mxu0 %v6210_v62  ;;  %4869 = vmatpush1.bf16.msra.mxu0 %v4868_v5  ;;  %v2642_v5 = vld [vmem:[#allocation8 + $0x1478] sm:$0xff] }
 0x2c2   :  { %5021 = vmatpush1.bf16.msra.mxu1 %v5020_v50  ;;  %4871 = vmatprep.subr.bf16.mxu0 %v4870_v53  ;;  %v2326_v50 = vld [vmem:[#allocation8 + $0xa98] sm:$0xff]  ;;  %v4880_v53 = vpack.c.bf16 %v2629_v11, %v2623_v60  ;;  %v5040_v60 = vpack.c.bf16 %v2343_v29, %v2337_v24  ;;  %v2349_v11 = vld [vmem:[#allocation8 + $0xb50] sm:$0xff]  ;;  %v2380_v24 = vld [vmem:[#allocation8 + $0xc48] sm:$0xff] }
 0x2c3   :  { %5023 = vmatprep.subr.bf16.mxu1 %v5022_v31  ;;  %v4882_v31 = vpack.c.bf16 %v2642_v5, %v2636_v25  ;;  %v5034_v6 = vpack.c.bf16 %v2332_v28, %v2326_v50  ;;  %v2665_v25 = vld [vmem:[#allocation8 + $0x1530] sm:$0xff]  ;;  %v2355_v50 = vld [vmem:[#allocation8 + $0xb80] sm:$0xff]  ;;  %v2672_v28 = vld [vmem:[#allocation8 + $0x1568] sm:$0xff] }
 0x2c4   :  { %3048 = vmatmul.mubr.f32.gmra.mrb[22].mxu0 %v6216_v17  ;;  %v2689_v29 = vld [vmem:[#allocation8 + $0x15f0] sm:$0xff] }
 0x2c5   :  { %4873 = vmatpush1.bf16.msra.mxu0 %v4872_v61  ;;  %v2654_v61 = vld [vmem:[#allocation8 + $0x14d8] sm:$0xff] }
 0x2c6   :  { %5025 = vmatpush1.bf16.msra.mxu1 %v5024_v59  ;;  %4875 = vmatprep.subr.bf16.mxu0 %v4874_v18  ;;  %v2338_v59 = vld [vmem:[#allocation8 + $0xaf8] sm:$0xff]  ;;  %v4884_v18 = vpack.c.bf16 %v2641_v39, %v2635_v2  ;;  %v5044_v2 = vpack.c.bf16 %v2355_v50, %v2349_v11  ;;  %v2361_v39 = vld [vmem:[#allocation8 + $0xbb0] sm:$0xff] }
 0x2c7   :  { %5027 = vmatprep.subr.bf16.mxu1 %v5026_v0  ;;  %v4886_v0 = vpack.c.bf16 %v2654_v61, %v2648_v7  ;;  %v5038_v27 = vpack.c.bf16 %v2344_v48, %v2338_v59  ;;  %v2677_v7 = vld [vmem:[#allocation8 + $0x1590] sm:$0xff]  ;;  %v2367_v59 = vld [vmem:[#allocation8 + $0xbe0] sm:$0xff]  ;;  %v2684_v48 = vld [vmem:[#allocation8 + $0x15c8] sm:$0xff] }
 0x2c8   :  { %v2702_v11 = vld [vmem:[#allocation8 + $0x1658] sm:$0xff] }
 0x2c9   :  { %4877 = vmatpush1.bf16.msra.mxu0 %v4876_v47  ;;  %v2666_v47 = vld [vmem:[#allocation8 + $0x1538] sm:$0xff] }
 0x2ca   :  { %5029 = vmatpush1.bf16.msra.mxu1 %v5028_v52  ;;  %4879 = vmatprep.subr.bf16.mxu0 %v4878_v33  ;;  %v2350_v52 = vld [vmem:[#allocation8 + $0xb58] sm:$0xff]  ;;  %v4888_v33 = vpack.c.bf16 %v2653_v37, %v2647_v22  ;;  %v5048_v22 = vpack.c.bf16 %v2367_v59, %v2361_v39 }
 0x2cb   :  { %5031 = vmatprep.subr.bf16.mxu1 %v5030_v63  ;;  %v4890_v63 = vpack.c.bf16 %v2666_v47, %v2660_v30  ;;  %v5042_v5 = vpack.c.bf16 %v2356_v41, %v2350_v52  ;;  %v2373_v47 = vld [vmem:[#allocation8 + $0xc10] sm:$0xff]  ;;  %v2379_v52 = vld [vmem:[#allocation8 + $0xc40] sm:$0xff]  ;;  %v2386_v41 = vld [vmem:[#allocation8 + $0xc78] sm:$0xff] }
 0x2cc   :  { %v2714_v39 = vld [vmem:[#allocation8 + $0x16b8] sm:$0xff] }
 0x2cd   :  { %4881 = vmatpush1.bf16.msra.mxu0 %v4880_v53  ;;  %v2678_v53 = vld [vmem:[#allocation8 + $0x1598] sm:$0xff] }
 0x2ce   :  { %5033 = vmatpush1.bf16.msra.mxu1 %v5032_v57  ;;  %4883 = vmatprep.subr.bf16.mxu0 %v4882_v31  ;;  %v2362_v57 = vld [vmem:[#allocation8 + $0xbb8] sm:$0xff]  ;;  %v4892_v31 = vpack.c.bf16 %v2665_v25, %v2659_v46  ;;  %v5052_v46 = vpack.c.bf16 %v2379_v52, %v2373_v47  ;;  %v2695_v25 = vld [vmem:[#allocation8 + $0x1620] sm:$0xff]  ;;  %v2725_v47 = vld [vmem:[#allocation8 + $0x1710] sm:$0xff] }
 0x2cf   :  { %5035 = vmatprep.subr.bf16.mxu1 %v5034_v6  ;;  %v4894_v6 = vpack.c.bf16 %v2678_v53, %v2672_v28  ;;  %v5046_v61 = vpack.c.bf16 %v2368_v58, %v2362_v57  ;;  %v2385_v28 = vld [vmem:[#allocation8 + $0xc70] sm:$0xff]  ;;  %v2391_v53 = vld [vmem:[#allocation8 + $0xca0] sm:$0xff]  ;;  %v2398_v57 = vld [vmem:[#allocation8 + $0xcd8] sm:$0xff] }
 0x2d1   :  { %4885 = vmatpush1.bf16.msra.mxu0 %v4884_v18  ;;  %v2690_v18 = vld [vmem:[#allocation8 + $0x15f8] sm:$0xff] }
 0x2d2   :  { %5037 = vmatpush1.bf16.msra.mxu1 %v5036_v21  ;;  %4887 = vmatprep.subr.bf16.mxu0 %v4886_v0  ;;  %v2374_v21 = vld [vmem:[#allocation8 + $0xc18] sm:$0xff]  ;;  %v4896_v0 = vpack.c.bf16 %v2677_v7, %v2671_v15  ;;  %v4898_v37 = vpack.c.bf16 %v2690_v18, %v2684_v48  ;;  %v5056_v15 = vpack.c.bf16 %v2391_v53, %v2385_v28  ;;  %v2707_v7 = vld [vmem:[#allocation8 + $0x1680] sm:$0xff]  ;;  %v2397_v48 = vld [vmem:[#allocation8 + $0xcd0] sm:$0xff] }
 0x2d3   :  { %5039 = vmatprep.subr.bf16.mxu1 %v5038_v27  ;;  %v2683_v27 = vld [vmem:[#allocation8 + $0x15c0] sm:$0xff]  ;;  %v5050_v30 = vpack.c.bf16 %v2380_v24, %v2374_v21  ;;  %v2410_v21 = vld [vmem:[#allocation8 + $0xd38] sm:$0xff]  ;;  %v2421_v28 = vld [vmem:[#allocation8 + $0xd90] sm:$0xff] }
 0x2d4   :  { %v2403_v18 = vld [vmem:[#allocation8 + $0xd00] sm:$0xff] }
 0x2d5   :  { %4889 = vmatpush1.bf16.msra.mxu0 %v4888_v33  ;;  %v2392_v33 = vld [vmem:[#allocation8 + $0xca8] sm:$0xff]  ;;  %v2731_v53 = vld [vmem:[#allocation8 + $0x1740] sm:$0xff] }
 0x2d6   :  { %5041 = vmatpush1.bf16.msra.mxu1 %v5040_v60  ;;  %4891 = vmatprep.subr.bf16.mxu0 %v4890_v63  ;;  %v2696_v60 = vld [vmem:[#allocation8 + $0x1628] sm:$0xff]  ;;  %v4900_v63 = vpack.c.bf16 %v2689_v29, %v2683_v27  ;;  %v5054_v50 = vpack.c.bf16 %v2392_v33, %v2386_v41  ;;  %v5060_v29 = vpack.c.bf16 %v2403_v18, %v2397_v48  ;;  %v2409_v41 = vld [vmem:[#allocation8 + $0xd30] sm:$0xff]  ;;  %v2415_v33 = vld [vmem:[#allocation8 + $0xd60] sm:$0xff] }
 0x2d7   :  { %5043 = vmatprep.subr.bf16.mxu1 %v5042_v5  ;;  %v2701_v5 = vld [vmem:[#allocation8 + $0x1650] sm:$0xff]  ;;  %v4902_v58 = vpack.c.bf16 %v2702_v11, %v2696_v60  ;;  %v2422_v60 = vld [vmem:[#allocation8 + $0xd98] sm:$0xff] }
 0x2d8   :  { %v2433_v48 = vld [vmem:[#allocation8 + $0xdf0] sm:$0xff] }
 0x2d9   :  { %4893 = vmatpush1.bf16.msra.mxu0 %v4892_v31  ;;  %v2404_v31 = vld [vmem:[#allocation8 + $0xd08] sm:$0xff] }
 0x2da   :  { %5045 = vmatpush1.bf16.msra.mxu1 %v5044_v2  ;;  %4895 = vmatprep.subr.bf16.mxu0 %v4894_v6  ;;  %v2708_v2 = vld [vmem:[#allocation8 + $0x1688] sm:$0xff]  ;;  %v4904_v6 = vpack.c.bf16 %v2701_v5, %v2695_v25  ;;  %v5058_v59 = vpack.c.bf16 %v2404_v31, %v2398_v57  ;;  %v2738_v25 = vld [vmem:[#allocation8 + $0x1778] sm:$0xff]  ;;  %v2737_v57 = vld [vmem:[#allocation8 + $0x1770] sm:$0xff] }
 0x2db   :  { %5047 = vmatprep.subr.bf16.mxu1 %v5046_v61  ;;  %v2713_v61 = vld [vmem:[#allocation8 + $0x16b0] sm:$0xff]  ;;  %v4906_v24 = vpack.c.bf16 %v2714_v39, %v2708_v2  ;;  %v2427_v31 = vld [vmem:[#allocation8 + $0xdc0] sm:$0xff]  ;;  %v2744_v39 = vld [vmem:[#allocation8 + $0x17a8] sm:$0xff] }
 0x2dc   :  { %v4908_v27 = vpack.c.bf16 %v2713_v61, %v2707_v7  ;;  %v2440_v7 = vld [vmem:[#allocation8 + $0xe28] sm:$0xff]  ;;  %v4916_v61 = vpack.c.bf16 %v2737_v57, %v2731_v53  ;;  %v2470_v53 = vld [vmem:[#allocation8 + $0xf18] sm:$0xff] }
 0x2dd   :  { %4897 = vmatpush1.bf16.msra.mxu0 %v4896_v0  ;;  %v2416_v0 = vld [vmem:[#allocation8 + $0xd68] sm:$0xff] }
 0x2de   :  { %5049 = vmatpush1.bf16.msra.mxu1 %v5048_v22  ;;  %4899 = vmatprep.subr.bf16.mxu0 %v4898_v37  ;;  %v2720_v22 = vld [vmem:[#allocation8 + $0x16e8] sm:$0xff]  ;;  %v2726_v37 = vld [vmem:[#allocation8 + $0x1718] sm:$0xff]  ;;  %v5062_v52 = vpack.c.bf16 %v2416_v0, %v2410_v21  ;;  %v2743_v21 = vld [vmem:[#allocation8 + $0x17a0] sm:$0xff] }
 0x2df   :  { %5051 = vmatprep.subr.bf16.mxu1 %v5050_v30  ;;  %v2719_v30 = vld [vmem:[#allocation8 + $0x16e0] sm:$0xff]  ;;  %v4910_v11 = vpack.c.bf16 %v2726_v37, %v2720_v22  ;;  %v1992_v37 = vld [vmem:[#allocation8 + $0x28] sm:$0xff] }
 0x2e0   :  { %v4912_v5 = vpack.c.bf16 %v2725_v47, %v2719_v30  ;;  %v2439_v22 = vld [vmem:[#allocation8 + $0xe20] sm:$0xff]  ;;  %v2452_v30 = vld [vmem:[#allocation8 + $0xe88] sm:$0xff] }
 0x2e1   :  { %3297 = vmatmul.mubr.f32.vlgmr.msra.gmra.mrb[24].mxu1 %v6131_v56  ;;  %4901 = vmatpush1.bf16.msra.mxu0 %v4900_v63  ;;  %v2428_v63 = vld [vmem:[#allocation8 + $0xdc8] sm:$0xff] }
 0x2e2   :  { %3302 = vmatprep.mubr.f32.mxu1 %v6136_v4  ;;  %5053 = vmatpush1.bf16.msra.mxu1 %v5052_v46  ;;  %v2732_v46 = vld [vmem:[#allocation8 + $0x1748] sm:$0xff] }
 0x2e3   :  { %5055 = vmatprep.subr.bf16.mxu1 %v5054_v50  ;;  %4903 = vmatprep.subr.bf16.mxu0 %v4902_v58  ;;  %v5064_v50 = vpack.c.bf16 %v2415_v33, %v2409_v41  ;;  %v5066_v58 = vpack.c.bf16 %v2428_v63, %v2422_v60  ;;  %v4914_v2 = vpack.c.bf16 %v2738_v25, %v2732_v46  ;;  %v2445_v60 = vld [vmem:[#allocation8 + $0xe50] sm:$0xff]  ;;  %v2458_v63 = vld [vmem:[#allocation8 + $0xeb8] sm:$0xff]  ;;  %v2464_v46 = vld [vmem:[#allocation8 + $0xee8] sm:$0xff] }
 0x2e4   :  { %v2476_v57 = vld [vmem:[#allocation8 + $0xf48] sm:$0xff] }
 0x2e5   :  { %3303 = vmatmul.mubr.f32.gmra.mrb[26].mxu1 %v6139_v54  ;;  %4905 = vmatpush1.bf16.msra.mxu0 %v4904_v6  ;;  %v2750_v6 = vld [vmem:[#allocation8 + $0x17d8] sm:$0xff] }
 0x2e6   :  { %3308 = vmatprep.mubr.f32.mxu1 %v6145_v43  ;;  %5057 = vmatpush1.bf16.msra.mxu1 %v5056_v15  ;;  %v2434_v15 = vld [vmem:[#allocation8 + $0xdf8] sm:$0xff]  ;;  %v4918_v18 = vpack.c.bf16 %v2750_v6, %v2744_v39  ;;  %v2475_v39 = vld [vmem:[#allocation8 + $0xf40] sm:$0xff] }
 0x2e7   :  { %5059 = vmatprep.subr.bf16.mxu1 %v5058_v59  ;;  %4907 = vmatprep.subr.bf16.mxu0 %v4906_v24  ;;  %v5068_v59 = vpack.c.bf16 %v2427_v31, %v2421_v28  ;;  %v2749_v24 = vld [vmem:[#allocation8 + $0x17d0] sm:$0xff]  ;;  %v5070_v0 = vpack.c.bf16 %v2440_v7, %v2434_v15  ;;  %v2463_v28 = vld [vmem:[#allocation8 + $0xee0] sm:$0xff]  ;;  %v5082_v31 = vpack.c.bf16 %v2476_v57, %v2470_v53  ;;  %v2482_v6 = vld [vmem:[#allocation8 + $0xf78] sm:$0xff] }
 0x2e8   :  { %v4920_v47 = vpack.c.bf16 %v2749_v24, %v2743_v21  ;;  %v2488_v15 = vld [vmem:[#allocation8 + $0xfa8] sm:$0xff]  ;;  %v2529_v57 = vld [vmem:[#allocation8 + $0x10f0] sm:$0xff] }
 0x2e9   :  { %3309 = vmatmul.mubr.f32.gmra.mrb[28].mxu1 %v6148_v34  ;;  %4909 = vmatpush1.bf16.msra.mxu0 %v4908_v27  ;;  %v1998_v27 = vld [vmem:[#allocation8 + $0x58] sm:$0xff]  ;;  %v2500_v21 = vld [vmem:[#allocation8 + $0x1008] sm:$0xff] }
 0x2ea   :  { %3314 = vmatprep.mubr.f32.mxu1 %v6158_v1  ;;  %5061 = vmatpush1.bf16.msra.mxu1 %v5060_v29  ;;  %v2446_v29 = vld [vmem:[#allocation8 + $0xe58] sm:$0xff]  ;;  %v5178_v41 = vpack.c.bf16 %v1998_v27, %v1992_v37  ;;  %v2499_v37 = vld [vmem:[#allocation8 + $0x1000] sm:$0xff] }
 0x2eb   :  { %5063 = vmatprep.subr.bf16.mxu1 %v5062_v52  ;;  %4911 = vmatprep.subr.bf16.mxu0 %v4910_v11  ;;  %v5072_v52 = vpack.c.bf16 %v2439_v22, %v2433_v48  ;;  %v5074_v33 = vpack.c.bf16 %v2452_v30, %v2446_v29  ;;  %v2451_v11 = vld [vmem:[#allocation8 + $0xe80] sm:$0xff]  ;;  %v2493_v22 = vld [vmem:[#allocation8 + $0xfd0] sm:$0xff]  ;;  %v2506_v27 = vld [vmem:[#allocation8 + $0x1038] sm:$0xff] }
 0x2ec   :  { %v5076_v25 = vpack.c.bf16 %v2451_v11, %v2445_v60  ;;  %v2487_v48 = vld [vmem:[#allocation8 + $0xfa0] sm:$0xff]  ;;  %v2512_v29 = vld [vmem:[#allocation8 + $0x1068] sm:$0xff]  ;;  %v5092_v30 = vpack.c.bf16 %v2499_v37, %v2493_v22 }
 0x2ed   :  { %3315 = vmatmul.mubr.f32.gmra.mrb[30].mxu1 %v6161_v3  ;;  %4913 = vmatpush1.bf16.msra.mxu0 %v4912_v5  ;;  %v5078_v5 = vpack.c.bf16 %v2464_v46, %v2458_v63  ;;  %v2524_v60 = vld [vmem:[#allocation8 + $0x10c8] sm:$0xff]  ;;  %v2517_v46 = vld [vmem:[#allocation8 + $0x1090] sm:$0xff] }
 0x2ee   :  { %5065 = vmatpush1.bf16.msra.mxu1 %v5064_v50  ;;  %3385 = vmatprep.mubr.f32.mxu1 %v6165_v12  ;;  %v2457_v50 = vld [vmem:[#allocation8 + $0xeb0] sm:$0xff]  ;;  %v2572_v22 = vld [vmem:[#allocation8 + $0x1248] sm:$0xff] }
 0x2ef   :  { %5067 = vmatprep.subr.bf16.mxu1 %v5066_v58  ;;  %4915 = vmatprep.subr.bf16.mxu0 %v4914_v2  ;;  %v5080_v58 = vpack.c.bf16 %v2463_v28, %v2457_v50  ;;  %v2469_v2 = vld [vmem:[#allocation8 + $0xf10] sm:$0xff]  ;;  %v2536_v50 = vld [vmem:[#allocation8 + $0x1128] sm:$0xff] }
 0x2f0   :  { %v5084_v7 = vpack.c.bf16 %v2475_v39, %v2469_v2  ;;  %v2548_v2 = vld [vmem:[#allocation8 + $0x1188] sm:$0xff] }
 0x2f1   :  { %4917 = vmatpush1.bf16.msra.mxu0 %v4916_v61  ;;  %v5086_v61 = vpack.c.bf16 %v2488_v15, %v2482_v6  ;;  %v2541_v15 = vld [vmem:[#allocation8 + $0x1150] sm:$0xff] }
 0x2f2   :  { %5069 = vmatpush1.bf16.msra.mxu1 %v5068_v59  ;;  %4919 = vmatprep.subr.bf16.mxu0 %v4918_v18  ;;  %v2481_v59 = vld [vmem:[#allocation8 + $0xf70] sm:$0xff]  ;;  %v2494_v18 = vld [vmem:[#allocation8 + $0xfd8] sm:$0xff] }
 0x2f3   :  { %5071 = vmatprep.subr.bf16.mxu1 %v5070_v0  ;;  %v5088_v24 = vpack.c.bf16 %v2487_v48, %v2481_v59  ;;  %v5090_v0 = vpack.c.bf16 %v2500_v21, %v2494_v18  ;;  %v2560_v59 = vld [vmem:[#allocation8 + $0x11e8] sm:$0xff]  ;;  %v2553_v21 = vld [vmem:[#allocation8 + $0x11b0] sm:$0xff] }
 0x2f5   :  { %4921 = vmatpush1.bf16.msra.mxu0 %v4920_v47  ;;  %v5094_v47 = vpack.c.bf16 %v2512_v29, %v2506_v27  ;;  %v2565_v29 = vld [vmem:[#allocation8 + $0x1210] sm:$0xff] }
 0x2f6   :  { %5073 = vmatpush1.bf16.msra.mxu1 %v5072_v52  ;;  %5179 = vmatprep.subr.bf16.mxu0 %v5178_v41  ;;  %v2505_v52 = vld [vmem:[#allocation8 + $0x1030] sm:$0xff]  ;;  %v2511_v41 = vld [vmem:[#allocation8 + $0x1060] sm:$0xff] }
 0x2f7   :  { %5075 = vmatprep.subr.bf16.mxu1 %v5074_v33  ;;  %v2518_v33 = vld [vmem:[#allocation8 + $0x1098] sm:$0xff]  ;;  %v5096_v11 = vpack.c.bf16 %v2511_v41, %v2505_v52  ;;  %v2584_v52 = vld [vmem:[#allocation8 + $0x12a8] sm:$0xff] }
 0x2f8   :  { %v5098_v63 = vpack.c.bf16 %v2524_v60, %v2518_v33  ;;  %v2577_v60 = vld [vmem:[#allocation8 + $0x1270] sm:$0xff] }
 0x2fa   :  { %5077 = vmatpush1.bf16.msra.mxu1 %v5076_v25  ;;  %v2523_v25 = vld [vmem:[#allocation8 + $0x10c0] sm:$0xff] }
 0x2fb   :  { %5079 = vmatprep.subr.bf16.mxu1 %v5078_v5  ;;  %v2530_v5 = vld [vmem:[#allocation8 + $0x10f8] sm:$0xff]  ;;  %v5100_v28 = vpack.c.bf16 %v2523_v25, %v2517_v46  ;;  %v2596_v46 = vld [vmem:[#allocation8 + $0x1308] sm:$0xff] }
 0x2fc   :  { %v5102_v53 = vpack.c.bf16 %v2536_v50, %v2530_v5  ;;  %v2589_v50 = vld [vmem:[#allocation8 + $0x12d0] sm:$0xff] }
 0x2fe   :  { %5081 = vmatpush1.bf16.msra.mxu1 %v5080_v58  ;;  %v2535_v58 = vld [vmem:[#allocation8 + $0x1120] sm:$0xff] }
 0x2ff   :  { %5083 = vmatprep.subr.bf16.mxu1 %v5082_v31  ;;  %v2542_v31 = vld [vmem:[#allocation8 + $0x1158] sm:$0xff]  ;;  %v5104_v39 = vpack.c.bf16 %v2535_v58, %v2529_v57  ;;  %v2608_v57 = vld [vmem:[#allocation8 + $0x1368] sm:$0xff] }
 0x300   :  { %v5106_v6 = vpack.c.bf16 %v2548_v2, %v2542_v31  ;;  %v2601_v2 = vld [vmem:[#allocation8 + $0x1330] sm:$0xff] }
 0x302   :  { %5085 = vmatpush1.bf16.msra.mxu1 %v5084_v7  ;;  %v2547_v7 = vld [vmem:[#allocation8 + $0x1180] sm:$0xff] }
 0x303   :  { %5087 = vmatprep.subr.bf16.mxu1 %v5086_v61  ;;  %v2554_v61 = vld [vmem:[#allocation8 + $0x11b8] sm:$0xff]  ;;  %v5108_v48 = vpack.c.bf16 %v2547_v7, %v2541_v15  ;;  %v2620_v15 = vld [vmem:[#allocation8 + $0x13c8] sm:$0xff] }
 0x304   :  { %v5110_v18 = vpack.c.bf16 %v2560_v59, %v2554_v61  ;;  %v2613_v59 = vld [vmem:[#allocation8 + $0x1390] sm:$0xff] }
 0x306   :  { %5089 = vmatpush1.bf16.msra.mxu1 %v5088_v24  ;;  %v2559_v24 = vld [vmem:[#allocation8 + $0x11e0] sm:$0xff] }
 0x307   :  { %5091 = vmatprep.subr.bf16.mxu1 %v5090_v0  ;;  %v2566_v0 = vld [vmem:[#allocation8 + $0x1218] sm:$0xff]  ;;  %v5112_v37 = vpack.c.bf16 %v2559_v24, %v2553_v21  ;;  %v2632_v21 = vld [vmem:[#allocation8 + $0x1428] sm:$0xff]  ;;  %v909_v24 = vsub.s32 7, %v6042_v36 }
 0x308   :  { %v5114_v27 = vpack.c.bf16 %v2572_v22, %v2566_v0  ;;  %v905_v22 = vsub.s32 6, %v6042_v36 }
 0x30a   :  { %5093 = vmatpush1.bf16.msra.mxu1 %v5092_v30  ;;  %v2571_v30 = vld [vmem:[#allocation8 + $0x1240] sm:$0xff] }
 0x30b   :  { %5095 = vmatprep.subr.bf16.mxu1 %v5094_v47  ;;  %v2578_v47 = vld [vmem:[#allocation8 + $0x1278] sm:$0xff]  ;;  %v5116_v41 = vpack.c.bf16 %v2571_v30, %v2565_v29  ;;  %v2631_v29 = vld [vmem:[#allocation8 + $0x1420] sm:$0xff] }
 0x30c   :  { %v5118_v33 = vpack.c.bf16 %v2584_v52, %v2578_v47  ;;  %v5684_v30 = vld [vmem:[#allocation7] sm:$0xff] }
 0x30d   :  { %v6236_v47 = vrot.slane %v5684_v30, %v909_v24  ;;  %v2638_v52 = vld [vmem:[#allocation8 + $0x1458] sm:$0xff]  ;;  %v2655_v24 = vld [vmem:[#allocation8 + $0x14e0] sm:$0xff] }
 0x30e   :  { %5097 = vmatpush1.bf16.msra.mxu1 %v5096_v11  ;;  %v2583_v11 = vld [vmem:[#allocation8 + $0x12a0] sm:$0xff] }
 0x30f   :  { %5099 = vmatprep.subr.bf16.mxu1 %v5098_v63  ;;  %v2590_v63 = vld [vmem:[#allocation8 + $0x12d8] sm:$0xff]  ;;  %v5120_v25 = vpack.c.bf16 %v2583_v11, %v2577_v60  ;;  %v1991_v11 = vld [vmem:[#allocation8 + $0x20] sm:$0xff] }
 0x310   :  { %v5122_v5 = vpack.c.bf16 %v2596_v46, %v2590_v63  ;;  %v1997_v63 = vld [vmem:[#allocation8 + $0x50] sm:$0xff] }
 0x311   :  { %v2637_v46 = vld [vmem:[#allocation8 + $0x1450] sm:$0xff] }
 0x312   :  { %5101 = vmatpush1.bf16.msra.mxu1 %v5100_v28  ;;  %v2595_v28 = vld [vmem:[#allocation8 + $0x1300] sm:$0xff] }
 0x313   :  { %5103 = vmatprep.subr.bf16.mxu1 %v5102_v53  ;;  %v2602_v53 = vld [vmem:[#allocation8 + $0x1338] sm:$0xff]  ;;  %v5124_v58 = vpack.c.bf16 %v2595_v28, %v2589_v50  ;;  %v2004_v50 = vld [vmem:[#allocation8 + $0x88] sm:$0xff] }
 0x314   :  { %v5126_v31 = vpack.c.bf16 %v2608_v57, %v2602_v53  ;;  %v2010_v28 = vld [vmem:[#allocation8 + $0xb8] sm:$0xff] }
 0x316   :  { %5105 = vmatpush1.bf16.msra.mxu1 %v5104_v39  ;;  %v2607_v39 = vld [vmem:[#allocation8 + $0x1360] sm:$0xff] }
 0x317   :  { %5107 = vmatprep.subr.bf16.mxu1 %v5106_v6  ;;  %v2614_v6 = vld [vmem:[#allocation8 + $0x1398] sm:$0xff]  ;;  %v5128_v7 = vpack.c.bf16 %v2607_v39, %v2601_v2  ;;  %v5180_v39 = vpack.c.bf16 %v1997_v63, %v1991_v11  ;;  %v2015_v63 = vld [vmem:[#allocation8 + $0xe0] sm:$0xff] }
 0x318   :  { %v5130_v61 = vpack.c.bf16 %v2620_v15, %v2614_v6 }
 0x31a   :  { %5109 = vmatpush1.bf16.msra.mxu1 %v5108_v48  ;;  %v2619_v48 = vld [vmem:[#allocation8 + $0x13c0] sm:$0xff] }
 0x31b   :  { %5111 = vmatprep.subr.bf16.mxu1 %v5110_v18  ;;  %v2626_v18 = vld [vmem:[#allocation8 + $0x13f8] sm:$0xff]  ;;  %v5132_v0 = vpack.c.bf16 %v2619_v48, %v2613_v59  ;;  %v2009_v59 = vld [vmem:[#allocation8 + $0xb0] sm:$0xff] }
 0x31c   :  { %v2649_v48 = vld [vmem:[#allocation8 + $0x14b0] sm:$0xff] }
 0x31e   :  { %5113 = vmatpush1.bf16.msra.mxu1 %v5112_v37  ;;  %v5134_v37 = vpack.c.bf16 %v2632_v21, %v2626_v18 }
 0x31f   :  { %5115 = vmatprep.subr.bf16.mxu1 %v5114_v27  ;;  %v2625_v27 = vld [vmem:[#allocation8 + $0x13f0] sm:$0xff] }
 0x320   :  { %v5136_v60 = vpack.c.bf16 %v2631_v29, %v2625_v27  ;;  %v2662_v27 = vld [vmem:[#allocation8 + $0x1518] sm:$0xff]  ;;  %v2668_v29 = vld [vmem:[#allocation8 + $0x1548] sm:$0xff] }
 0x321   :  { %3386 = vmatmul.mubr.f32.vlgmr.msra.gmra.mrb[24].mxu1 %v6186_v23 }
 0x322   :  { %3391 = vmatprep.mubr.f32.mxu1 %v6190_v8  ;;  %5117 = vmatpush1.bf16.msra.mxu1 %v5116_v41  ;;  %v2644_v41 = vld [vmem:[#allocation8 + $0x1488] sm:$0xff] }
 0x323   :  { %5119 = vmatprep.subr.bf16.mxu1 %v5118_v33  ;;  %v6238_v33 = vrot.slane %v5684_v30, %v905_v22  ;;  %v5138_v57 = vpack.c.bf16 %v2644_v41, %v2638_v52  ;;  %v2022_v22 = vld [vmem:[#allocation8 + $0x118] sm:$0xff] }
 0x325   :  { %3392 = vmatmul.mubr.f32.gmra.mrb[26].mxu1 %v6196_v26 }
 0x326   :  { %3397 = vmatprep.mubr.f32.mxu1 %v6200_v32  ;;  %5121 = vmatpush1.bf16.msra.mxu1 %v5120_v25 }
 0x327   :  { %5123 = vmatprep.subr.bf16.mxu1 %v5122_v5  ;;  %v2643_v5 = vld [vmem:[#allocation8 + $0x1480] sm:$0xff] }
 0x328   :  { %v5140_v15 = vpack.c.bf16 %v2643_v5, %v2637_v46  ;;  %v2021_v46 = vld [vmem:[#allocation8 + $0x110] sm:$0xff] }
 0x329   :  { %3398 = vmatmul.mubr.f32.gmra.mrb[28].mxu1 %v6206_v45 }
 0x32a   :  { %3403 = vmatprep.mubr.f32.mxu1 %v6210_v62  ;;  %5125 = vmatpush1.bf16.msra.mxu1 %v5124_v58  ;;  %v2650_v58 = vld [vmem:[#allocation8 + $0x14b8] sm:$0xff] }
 0x32b   :  { %5127 = vmatprep.subr.bf16.mxu1 %v5126_v31  ;;  %v2656_v31 = vld [vmem:[#allocation8 + $0x14e8] sm:$0xff] }
 0x32c   :  { %v5142_v21 = vpack.c.bf16 %v2656_v31, %v2650_v58  ;;  %v2674_v31 = vld [vmem:[#allocation8 + $0x1578] sm:$0xff] }
 0x32d   :  { %3404 = vmatmul.mubr.f32.gmra.mrb[30].mxu1 %v6216_v17 }
 0x32e   :  { %5129 = vmatpush1.bf16.msra.mxu1 %v5128_v7  ;;  %v5182_v7 = vpack.c.bf16 %v2010_v28, %v2004_v50  ;;  %v5146_v50 = vpack.c.bf16 %v2668_v29, %v2662_v27  ;;  %v2667_v28 = vld [vmem:[#allocation8 + $0x1540] sm:$0xff]  ;;  %v2040_v27 = vld [vmem:[#allocation8 + $0x1a8] sm:$0xff]  ;;  %v2046_v29 = vld [vmem:[#allocation8 + $0x1d8] sm:$0xff] }
 0x32f   :  { %5131 = vmatprep.subr.bf16.mxu1 %v5130_v61  ;;  %v2003_v61 = vld [vmem:[#allocation8 + $0x80] sm:$0xff] }
 0x330   :  { %v5184_v52 = vpack.c.bf16 %v2009_v59, %v2003_v61 }
 0x332   :  { %5133 = vmatpush1.bf16.msra.mxu1 %v5132_v0  ;;  %v2016_v0 = vld [vmem:[#allocation8 + $0xe8] sm:$0xff] }
 0x333   :  { %v1964_v25 = vpop.f32.mrb[16].mxu1  ;;  %5135 = vmatprep.subr.bf16.mxu1 %v5134_v37  ;;  %v5186_v11 = vpack.c.bf16 %v2022_v22, %v2016_v0 }
 0x334   :  { %v1966_v53 = vpop.f32.mrb[17].mxu1  ;;  %v6244_v6 = vadd.f32 %v1964_v25, %v6238_v33  ;;  %v2661_v25 = vld [vmem:[#allocation8 + $0x1510] sm:$0xff] }
 0x335   :  { %v6241_v2 = vadd.f32 %v1966_v53, %v6236_v47  ;;  %v2028_v53 = vld [vmem:[#allocation8 + $0x148] sm:$0xff]  ;;  %v5148_v59 = vpack.c.bf16 %v2667_v28, %v2661_v25  ;;  %v2039_v28 = vld [vmem:[#allocation8 + $0x1a0] sm:$0xff] }
 0x336   :  { %5137 = vmatpush1.bf16.msra.mxu1 %v5136_v60  ;;  %v5144_v60 = vpack.c.bf16 %v2655_v24, %v2649_v48  ;;  %v2673_v24 = vld [vmem:[#allocation8 + $0x1570] sm:$0xff] }
 0x337   :  { %v1970_v18 = vpop.f32.mrb[18].mxu1  ;;  %3118 = vmatprep.mubr.f32.mxu0 %v6241_v2  ;;  %3474 = vmatprep.mubr.f32.mxu1 %v6241_v2 }
 0x338   :  { %v1972_v37 = vpop.f32.mrb[19].mxu1  ;;  %3119 = vmatmul.mubr.f32.vlgmr.msra.gmra.mrb[16].mxu0 %v6244_v6  ;;  %5139 = vmatprep.subr.bf16.mxu1 %v5138_v57  ;;  %v6253_v41 = vadd.f32 %v1970_v18, %v6238_v33  ;;  %v2034_v57 = vld [vmem:[#allocation8 + $0x178] sm:$0xff]  ;;  %v2027_v18 = vld [vmem:[#allocation8 + $0x140] sm:$0xff] }
 0x339   :  { %v6250_v30 = vadd.f32 %v1972_v37, %v6236_v47  ;;  %5181 = vmatpush1.bf16.msra.mxu0 %v5180_v39  ;;  %v2680_v39 = vld [vmem:[#allocation8 + $0x15a8] sm:$0xff]  ;;  %v5190_v48 = vpack.c.bf16 %v2034_v57, %v2028_v53  ;;  %v2679_v37 = vld [vmem:[#allocation8 + $0x15a0] sm:$0xff]  ;;  %v2045_v53 = vld [vmem:[#allocation8 + $0x1d0] sm:$0xff] }
 0x33a   :  { %5141 = vmatpush1.bf16.msra.mxu1 %v5140_v15  ;;  %5183 = vmatprep.subr.bf16.mxu0 %v5182_v7  ;;  %v5188_v7 = vpack.c.bf16 %v2021_v46, %v2015_v63  ;;  %v5150_v22 = vpack.c.bf16 %v2680_v39, %v2674_v31  ;;  %v2686_v63 = vld [vmem:[#allocation8 + $0x15d8] sm:$0xff]  ;;  %v2692_v46 = vld [vmem:[#allocation8 + $0x1608] sm:$0xff]  ;;  %v2685_v57 = vld [vmem:[#allocation8 + $0x15d0] sm:$0xff] }
 0x33b   :  { %v1976_v5 = vpop.f32.mrb[20].mxu1  ;;  %3124 = vmatprep.mubr.f32.mxu0 %v6250_v30  ;;  %5143 = vmatprep.subr.bf16.mxu1 %v5142_v21  ;;  %v2033_v21 = vld [vmem:[#allocation8 + $0x170] sm:$0xff]  ;;  %v2691_v31 = vld [vmem:[#allocation8 + $0x1600] sm:$0xff]  ;;  %v2052_v39 = vld [vmem:[#allocation8 + $0x208] sm:$0xff] }
 0x33c   :  { %v1978_v58 = vpop.f32.mrb[21].mxu1  ;;  %3125 = vmatmul.mubr.f32.gmra.mrb[18].mxu0 %v6253_v41  ;;  %v6261_v61 = vadd.f32 %v1976_v5, %v6238_v33  ;;  %v5152_v5 = vpack.c.bf16 %v2679_v37, %v2673_v24  ;;  %v2057_v24 = vld [vmem:[#allocation8 + $0x230] sm:$0xff]  ;;  %v2703_v37 = vld [vmem:[#allocation8 + $0x1660] sm:$0xff] }
 0x33d   :  { %v6258_v15 = vadd.f32 %v1978_v58, %v6236_v47  ;;  %5185 = vmatpush1.bf16.msra.mxu0 %v5184_v52  ;;  %v5154_v58 = vpack.c.bf16 %v2692_v46, %v2686_v63  ;;  %v2716_v63 = vld [vmem:[#allocation8 + $0x16c8] sm:$0xff] }
 0x33e   :  { %5145 = vmatpush1.bf16.msra.mxu1 %v5144_v60  ;;  %5187 = vmatprep.subr.bf16.mxu0 %v5186_v11  ;;  %v5192_v11 = vpack.c.bf16 %v2033_v21, %v2027_v18  ;;  %v2704_v18 = vld [vmem:[#allocation8 + $0x1668] sm:$0xff]  ;;  %v2051_v21 = vld [vmem:[#allocation8 + $0x200] sm:$0xff] }
 0x33f   :  { %v1982_v0 = vpop.f32.mrb[22].mxu1  ;;  %3130 = vmatprep.mubr.f32.mxu0 %v6258_v15  ;;  %5147 = vmatprep.subr.bf16.mxu1 %v5146_v50  ;;  %v5194_v50 = vpack.c.bf16 %v2046_v29, %v2040_v27  ;;  %v2064_v27 = vld [vmem:[#allocation8 + $0x268] sm:$0xff]  ;;  %v2070_v29 = vld [vmem:[#allocation8 + $0x298] sm:$0xff]  ;;  %v5200_v46 = vpack.c.bf16 %v2057_v24, %v2051_v21  ;;  %v2721_v21 = vld [vmem:[#allocation8 + $0x16f0] sm:$0xff] }
 0x340   :  { %v1984_v52 = vpop.f32.mrb[23].mxu1  ;;  %3131 = vmatmul.mubr.f32.gmra.mrb[20].mxu0 %v6261_v61  ;;  %v6269_v25 = vadd.f32 %v1982_v0, %v6238_v33  ;;  %v5196_v33 = vpack.c.bf16 %v2045_v53, %v2039_v28  ;;  %v2697_v0 = vld [vmem:[#allocation8 + $0x1630] sm:$0xff] }
 0x341   :  { %v6266_v60 = vadd.f32 %v1984_v52, %v6236_v47  ;;  %5189 = vmatpush1.bf16.msra.mxu0 %v5188_v7  ;;  %v2058_v47 = vld [vmem:[#allocation8 + $0x238] sm:$0xff]  ;;  %v2709_v28 = vld [vmem:[#allocation8 + $0x1690] sm:$0xff] }
 0x342   :  { %5149 = vmatpush1.bf16.msra.mxu1 %v5148_v59  ;;  %5191 = vmatprep.subr.bf16.mxu0 %v5190_v48  ;;  %v2698_v7 = vld [vmem:[#allocation8 + $0x1638] sm:$0xff]  ;;  %v5156_v59 = vpack.c.bf16 %v2691_v31, %v2685_v57  ;;  %v5198_v48 = vpack.c.bf16 %v2058_v47, %v2052_v39  ;;  %v2715_v57 = vld [vmem:[#allocation8 + $0x16c0] sm:$0xff]  ;;  %v2076_v31 = vld [vmem:[#allocation8 + $0x2c8] sm:$0xff] }
 0x343   :  { %3136 = vmatprep.mubr.f32.mxu0 %v6266_v60  ;;  %5151 = vmatprep.subr.bf16.mxu1 %v5150_v22  ;;  %v5158_v22 = vpack.c.bf16 %v2704_v18, %v2698_v7  ;;  %v2710_v52 = vld [vmem:[#allocation8 + $0x1698] sm:$0xff]  ;;  %v2728_v47 = vld [vmem:[#allocation8 + $0x1728] sm:$0xff]  ;;  %v5164_v18 = vpack.c.bf16 %v2715_v57, %v2709_v28  ;;  %v2739_v28 = vld [vmem:[#allocation8 + $0x1780] sm:$0xff] }
 0x344   :  { %3137 = vmatmul.mubr.f32.gmra.mrb[22].mxu0 %v6269_v25  ;;  %v5162_v53 = vpack.c.bf16 %v2716_v63, %v2710_v52  ;;  %v2722_v39 = vld [vmem:[#allocation8 + $0x16f8] sm:$0xff]  ;;  %v2100_v57 = vld [vmem:[#allocation8 + $0x388] sm:$0xff] }
 0x345   :  { %5193 = vmatpush1.bf16.msra.mxu0 %v5192_v11  ;;  %3563 = vmatprep.mubr.f32.mxu0 %v6062_v19  ;;  %v5160_v19 = vpack.c.bf16 %v2703_v37, %v2697_v0  ;;  %v5202_v11 = vpack.c.bf16 %v2070_v29, %v2064_v27  ;;  %v5166_v24 = vpack.c.bf16 %v2728_v47, %v2722_v39  ;;  %v2727_v0 = vld [vmem:[#allocation8 + $0x1720] sm:$0xff]  ;;  %v2088_v37 = vld [vmem:[#allocation8 + $0x328] sm:$0xff]  ;;  %v2734_v27 = vld [vmem:[#allocation8 + $0x1758] sm:$0xff] }
 0x346   :  { %5153 = vmatpush1.bf16.msra.mxu1 %v5152_v5  ;;  %5195 = vmatprep.subr.bf16.mxu0 %v5194_v50  ;;  %v2063_v5 = vld [vmem:[#allocation8 + $0x260] sm:$0xff]  ;;  %v2069_v50 = vld [vmem:[#allocation8 + $0x290] sm:$0xff]  ;;  %v2740_v29 = vld [vmem:[#allocation8 + $0x1788] sm:$0xff]  ;;  %v5168_v63 = vpack.c.bf16 %v2727_v0, %v2721_v21 }
 0x347   :  { %5155 = vmatprep.subr.bf16.mxu1 %v5154_v58  ;;  %v2082_v58 = vld [vmem:[#allocation8 + $0x2f8] sm:$0xff]  ;;  %v5204_v7 = vpack.c.bf16 %v2069_v50, %v2063_v5  ;;  %v2733_v5 = vld [vmem:[#allocation8 + $0x1750] sm:$0xff]  ;;  %v5170_v50 = vpack.c.bf16 %v2740_v29, %v2734_v27  ;;  %v2751_v21 = vld [vmem:[#allocation8 + $0x17e0] sm:$0xff] }
 0x348   :  { %v5172_v47 = vpack.c.bf16 %v2739_v28, %v2733_v5  ;;  %v2112_v0 = vld [vmem:[#allocation8 + $0x3e8] sm:$0xff]  ;;  %v2111_v29 = vld [vmem:[#allocation8 + $0x3e0] sm:$0xff] }
 0x349   :  { %5197 = vmatpush1.bf16.msra.mxu0 %v5196_v33  ;;  %v5206_v33 = vpack.c.bf16 %v2082_v58, %v2076_v31  ;;  %v2746_v31 = vld [vmem:[#allocation8 + $0x17b8] sm:$0xff]  ;;  %v2752_v58 = vld [vmem:[#allocation8 + $0x17e8] sm:$0xff]  ;;  %v2123_v5 = vld [vmem:[#allocation8 + $0x440] sm:$0xff] }
 0x34a   :  { %5157 = vmatpush1.bf16.msra.mxu1 %v5156_v59  ;;  %5199 = vmatprep.subr.bf16.mxu0 %v5198_v48  ;;  %v2075_v59 = vld [vmem:[#allocation8 + $0x2c0] sm:$0xff]  ;;  %v2081_v48 = vld [vmem:[#allocation8 + $0x2f0] sm:$0xff]  ;;  %v2136_v28 = vld [vmem:[#allocation8 + $0x4a8] sm:$0xff] }
 0x34b   :  { %5159 = vmatprep.subr.bf16.mxu1 %v5158_v22  ;;  %v2094_v22 = vld [vmem:[#allocation8 + $0x358] sm:$0xff]  ;;  %v5208_v52 = vpack.c.bf16 %v2081_v48, %v2075_v59  ;;  %v2745_v59 = vld [vmem:[#allocation8 + $0x17b0] sm:$0xff]  ;;  %v5174_v48 = vpack.c.bf16 %v2752_v58, %v2746_v31  ;;  %v2135_v58 = vld [vmem:[#allocation8 + $0x4a0] sm:$0xff] }
 0x34d   :  { %5201 = vmatpush1.bf16.msra.mxu0 %v5200_v46  ;;  %v5210_v46 = vpack.c.bf16 %v2094_v22, %v2088_v37  ;;  %v5176_v22 = vpack.c.bf16 %v2751_v21, %v2745_v59  ;;  %v2147_v59 = vld [vmem:[#allocation8 + $0x500] sm:$0xff]  ;;  %v2160_v21 = vld [vmem:[#allocation8 + $0x568] sm:$0xff] }
 0x34e   :  { %5161 = vmatpush1.bf16.msra.mxu1 %v5160_v19  ;;  %5203 = vmatprep.subr.bf16.mxu0 %v5202_v11  ;;  %v2087_v19 = vld [vmem:[#allocation8 + $0x320] sm:$0xff]  ;;  %v2093_v11 = vld [vmem:[#allocation8 + $0x350] sm:$0xff] }
 0x34f   :  { %5163 = vmatprep.subr.bf16.mxu1 %v5162_v53  ;;  %v2106_v53 = vld [vmem:[#allocation8 + $0x3b8] sm:$0xff]  ;;  %v5212_v39 = vpack.c.bf16 %v2093_v11, %v2087_v19 }
 0x351   :  { %5205 = vmatpush1.bf16.msra.mxu0 %v5204_v7  ;;  %v5214_v7 = vpack.c.bf16 %v2106_v53, %v2100_v57  ;;  %v2142_v57 = vld [vmem:[#allocation8 + $0x4d8] sm:$0xff] }
 0x352   :  { %5165 = vmatpush1.bf16.msra.mxu1 %v5164_v18  ;;  %5207 = vmatprep.subr.bf16.mxu0 %v5206_v33  ;;  %v2099_v18 = vld [vmem:[#allocation8 + $0x380] sm:$0xff]  ;;  %v2105_v33 = vld [vmem:[#allocation8 + $0x3b0] sm:$0xff]  ;;  %v5226_v31 = vpack.c.bf16 %v2142_v57, %v2136_v28 }
 0x353   :  { %5167 = vmatprep.subr.bf16.mxu1 %v5166_v24  ;;  %v2118_v24 = vld [vmem:[#allocation8 + $0x418] sm:$0xff]  ;;  %v5216_v37 = vpack.c.bf16 %v2105_v33, %v2099_v18 }
 0x354   :  { %v5218_v27 = vpack.c.bf16 %v2118_v24, %v2112_v0  ;;  %v2166_v0 = vld [vmem:[#allocation8 + $0x598] sm:$0xff] }
 0x355   :  { %5209 = vmatpush1.bf16.msra.mxu0 %v5208_v52  ;;  %v2117_v52 = vld [vmem:[#allocation8 + $0x410] sm:$0xff] }
 0x356   :  { %5169 = vmatpush1.bf16.msra.mxu1 %v5168_v63  ;;  %5211 = vmatprep.subr.bf16.mxu0 %v5210_v46  ;;  %v2124_v63 = vld [vmem:[#allocation8 + $0x448] sm:$0xff]  ;;  %v2130_v46 = vld [vmem:[#allocation8 + $0x478] sm:$0xff]  ;;  %v5220_v19 = vpack.c.bf16 %v2117_v52, %v2111_v29 }
 0x357   :  { %5171 = vmatprep.subr.bf16.mxu1 %v5170_v50  ;;  %v5222_v11 = vpack.c.bf16 %v2130_v46, %v2124_v63  ;;  %v2129_v50 = vld [vmem:[#allocation8 + $0x470] sm:$0xff]  ;;  %v2172_v29 = vld [vmem:[#allocation8 + $0x5c8] sm:$0xff]  ;;  %v2178_v52 = vld [vmem:[#allocation8 + $0x5f8] sm:$0xff] }
 0x358   :  { %v5224_v53 = vpack.c.bf16 %v2129_v50, %v2123_v5  ;;  %v5238_v46 = vpack.c.bf16 %v2178_v52, %v2172_v29  ;;  %v2184_v5 = vld [vmem:[#allocation8 + $0x628] sm:$0xff]  ;;  %v2190_v50 = vld [vmem:[#allocation8 + $0x658] sm:$0xff] }
 0x359   :  { %5213 = vmatpush1.bf16.msra.mxu0 %v5212_v39  ;;  %v2141_v39 = vld [vmem:[#allocation8 + $0x4d0] sm:$0xff]  ;;  %v5242_v57 = vpack.c.bf16 %v2190_v50, %v2184_v5  ;;  %v2231_v5 = vld [vmem:[#allocation8 + $0x7a0] sm:$0xff]  ;;  %v2244_v50 = vld [vmem:[#allocation8 + $0x808] sm:$0xff] }
 0x35a   :  { %5173 = vmatpush1.bf16.msra.mxu1 %v5172_v47  ;;  %5215 = vmatprep.subr.bf16.mxu0 %v5214_v7  ;;  %v2148_v47 = vld [vmem:[#allocation8 + $0x508] sm:$0xff]  ;;  %v2154_v7 = vld [vmem:[#allocation8 + $0x538] sm:$0xff]  ;;  %v5228_v18 = vpack.c.bf16 %v2141_v39, %v2135_v58 }
 0x35b   :  { %5175 = vmatprep.subr.bf16.mxu1 %v5174_v48  ;;  %v5230_v33 = vpack.c.bf16 %v2154_v7, %v2148_v47  ;;  %v2153_v48 = vld [vmem:[#allocation8 + $0x530] sm:$0xff]  ;;  %v2196_v58 = vld [vmem:[#allocation8 + $0x688] sm:$0xff]  ;;  %v2202_v39 = vld [vmem:[#allocation8 + $0x6b8] sm:$0xff] }
 0x35c   :  { %v5232_v24 = vpack.c.bf16 %v2153_v48, %v2147_v59  ;;  %v5246_v7 = vpack.c.bf16 %v2202_v39, %v2196_v58  ;;  %v2208_v59 = vld [vmem:[#allocation8 + $0x6e8] sm:$0xff]  ;;  %v2214_v48 = vld [vmem:[#allocation8 + $0x718] sm:$0xff] }
 0x35d   :  { %5217 = vmatpush1.bf16.msra.mxu0 %v5216_v37  ;;  %v5234_v37 = vpack.c.bf16 %v2166_v0, %v2160_v21  ;;  %v5250_v0 = vpack.c.bf16 %v2214_v48, %v2208_v59  ;;  %v2273_v48 = vld [vmem:[#allocation8 + $0x8f0] sm:$0xff] }
 0x35e   :  { %5177 = vmatpush1.bf16.msra.mxu1 %v5176_v22  ;;  %5219 = vmatprep.subr.bf16.mxu0 %v5218_v27  ;;  %v2159_v22 = vld [vmem:[#allocation8 + $0x560] sm:$0xff]  ;;  %v2165_v27 = vld [vmem:[#allocation8 + $0x590] sm:$0xff] }
 0x35f   :  { %v5236_v63 = vpack.c.bf16 %v2165_v27, %v2159_v22  ;;  %v2220_v22 = vld [vmem:[#allocation8 + $0x748] sm:$0xff]  ;;  %v2226_v27 = vld [vmem:[#allocation8 + $0x778] sm:$0xff] }
 0x360   :  { %v5254_v52 = vpack.c.bf16 %v2226_v27, %v2220_v22  ;;  %v2279_v22 = vld [vmem:[#allocation8 + $0x920] sm:$0xff]  ;;  %v2285_v27 = vld [vmem:[#allocation8 + $0x950] sm:$0xff] }
 0x361   :  { %3475 = vmatmul.mubr.f32.vlgmr.msra.gmra.mrb[24].mxu1 %v6244_v6  ;;  %5221 = vmatpush1.bf16.msra.mxu0 %v5220_v19  ;;  %v2171_v19 = vld [vmem:[#allocation8 + $0x5c0] sm:$0xff] }
 0x362   :  { %3480 = vmatprep.mubr.f32.mxu1 %v6250_v30  ;;  %5223 = vmatprep.subr.bf16.mxu0 %v5222_v11  ;;  %v2177_v11 = vld [vmem:[#allocation8 + $0x5f0] sm:$0xff] }
 0x363   :  { %v5240_v28 = vpack.c.bf16 %v2177_v11, %v2171_v19 }
 0x365   :  { %3481 = vmatmul.mubr.f32.gmra.mrb[26].mxu1 %v6253_v41  ;;  %5225 = vmatpush1.bf16.msra.mxu0 %v5224_v53  ;;  %v2183_v53 = vld [vmem:[#allocation8 + $0x620] sm:$0xff] }
 0x366   :  { %3486 = vmatprep.mubr.f32.mxu1 %v6258_v15  ;;  %5227 = vmatprep.subr.bf16.mxu0 %v5226_v31  ;;  %v2189_v31 = vld [vmem:[#allocation8 + $0x650] sm:$0xff] }
 0x367   :  { %v5244_v47 = vpack.c.bf16 %v2189_v31, %v2183_v53  ;;  %v2243_v53 = vld [vmem:[#allocation8 + $0x800] sm:$0xff]  ;;  %v2256_v31 = vld [vmem:[#allocation8 + $0x868] sm:$0xff] }
 0x369   :  { %3487 = vmatmul.mubr.f32.gmra.mrb[28].mxu1 %v6261_v61  ;;  %5229 = vmatpush1.bf16.msra.mxu0 %v5228_v18  ;;  %v2195_v18 = vld [vmem:[#allocation8 + $0x680] sm:$0xff] }
 0x36a   :  { %3492 = vmatprep.mubr.f32.mxu1 %v6266_v60  ;;  %5231 = vmatprep.subr.bf16.mxu0 %v5230_v33  ;;  %v2201_v33 = vld [vmem:[#allocation8 + $0x6b0] sm:$0xff] }
 0x36b   :  { %v5248_v21 = vpack.c.bf16 %v2201_v33, %v2195_v18  ;;  %v2268_v18 = vld [vmem:[#allocation8 + $0x8c8] sm:$0xff]  ;;  %v2274_v33 = vld [vmem:[#allocation8 + $0x8f8] sm:$0xff] }
 0x36c   :  { %v5270_v59 = vpack.c.bf16 %v2274_v33, %v2268_v18  ;;  %v2327_v18 = vld [vmem:[#allocation8 + $0xaa0] sm:$0xff]  ;;  %v2333_v33 = vld [vmem:[#allocation8 + $0xad0] sm:$0xff] }
 0x36d   :  { %3493 = vmatmul.mubr.f32.gmra.mrb[30].mxu1 %v6269_v25  ;;  %5233 = vmatpush1.bf16.msra.mxu0 %v5232_v24  ;;  %v2207_v24 = vld [vmem:[#allocation8 + $0x6e0] sm:$0xff] }
 0x36e   :  { %5235 = vmatprep.subr.bf16.mxu0 %v5234_v37  ;;  %v2213_v37 = vld [vmem:[#allocation8 + $0x710] sm:$0xff] }
 0x36f   :  { %v5252_v29 = vpack.c.bf16 %v2213_v37, %v2207_v24 }
 0x371   :  { %5237 = vmatpush1.bf16.msra.mxu0 %v5236_v63  ;;  %v2219_v63 = vld [vmem:[#allocation8 + $0x740] sm:$0xff] }
 0x372   :  { %5239 = vmatprep.subr.bf16.mxu0 %v5238_v46  ;;  %v2232_v46 = vld [vmem:[#allocation8 + $0x7a8] sm:$0xff] }
 0x375   :  { %5241 = vmatpush1.bf16.msra.mxu0 %v5240_v28 }
 0x376   :  { %5243 = vmatprep.subr.bf16.mxu0 %v5242_v57 }
 0x378   :  { %3564 = vmatmul.mubr.f32.vlgmr.msra.gmra.mrb[24].mxu0 %v6059_v13  ;;  %v2225_v13 = vld [vmem:[#allocation8 + $0x770] sm:$0xff] }
 0x379   :  { %3569 = vmatprep.mubr.f32.mxu0 %v6072_v35  ;;  %5245 = vmatpush1.bf16.msra.mxu0 %v5244_v47  ;;  %v2238_v35 = vld [vmem:[#allocation8 + $0x7d8] sm:$0xff]  ;;  %v5256_v19 = vpack.c.bf16 %v2225_v13, %v2219_v63  ;;  %v2255_v47 = vld [vmem:[#allocation8 + $0x860] sm:$0xff]  ;;  %v5276_v63 = vpack.c.bf16 %v2285_v27, %v2279_v22 }
 0x37a   :  { %5247 = vmatprep.subr.bf16.mxu0 %v5246_v7  ;;  %v5258_v11 = vpack.c.bf16 %v2238_v35, %v2232_v46  ;;  %v2261_v7 = vld [vmem:[#allocation8 + $0x890] sm:$0xff]  ;;  %v2291_v46 = vld [vmem:[#allocation8 + $0x980] sm:$0xff] }
 0x37b   :  { %v2297_v35 = vld [vmem:[#allocation8 + $0x9b0] sm:$0xff] }
 0x37c   :  { %3570 = vmatmul.mubr.f32.gmra.mrb[26].mxu0 %v6068_v16  ;;  %v2237_v16 = vld [vmem:[#allocation8 + $0x7d0] sm:$0xff] }
 0x37d   :  { %3575 = vmatprep.mubr.f32.mxu0 %v6082_v44  ;;  %5249 = vmatpush1.bf16.msra.mxu0 %v5248_v21  ;;  %v2250_v44 = vld [vmem:[#allocation8 + $0x838] sm:$0xff]  ;;  %v5260_v28 = vpack.c.bf16 %v2237_v16, %v2231_v5  ;;  %v2280_v21 = vld [vmem:[#allocation8 + $0x928] sm:$0xff]  ;;  %v5280_v5 = vpack.c.bf16 %v2297_v35, %v2291_v46 }
 0x37e   :  { %5251 = vmatprep.subr.bf16.mxu0 %v5250_v0  ;;  %v5262_v57 = vpack.c.bf16 %v2250_v44, %v2244_v50  ;;  %v2286_v0 = vld [vmem:[#allocation8 + $0x958] sm:$0xff]  ;;  %v2303_v50 = vld [vmem:[#allocation8 + $0x9e0] sm:$0xff]  ;;  %v2309_v44 = vld [vmem:[#allocation8 + $0xa10] sm:$0xff] }
 0x37f   :  { %v5274_v37 = vpack.c.bf16 %v2286_v0, %v2280_v21  ;;  %v2339_v21 = vld [vmem:[#allocation8 + $0xb00] sm:$0xff]  ;;  %v2345_v0 = vld [vmem:[#allocation8 + $0xb30] sm:$0xff] }
 0x380   :  { %3576 = vmatmul.mubr.f32.gmra.mrb[28].mxu0 %v6078_v51  ;;  %v2249_v51 = vld [vmem:[#allocation8 + $0x830] sm:$0xff]  ;;  %v5296_v22 = vpack.c.bf16 %v2345_v0, %v2339_v21 }
 0x381   :  { %3581 = vmatprep.mubr.f32.mxu0 %v6092_v49  ;;  %5253 = vmatpush1.bf16.msra.mxu0 %v5252_v29  ;;  %v2262_v49 = vld [vmem:[#allocation8 + $0x898] sm:$0xff]  ;;  %v5264_v58 = vpack.c.bf16 %v2249_v51, %v2243_v53  ;;  %v2292_v29 = vld [vmem:[#allocation8 + $0x988] sm:$0xff]  ;;  %v5284_v53 = vpack.c.bf16 %v2309_v44, %v2303_v50 }
 0x382   :  { %5255 = vmatprep.subr.bf16.mxu0 %v5254_v52  ;;  %v5266_v39 = vpack.c.bf16 %v2262_v49, %v2256_v31  ;;  %v2298_v52 = vld [vmem:[#allocation8 + $0x9b8] sm:$0xff]  ;;  %v2315_v31 = vld [vmem:[#allocation8 + $0xa40] sm:$0xff]  ;;  %v2321_v49 = vld [vmem:[#allocation8 + $0xa70] sm:$0xff] }
 0x383   :  { %v5278_v13 = vpack.c.bf16 %v2298_v52, %v2292_v29  ;;  %v2351_v29 = vld [vmem:[#allocation8 + $0xb60] sm:$0xff]  ;;  %v2357_v52 = vld [vmem:[#allocation8 + $0xb90] sm:$0xff] }
 0x384   :  { %3582 = vmatmul.mubr.f32.gmra.mrb[30].mxu0 %v6088_v9  ;;  %v5268_v9 = vpack.c.bf16 %v2261_v7, %v2255_v47  ;;  %v5288_v47 = vpack.c.bf16 %v2321_v49, %v2315_v31  ;;  %v5300_v46 = vpack.c.bf16 %v2357_v52, %v2351_v29  ;;  %v2423_v29 = vld [vmem:[#allocation8 + $0xda0] sm:$0xff]  ;;  %v2436_v52 = vld [vmem:[#allocation8 + $0xe08] sm:$0xff] }
 0x385   :  { %5257 = vmatpush1.bf16.msra.mxu0 %v5256_v19  ;;  %3652 = vmatprep.mubr.f32.mxu0 %v6128_v40  ;;  %v2267_v40 = vld [vmem:[#allocation8 + $0x8c0] sm:$0xff]  ;;  %v2304_v19 = vld [vmem:[#allocation8 + $0x9e8] sm:$0xff] }
 0x386   :  { %5259 = vmatprep.subr.bf16.mxu0 %v5258_v11  ;;  %v5272_v24 = vpack.c.bf16 %v2273_v48, %v2267_v40  ;;  %v2310_v11 = vld [vmem:[#allocation8 + $0xa18] sm:$0xff]  ;;  %v5292_v40 = vpack.c.bf16 %v2333_v33, %v2327_v18 }
 0x387   :  { %v5282_v16 = vpack.c.bf16 %v2310_v11, %v2304_v19  ;;  %v2363_v19 = vld [vmem:[#allocation8 + $0xbc0] sm:$0xff]  ;;  %v2369_v11 = vld [vmem:[#allocation8 + $0xbf0] sm:$0xff] }
 0x388   :  { %v5304_v50 = vpack.c.bf16 %v2369_v11, %v2363_v19 }
 0x389   :  { %5261 = vmatpush1.bf16.msra.mxu0 %v5260_v28  ;;  %v2316_v28 = vld [vmem:[#allocation8 + $0xa48] sm:$0xff] }
 0x38a   :  { %5263 = vmatprep.subr.bf16.mxu0 %v5262_v57  ;;  %v2322_v57 = vld [vmem:[#allocation8 + $0xa78] sm:$0xff] }
 0x38b   :  { %v5286_v51 = vpack.c.bf16 %v2322_v57, %v2316_v28  ;;  %v2375_v28 = vld [vmem:[#allocation8 + $0xc20] sm:$0xff]  ;;  %v2381_v57 = vld [vmem:[#allocation8 + $0xc50] sm:$0xff] }
 0x38c   :  { %v5308_v31 = vpack.c.bf16 %v2381_v57, %v2375_v28  ;;  %v2465_v57 = vld [vmem:[#allocation8 + $0xef0] sm:$0xff] }
 0x38d   :  { %5265 = vmatpush1.bf16.msra.mxu0 %v5264_v58  ;;  %v2328_v58 = vld [vmem:[#allocation8 + $0xaa8] sm:$0xff] }
 0x38e   :  { %5267 = vmatprep.subr.bf16.mxu0 %v5266_v39  ;;  %v2334_v39 = vld [vmem:[#allocation8 + $0xad8] sm:$0xff] }
 0x38f   :  { %v5290_v7 = vpack.c.bf16 %v2334_v39, %v2328_v58  ;;  %v2387_v58 = vld [vmem:[#allocation8 + $0xc80] sm:$0xff]  ;;  %v2393_v39 = vld [vmem:[#allocation8 + $0xcb0] sm:$0xff] }
 0x390   :  { %v5312_v18 = vpack.c.bf16 %v2393_v39, %v2387_v58  ;;  %v2471_v58 = vld [vmem:[#allocation8 + $0xf20] sm:$0xff]  ;;  %v2477_v39 = vld [vmem:[#allocation8 + $0xf50] sm:$0xff] }
 0x391   :  { %5269 = vmatpush1.bf16.msra.mxu0 %v5268_v9  ;;  %v2340_v9 = vld [vmem:[#allocation8 + $0xb08] sm:$0xff] }
 0x392   :  { %5271 = vmatprep.subr.bf16.mxu0 %v5270_v59  ;;  %v2346_v59 = vld [vmem:[#allocation8 + $0xb38] sm:$0xff] }
 0x393   :  { %v5294_v48 = vpack.c.bf16 %v2346_v59, %v2340_v9  ;;  %v2399_v9 = vld [vmem:[#allocation8 + $0xce0] sm:$0xff]  ;;  %v2405_v59 = vld [vmem:[#allocation8 + $0xd10] sm:$0xff] }
 0x394   :  { %v5316_v21 = vpack.c.bf16 %v2405_v59, %v2399_v9  ;;  %v2483_v9 = vld [vmem:[#allocation8 + $0xf80] sm:$0xff]  ;;  %v2489_v59 = vld [vmem:[#allocation8 + $0xfb0] sm:$0xff] }
 0x395   :  { %5273 = vmatpush1.bf16.msra.mxu0 %v5272_v24  ;;  %v2352_v24 = vld [vmem:[#allocation8 + $0xb68] sm:$0xff] }
 0x396   :  { %5275 = vmatprep.subr.bf16.mxu0 %v5274_v37  ;;  %v2358_v37 = vld [vmem:[#allocation8 + $0xb98] sm:$0xff] }
 0x397   :  { %v5298_v27 = vpack.c.bf16 %v2358_v37, %v2352_v24  ;;  %v2411_v24 = vld [vmem:[#allocation8 + $0xd40] sm:$0xff]  ;;  %v2424_v37 = vld [vmem:[#allocation8 + $0xda8] sm:$0xff] }
 0x399   :  { %5277 = vmatpush1.bf16.msra.mxu0 %v5276_v63  ;;  %v2364_v63 = vld [vmem:[#allocation8 + $0xbc8] sm:$0xff] }
 0x39a   :  { %5279 = vmatprep.subr.bf16.mxu0 %v5278_v13  ;;  %v2370_v13 = vld [vmem:[#allocation8 + $0xbf8] sm:$0xff] }
 0x39b   :  { %v5302_v35 = vpack.c.bf16 %v2370_v13, %v2364_v63 }
 0x39d   :  { %5281 = vmatpush1.bf16.msra.mxu0 %v5280_v5  ;;  %v2376_v5 = vld [vmem:[#allocation8 + $0xc28] sm:$0xff] }
 0x39e   :  { %5283 = vmatprep.subr.bf16.mxu0 %v5282_v16  ;;  %v2382_v16 = vld [vmem:[#allocation8 + $0xc58] sm:$0xff] }
 0x39f   :  { %v5306_v44 = vpack.c.bf16 %v2382_v16, %v2376_v5  ;;  %v2447_v5 = vld [vmem:[#allocation8 + $0xe60] sm:$0xff]  ;;  %v2453_v16 = vld [vmem:[#allocation8 + $0xe90] sm:$0xff] }
 0x3a1   :  { %5285 = vmatpush1.bf16.msra.mxu0 %v5284_v53  ;;  %v2388_v53 = vld [vmem:[#allocation8 + $0xc88] sm:$0xff] }
 0x3a2   :  { %5287 = vmatprep.subr.bf16.mxu0 %v5286_v51  ;;  %v2394_v51 = vld [vmem:[#allocation8 + $0xcb8] sm:$0xff] }
 0x3a3   :  { %v5310_v49 = vpack.c.bf16 %v2394_v51, %v2388_v53  ;;  %v2472_v53 = vld [vmem:[#allocation8 + $0xf28] sm:$0xff]  ;;  %v2478_v51 = vld [vmem:[#allocation8 + $0xf58] sm:$0xff] }
 0x3a5   :  { %5289 = vmatpush1.bf16.msra.mxu0 %v5288_v47  ;;  %v2400_v47 = vld [vmem:[#allocation8 + $0xce8] sm:$0xff] }
 0x3a6   :  { %5291 = vmatprep.subr.bf16.mxu0 %v5290_v7  ;;  %v2406_v7 = vld [vmem:[#allocation8 + $0xd18] sm:$0xff] }
 0x3a7   :  { %v5314_v33 = vpack.c.bf16 %v2406_v7, %v2400_v47  ;;  %v2484_v47 = vld [vmem:[#allocation8 + $0xf88] sm:$0xff]  ;;  %v2490_v7 = vld [vmem:[#allocation8 + $0xfb8] sm:$0xff] }
 0x3a9   :  { %5293 = vmatpush1.bf16.msra.mxu0 %v5292_v40  ;;  %v2412_v40 = vld [vmem:[#allocation8 + $0xd48] sm:$0xff] }
 0x3aa   :  { %5295 = vmatprep.subr.bf16.mxu0 %v5294_v48  ;;  %v2418_v48 = vld [vmem:[#allocation8 + $0xd78] sm:$0xff] }
 0x3ab   :  { %v5318_v0 = vpack.c.bf16 %v2418_v48, %v2412_v40  ;;  %v2496_v40 = vld [vmem:[#allocation8 + $0xfe8] sm:$0xff]  ;;  %v2502_v48 = vld [vmem:[#allocation8 + $0x1018] sm:$0xff] }
 0x3ad   :  { %5297 = vmatpush1.bf16.msra.mxu0 %v5296_v22 }
 0x3ae   :  { %5299 = vmatprep.subr.bf16.mxu0 %v5298_v27 }
 0x3b1   :  { %5301 = vmatpush1.bf16.msra.mxu0 %v5300_v46  ;;  %v2435_v46 = vld [vmem:[#allocation8 + $0xe00] sm:$0xff] }
 0x3b2   :  { %5303 = vmatprep.subr.bf16.mxu0 %v5302_v35  ;;  %v2448_v35 = vld [vmem:[#allocation8 + $0xe68] sm:$0xff] }
 0x3b5   :  { %5305 = vmatpush1.bf16.msra.mxu0 %v5304_v50  ;;  %v2460_v50 = vld [vmem:[#allocation8 + $0xec8] sm:$0xff] }
 0x3b6   :  { %5307 = vmatprep.subr.bf16.mxu0 %v5306_v44  ;;  %v2466_v44 = vld [vmem:[#allocation8 + $0xef8] sm:$0xff] }
 0x3b7   :  { %v5334_v28 = vpack.c.bf16 %v2466_v44, %v2460_v50  ;;  %v2544_v50 = vld [vmem:[#allocation8 + $0x1168] sm:$0xff]  ;;  %v2550_v44 = vld [vmem:[#allocation8 + $0x1198] sm:$0xff] }
 0x3b8   :  { %3653 = vmatmul.mubr.f32.vlgmr.msra.gmra.mrb[24].mxu0 %v6131_v56  ;;  %v2417_v56 = vld [vmem:[#allocation8 + $0xd70] sm:$0xff] }
 0x3b9   :  { %3658 = vmatprep.mubr.f32.mxu0 %v6136_v4  ;;  %5309 = vmatpush1.bf16.msra.mxu0 %v5308_v31  ;;  %v2430_v4 = vld [vmem:[#allocation8 + $0xdd8] sm:$0xff]  ;;  %v5320_v22 = vpack.c.bf16 %v2417_v56, %v2411_v24  ;;  %v2495_v24 = vld [vmem:[#allocation8 + $0xfe0] sm:$0xff]  ;;  %v2501_v56 = vld [vmem:[#allocation8 + $0x1010] sm:$0xff] }
 0x3ba   :  { %5311 = vmatprep.subr.bf16.mxu0 %v5310_v49  ;;  %v5322_v27 = vpack.c.bf16 %v2430_v4, %v2424_v37  ;;  %v5338_v49 = vpack.c.bf16 %v2478_v51, %v2472_v53  ;;  %v2508_v37 = vld [vmem:[#allocation8 + $0x1048] sm:$0xff]  ;;  %v2514_v4 = vld [vmem:[#allocation8 + $0x1078] sm:$0xff] }
 0x3bb   :  { %v2556_v53 = vld [vmem:[#allocation8 + $0x11c8] sm:$0xff]  ;;  %v2562_v51 = vld [vmem:[#allocation8 + $0x11f8] sm:$0xff] }
 0x3bc   :  { %3659 = vmatmul.mubr.f32.gmra.mrb[26].mxu0 %v6139_v54  ;;  %v2429_v54 = vld [vmem:[#allocation8 + $0xdd0] sm:$0xff] }
 0x3bd   :  { %3664 = vmatprep.mubr.f32.mxu0 %v6145_v43  ;;  %5313 = vmatpush1.bf16.msra.mxu0 %v5312_v18  ;;  %v2442_v43 = vld [vmem:[#allocation8 + $0xe38] sm:$0xff]  ;;  %v5324_v63 = vpack.c.bf16 %v2429_v54, %v2423_v29  ;;  %v5340_v18 = vpack.c.bf16 %v2477_v39, %v2471_v58  ;;  %v2507_v29 = vld [vmem:[#allocation8 + $0x1040] sm:$0xff]  ;;  %v2513_v54 = vld [vmem:[#allocation8 + $0x1070] sm:$0xff] }
 0x3be   :  { %5315 = vmatprep.subr.bf16.mxu0 %v5314_v33  ;;  %v5326_v13 = vpack.c.bf16 %v2442_v43, %v2436_v52  ;;  %v5342_v33 = vpack.c.bf16 %v2490_v7, %v2484_v47  ;;  %v2520_v52 = vld [vmem:[#allocation8 + $0x10a8] sm:$0xff]  ;;  %v2526_v43 = vld [vmem:[#allocation8 + $0x10d8] sm:$0xff]  ;;  %v2555_v58 = vld [vmem:[#allocation8 + $0x11c0] sm:$0xff] }
 0x3bf   :  { %v2561_v39 = vld [vmem:[#allocation8 + $0x11f0] sm:$0xff]  ;;  %v2568_v47 = vld [vmem:[#allocation8 + $0x1228] sm:$0xff]  ;;  %v2574_v7 = vld [vmem:[#allocation8 + $0x1258] sm:$0xff] }
 0x3c0   :  { %3665 = vmatmul.mubr.f32.gmra.mrb[28].mxu0 %v6148_v34  ;;  %v2441_v34 = vld [vmem:[#allocation8 + $0xe30] sm:$0xff] }
 0x3c1   :  { %3670 = vmatprep.mubr.f32.mxu0 %v6158_v1  ;;  %5317 = vmatpush1.bf16.msra.mxu0 %v5316_v21  ;;  %v2454_v1 = vld [vmem:[#allocation8 + $0xe98] sm:$0xff]  ;;  %v5328_v19 = vpack.c.bf16 %v2441_v34, %v2435_v46  ;;  %v5344_v21 = vpack.c.bf16 %v2489_v59, %v2483_v9  ;;  %v2519_v46 = vld [vmem:[#allocation8 + $0x10a0] sm:$0xff]  ;;  %v2525_v34 = vld [vmem:[#allocation8 + $0x10d0] sm:$0xff] }
 0x3c2   :  { %5319 = vmatprep.subr.bf16.mxu0 %v5318_v0  ;;  %v5330_v11 = vpack.c.bf16 %v2454_v1, %v2448_v35  ;;  %v5346_v0 = vpack.c.bf16 %v2502_v48, %v2496_v40  ;;  %v2532_v35 = vld [vmem:[#allocation8 + $0x1108] sm:$0xff]  ;;  %v2538_v1 = vld [vmem:[#allocation8 + $0x1138] sm:$0xff]  ;;  %v2567_v9 = vld [vmem:[#allocation8 + $0x1220] sm:$0xff] }
 0x3c3   :  { %v2573_v59 = vld [vmem:[#allocation8 + $0x1250] sm:$0xff]  ;;  %v2580_v40 = vld [vmem:[#allocation8 + $0x1288] sm:$0xff]  ;;  %v2586_v48 = vld [vmem:[#allocation8 + $0x12b8] sm:$0xff] }
 0x3c4   :  { %3671 = vmatmul.mubr.f32.gmra.mrb[30].mxu0 %v6161_v3  ;;  %v5332_v3 = vpack.c.bf16 %v2453_v16, %v2447_v5  ;;  %v2531_v5 = vld [vmem:[#allocation8 + $0x1100] sm:$0xff]  ;;  %v2537_v16 = vld [vmem:[#allocation8 + $0x1130] sm:$0xff] }
 0x3c5   :  { %5321 = vmatpush1.bf16.msra.mxu0 %v5320_v22  ;;  %3741 = vmatprep.mubr.f32.mxu0 %v6165_v12  ;;  %v2459_v12 = vld [vmem:[#allocation8 + $0xec0] sm:$0xff]  ;;  %v5348_v22 = vpack.c.bf16 %v2501_v56, %v2495_v24  ;;  %v2585_v56 = vld [vmem:[#allocation8 + $0x12b0] sm:$0xff] }
 0x3c6   :  { %5323 = vmatprep.subr.bf16.mxu0 %v5322_v27  ;;  %v5336_v31 = vpack.c.bf16 %v2465_v57, %v2459_v12  ;;  %v5350_v27 = vpack.c.bf16 %v2514_v4, %v2508_v37  ;;  %v2543_v12 = vld [vmem:[#allocation8 + $0x1160] sm:$0xff]  ;;  %v2549_v57 = vld [vmem:[#allocation8 + $0x1190] sm:$0xff]  ;;  %v2592_v37 = vld [vmem:[#allocation8 + $0x12e8] sm:$0xff] }
 0x3c7   :  { %v2579_v24 = vld [vmem:[#allocation8 + $0x1280] sm:$0xff]  ;;  %v2598_v4 = vld [vmem:[#allocation8 + $0x1318] sm:$0xff] }
 0x3c9   :  { %5325 = vmatpush1.bf16.msra.mxu0 %v5324_v63  ;;  %v5352_v63 = vpack.c.bf16 %v2513_v54, %v2507_v29  ;;  %v2591_v29 = vld [vmem:[#allocation8 + $0x12e0] sm:$0xff]  ;;  %v2597_v54 = vld [vmem:[#allocation8 + $0x1310] sm:$0xff] }
 0x3ca   :  { %5327 = vmatprep.subr.bf16.mxu0 %v5326_v13  ;;  %v5354_v13 = vpack.c.bf16 %v2526_v43, %v2520_v52  ;;  %v2604_v52 = vld [vmem:[#allocation8 + $0x1348] sm:$0xff]  ;;  %v2610_v43 = vld [vmem:[#allocation8 + $0x1378] sm:$0xff] }
 0x3cd   :  { %5329 = vmatpush1.bf16.msra.mxu0 %v5328_v19  ;;  %v5356_v19 = vpack.c.bf16 %v2525_v34, %v2519_v46  ;;  %v2603_v46 = vld [vmem:[#allocation8 + $0x1340] sm:$0xff]  ;;  %v2616_v34 = vld [vmem:[#allocation8 + $0x13a8] sm:$0xff] }
 0x3ce   :  { %5331 = vmatprep.subr.bf16.mxu0 %v5330_v11  ;;  %v5358_v11 = vpack.c.bf16 %v2538_v1, %v2532_v35 }
 0x3d1   :  { %5333 = vmatpush1.bf16.msra.mxu0 %v5332_v3  ;;  %v5360_v3 = vpack.c.bf16 %v2537_v16, %v2531_v5  ;;  %v6305_v16 = vld [vmem:[#allocation10] sm:$0x3f] }
 0x3d2   :  { %5335 = vmatprep.subr.bf16.mxu0 %v5334_v28  ;;  %v5362_v28 = vpack.c.bf16 %v2550_v44, %v2544_v50  ;;  %v2627_v50 = vld [vmem:[#allocation8 + $0x1400] sm:$0xff]  ;;  %v2640_v44 = vld [vmem:[#allocation8 + $0x1468] sm:$0xff] }
 0x3d5   :  { %5337 = vmatpush1.bf16.msra.mxu0 %v5336_v31  ;;  %v5364_v31 = vpack.c.bf16 %v2549_v57, %v2543_v12  ;;  %v2639_v57 = vld [vmem:[#allocation8 + $0x1460] sm:$0xff] }
 0x3d6   :  { %5339 = vmatprep.subr.bf16.mxu0 %v5338_v49  ;;  %v5366_v49 = vpack.c.bf16 %v2562_v51, %v2556_v53  ;;  %v2645_v53 = vld [vmem:[#allocation8 + $0x1490] sm:$0xff] }
 0x3d9   :  { %5341 = vmatpush1.bf16.msra.mxu0 %v5340_v18  ;;  %v5368_v18 = vpack.c.bf16 %v2561_v39, %v2555_v58 }
 0x3da   :  { %5343 = vmatprep.subr.bf16.mxu0 %v5342_v33  ;;  %v5370_v33 = vpack.c.bf16 %v2574_v7, %v2568_v47  ;;  %v5396_v7 = vpack.c.bf16 %v2645_v53, %v2639_v57  ;;  %v2711_v53 = vld [vmem:[#allocation8 + $0x16a0] sm:$0xff] }
 0x3dd   :  { %5345 = vmatpush1.bf16.msra.mxu0 %v5344_v21  ;;  %v5372_v21 = vpack.c.bf16 %v2573_v59, %v2567_v9  ;;  %v2664_v9 = vld [vmem:[#allocation8 + $0x1528] sm:$0xff]  ;;  %v2670_v59 = vld [vmem:[#allocation8 + $0x1558] sm:$0xff] }
 0x3de   :  { %5347 = vmatprep.subr.bf16.mxu0 %v5346_v0  ;;  %v5374_v0 = vpack.c.bf16 %v2586_v48, %v2580_v40 }
 0x3e1   :  { %5349 = vmatpush1.bf16.msra.mxu0 %v5348_v22  ;;  %v5376_v22 = vpack.c.bf16 %v2585_v56, %v2579_v24  ;;  %v5402_v24 = vpack.c.bf16 %v2670_v59, %v2664_v9  ;;  %v2663_v56 = vld [vmem:[#allocation8 + $0x1520] sm:$0xff]  ;;  %v2741_v59 = vld [vmem:[#allocation8 + $0x1790] sm:$0xff] }
 0x3e2   :  { %5351 = vmatprep.subr.bf16.mxu0 %v5350_v27  ;;  %v5378_v27 = vpack.c.bf16 %v2598_v4, %v2592_v37  ;;  %v2669_v37 = vld [vmem:[#allocation8 + $0x1550] sm:$0xff]  ;;  %v2735_v9 = vld [vmem:[#allocation8 + $0x1760] sm:$0xff] }
 0x3e5   :  { %5353 = vmatpush1.bf16.msra.mxu0 %v5352_v63  ;;  %v5380_v63 = vpack.c.bf16 %v2597_v54, %v2591_v29 }
 0x3e6   :  { %5355 = vmatprep.subr.bf16.mxu0 %v5354_v13  ;;  %v5382_v13 = vpack.c.bf16 %v2610_v43, %v2604_v52  ;;  %v5404_v43 = vpack.c.bf16 %v2669_v37, %v2663_v56  ;;  %v2753_v56 = vld [vmem:[#allocation8 + $0x17f0] sm:$0xff]  ;;  %v2768_v37 = vrot.slane %v6305_v16, %v889_v55 }
 0x3e9   :  { %5357 = vmatpush1.bf16.msra.mxu0 %v5356_v19  ;;  %v2615_v19 = vld [vmem:[#allocation8 + $0x13a0] sm:$0xff] }
 0x3ea   :  { %5359 = vmatprep.subr.bf16.mxu0 %v5358_v11  ;;  %v2628_v11 = vld [vmem:[#allocation8 + $0x1408] sm:$0xff] }
 0x3ed   :  { %5361 = vmatpush1.bf16.msra.mxu0 %v5360_v3  ;;  %v2646_v3 = vld [vmem:[#allocation8 + $0x1498] sm:$0xff] }
 0x3ee   :  { %5363 = vmatprep.subr.bf16.mxu0 %v5362_v28  ;;  %v2760_v28 = vrot.slane %v6305_v16, %v881_v42 }
 0x3f1   :  { %5365 = vmatpush1.bf16.msra.mxu0 %v5364_v31  ;;  %v2652_v31 = vld [vmem:[#allocation8 + $0x14c8] sm:$0xff] }
 0x3f2   :  { %5367 = vmatprep.subr.bf16.mxu0 %v5366_v49  ;;  %v2658_v49 = vld [vmem:[#allocation8 + $0x14f8] sm:$0xff] }
 0x3f3   :  { %v5398_v42 = vpack.c.bf16 %v2658_v49, %v2652_v31  ;;  %v2724_v31 = vld [vmem:[#allocation8 + $0x1708] sm:$0xff]  ;;  %v2730_v49 = vld [vmem:[#allocation8 + $0x1738] sm:$0xff] }
 0x3f5   :  { %5369 = vmatpush1.bf16.msra.mxu0 %v5368_v18  ;;  %v2651_v18 = vld [vmem:[#allocation8 + $0x14c0] sm:$0xff] }
 0x3f6   :  { %5371 = vmatprep.subr.bf16.mxu0 %v5370_v33  ;;  %v2657_v33 = vld [vmem:[#allocation8 + $0x14f0] sm:$0xff] }
 0x3f8   :  { %3742 = vmatmul.mubr.f32.vlgmr.msra.gmra.mrb[24].mxu0 %v6186_v23  ;;  %v2609_v23 = vld [vmem:[#allocation8 + $0x1370] sm:$0xff] }
 0x3f9   :  { %3747 = vmatprep.mubr.f32.mxu0 %v6190_v8  ;;  %5373 = vmatpush1.bf16.msra.mxu0 %v5372_v21  ;;  %v2622_v8 = vld [vmem:[#allocation8 + $0x13d8] sm:$0xff]  ;;  %v5384_v35 = vpack.c.bf16 %v2609_v23, %v2603_v46  ;;  %v2681_v46 = vld [vmem:[#allocation8 + $0x15b0] sm:$0xff] }
 0x3fa   :  { %5375 = vmatprep.subr.bf16.mxu0 %v5374_v0  ;;  %v5386_v1 = vpack.c.bf16 %v2622_v8, %v2616_v34  ;;  %v5400_v0 = vpack.c.bf16 %v2657_v33, %v2651_v18  ;;  %v2688_v34 = vld [vmem:[#allocation8 + $0x15e8] sm:$0xff]  ;;  %v2694_v8 = vld [vmem:[#allocation8 + $0x1618] sm:$0xff] }
 0x3fb   :  { %v2742_v18 = vld [vmem:[#allocation8 + $0x1798] sm:$0xff] }
 0x3fc   :  { %3748 = vmatmul.mubr.f32.gmra.mrb[26].mxu0 %v6196_v26  ;;  %v2621_v26 = vld [vmem:[#allocation8 + $0x13d0] sm:$0xff] }
 0x3fd   :  { %3753 = vmatprep.mubr.f32.mxu0 %v6200_v32  ;;  %5377 = vmatpush1.bf16.msra.mxu0 %v5376_v22  ;;  %v2634_v32 = vld [vmem:[#allocation8 + $0x1438] sm:$0xff]  ;;  %v5388_v5 = vpack.c.bf16 %v2621_v26, %v2615_v19  ;;  %v2676_v22 = vld [vmem:[#allocation8 + $0x1588] sm:$0xff] }
 0x3fe   :  { %5379 = vmatprep.subr.bf16.mxu0 %v5378_v27  ;;  %v2682_v27 = vld [vmem:[#allocation8 + $0x15b8] sm:$0xff] }
 0x400   :  { %3754 = vmatmul.mubr.f32.gmra.mrb[28].mxu0 %v6206_v45  ;;  %v5390_v45 = vpack.c.bf16 %v2634_v32, %v2628_v11  ;;  %v5410_v11 = vpack.c.bf16 %v2694_v8, %v2688_v34  ;;  %v2687_v32 = vld [vmem:[#allocation8 + $0x15e0] sm:$0xff] }
 0x401   :  { %3759 = vmatprep.mubr.f32.mxu0 %v6210_v62  ;;  %5381 = vmatpush1.bf16.msra.mxu0 %v5380_v63  ;;  %v2633_v62 = vld [vmem:[#allocation8 + $0x1430] sm:$0xff]  ;;  %v5406_v63 = vpack.c.bf16 %v2682_v27, %v2676_v22  ;;  %v2772_v22 = vrot.slane %v6305_v16, %v893_v14 }
 0x402   :  { %5383 = vmatprep.subr.bf16.mxu0 %v5382_v13  ;;  %v5392_v12 = vpack.c.bf16 %v2633_v62, %v2627_v50  ;;  %v2675_v13 = vld [vmem:[#allocation8 + $0x1580] sm:$0xff]  ;;  %v2706_v50 = vld [vmem:[#allocation8 + $0x1678] sm:$0xff] }
 0x403   :  { %v5408_v26 = vpack.c.bf16 %v2681_v46, %v2675_v13 }
 0x404   :  { %3760 = vmatmul.mubr.f32.gmra.mrb[30].mxu0 %v6216_v17  ;;  %v2764_v17 = vrot.slane %v6305_v16, %v885_v38 }
 0x405   :  { %5385 = vmatpush1.bf16.msra.mxu0 %v5384_v35  ;;  %3830 = vmatprep.mubr.f32.mxu0 %v6241_v2  ;;  %v5394_v2 = vpack.c.bf16 %v2646_v3, %v2640_v44  ;;  %v2699_v3 = vld [vmem:[#allocation8 + $0x1640] sm:$0xff] }
 0x406   :  { %5387 = vmatprep.subr.bf16.mxu0 %v5386_v1 }
 0x409   :  { %5389 = vmatpush1.bf16.msra.mxu0 %v5388_v5  ;;  %v2693_v5 = vld [vmem:[#allocation8 + $0x1610] sm:$0xff] }
 0x40a   :  { %5391 = vmatprep.subr.bf16.mxu0 %v5390_v45  ;;  %v2700_v45 = vld [vmem:[#allocation8 + $0x1648] sm:$0xff]  ;;  %v5412_v62 = vpack.c.bf16 %v2693_v5, %v2687_v32 }
 0x40b   :  { %v3120_v51 = vpop.f32.mrb[16].mxu0  ;;  %v5414_v44 = vpack.c.bf16 %v2706_v50, %v2700_v45 }
 0x40c   :  { %v5474_v58 = vadd.f32 %v3120_v51, %v2760_v28  ;;  %v3122_v39 = vpop.f32.mrb[17].mxu0  ;;  %v2717_v51 = vld [vmem:[#allocation8 + $0x16d0] sm:$0xff] }
 0x40d   :  { %v5475_v47 = vadd.f32 %v3122_v39, %v2764_v17  ;;  %5393 = vmatpush1.bf16.msra.mxu0 %v5392_v12  ;;  %v2705_v12 = vld [vmem:[#allocation8 + $0x1670] sm:$0xff]  ;;  %v5422_v39 = vpack.c.bf16 %v2730_v49, %v2724_v31 }
 0x40e   :  { %3855 = vst [vmem:[#allocation11] sm:$0xff] %v5474_v58  ;;  %5395 = vmatprep.subr.bf16.mxu0 %v5394_v2  ;;  %v2712_v2 = vld [vmem:[#allocation8 + $0x16a8] sm:$0xff]  ;;  %v5420_v58 = vpack.c.bf16 %v2717_v51, %v2711_v53 }
 0x40f   :  { %3856 = vst [vmem:[#allocation11 + $0x8] sm:$0xff] %v5475_v47  ;;  %v3126_v38 = vpop.f32.mrb[18].mxu0  ;;  %v2723_v47 = vld [vmem:[#allocation8 + $0x1700] sm:$0xff] }
 0x410   :  { %v5476_v40 = vadd.f32 %v3126_v38, %v2760_v28  ;;  %v3128_v48 = vpop.f32.mrb[19].mxu0 }
 0x411   :  { %v5477_v21 = vadd.f32 %v3128_v48, %v2764_v17  ;;  %5397 = vmatpush1.bf16.msra.mxu0 %v5396_v7  ;;  %v2729_v7 = vld [vmem:[#allocation8 + $0x1730] sm:$0xff]  ;;  %v2754_v48 = vld [vmem:[#allocation8 + $0x17f8] sm:$0xff] }
 0x412   :  { %3861 = vst [vmem:[#allocation11 + $0x30] sm:$0xff] %v5476_v40  ;;  %5399 = vmatprep.subr.bf16.mxu0 %v5398_v42  ;;  %v2736_v42 = vld [vmem:[#allocation8 + $0x1768] sm:$0xff]  ;;  %v5424_v33 = vpack.c.bf16 %v2729_v7, %v2723_v47 }
 0x413   :  { %3862 = vst [vmem:[#allocation11 + $0x38] sm:$0xff] %v5477_v21  ;;  %v3132_v4 = vpop.f32.mrb[20].mxu0  ;;  %v5426_v38 = vpack.c.bf16 %v2742_v18, %v2736_v42  ;;  %v2748_v40 = vld [vmem:[#allocation8 + $0x17c8] sm:$0xff]  ;;  %v5428_v21 = vpack.c.bf16 %v2741_v59, %v2735_v9 }
 0x414   :  { %v5478_v29 = vadd.f32 %v3132_v4, %v2760_v28  ;;  %v3134_v54 = vpop.f32.mrb[21].mxu0 }
 0x415   :  { %v5479_v52 = vadd.f32 %v3134_v54, %v2764_v17  ;;  %5401 = vmatpush1.bf16.msra.mxu0 %v5400_v0  ;;  %v5430_v0 = vpack.c.bf16 %v2754_v48, %v2748_v40 }
 0x416   :  { %3867 = vst [vmem:[#allocation11 + $0x60] sm:$0xff] %v5478_v29  ;;  %5403 = vmatprep.subr.bf16.mxu0 %v5402_v24  ;;  %v2747_v24 = vld [vmem:[#allocation8 + $0x17c0] sm:$0xff] }
 0x417   :  { %3868 = vst [vmem:[#allocation11 + $0x68] sm:$0xff] %v5479_v52  ;;  %v3138_v23 = vpop.f32.mrb[22].mxu0  ;;  %v5432_v4 = vpack.c.bf16 %v2753_v56, %v2747_v24 }
 0x418   :  { %v5480_v35 = vadd.f32 %v3138_v23, %v2760_v28  ;;  %v3140_v1 = vpop.f32.mrb[23].mxu0  ;;  %v2718_v28 = vld [vmem:[#allocation8 + $0x16d8] sm:$0xff] }
 0x419   :  { %v5481_v19 = vadd.f32 %v3140_v1, %v2764_v17  ;;  %5405 = vmatpush1.bf16.msra.mxu0 %v5404_v43  ;;  %v5416_v17 = vpack.c.bf16 %v2705_v12, %v2699_v3  ;;  %v5418_v57 = vpack.c.bf16 %v2718_v28, %v2712_v2 }
 0x41a   :  { %3873 = vst [vmem:[#allocation11 + $0x90] sm:$0xff] %v5480_v35  ;;  %5407 = vmatprep.subr.bf16.mxu0 %v5406_v63 }
 0x41b   :  { %3874 = vst [vmem:[#allocation11 + $0x98] sm:$0xff] %v5481_v19 }
 0x41d   :  { %5409 = vmatpush1.bf16.msra.mxu0 %v5408_v26 }
 0x41e   :  { %5411 = vmatprep.subr.bf16.mxu0 %v5410_v11 }
 0x421   :  { %5413 = vmatpush1.bf16.msra.mxu0 %v5412_v62 }
 0x422   :  { %5415 = vmatprep.subr.bf16.mxu0 %v5414_v44 }
 0x425   :  { %5417 = vmatpush1.bf16.msra.mxu0 %v5416_v17 }
 0x426   :  { %5419 = vmatprep.subr.bf16.mxu0 %v5418_v57 }
 0x429   :  { %5421 = vmatpush1.bf16.msra.mxu0 %v5420_v58 }
 0x42a   :  { %5423 = vmatprep.subr.bf16.mxu0 %v5422_v39 }
 0x42d   :  { %5425 = vmatpush1.bf16.msra.mxu0 %v5424_v33 }
 0x42e   :  { %5427 = vmatprep.subr.bf16.mxu0 %v5426_v38 }
 0x431   :  { %5429 = vmatpush1.bf16.msra.mxu0 %v5428_v21 }
 0x432   :  { %5431 = vmatprep.subr.bf16.mxu0 %v5430_v0 }
 0x434   :  { %v3476_v27 = vpop.f32.mrb[24].mxu1 }
 0x435   :  { %v5482_v29 = vadd.f32 %v3476_v27, %v2768_v37  ;;  %v3478_v54 = vpop.f32.mrb[25].mxu1  ;;  %5433 = vmatpush1.bf16.msra.mxu0 %v5432_v4 }
 0x436   :  { %v5483_v52 = vadd.f32 %v3478_v54, %v2772_v22 }
 0x437   :  { %3857 = vst [vmem:[#allocation11 + $0x10] sm:$0xff] %v5482_v29 }
 0x438   :  { %3858 = vst [vmem:[#allocation11 + $0x18] sm:$0xff] %v5483_v52  ;;  %v3482_v43 = vpop.f32.mrb[26].mxu1  ;;  %3831 = vmatmul.mubr.f32.vlgmr.msra.gmra.mrb[24].mxu0 %v6244_v6 }
 0x439   :  { %v5484_v63 = vadd.f32 %v3482_v43, %v2768_v37  ;;  %v3484_v13 = vpop.f32.mrb[27].mxu1  ;;  %3836 = vmatprep.mubr.f32.mxu0 %v6250_v30 }
 0x43a   :  { %v5485_v55 = vadd.f32 %v3484_v13, %v2772_v22 }
 0x43b   :  { %3863 = vst [vmem:[#allocation11 + $0x40] sm:$0xff] %v5484_v63 }
 0x43c   :  { %3864 = vst [vmem:[#allocation11 + $0x48] sm:$0xff] %v5485_v55  ;;  %v3488_v46 = vpop.f32.mrb[28].mxu1  ;;  %3837 = vmatmul.mubr.f32.gmra.mrb[26].mxu0 %v6253_v41  ;;  %v2776_v41 = vrot.slane %v6305_v16, %v897_v10 }
 0x43d   :  { %v5486_v14 = vadd.f32 %v3488_v46, %v2768_v37  ;;  %v3490_v23 = vpop.f32.mrb[29].mxu1  ;;  %3842 = vmatprep.mubr.f32.mxu0 %v6258_v15  ;;  %v2780_v15 = vrot.slane %v6305_v16, %v901_v20 }
 0x43e   :  { %v5487_v34 = vadd.f32 %v3490_v23, %v2772_v22 }
 0x43f   :  { %3869 = vst [vmem:[#allocation11 + $0x70] sm:$0xff] %v5486_v14 }
 0x440   :  { %3870 = vst [vmem:[#allocation11 + $0x78] sm:$0xff] %v5487_v34  ;;  %v3494_v8 = vpop.f32.mrb[30].mxu1  ;;  %3843 = vmatmul.mubr.f32.gmra.mrb[28].mxu0 %v6261_v61 }
 0x441   :  { %v5488_v6 = vadd.f32 %v3494_v8, %v2768_v37  ;;  %v3496_v35 = vpop.f32.mrb[31].mxu1  ;;  %3848 = vmatprep.mubr.f32.mxu0 %v6266_v60 }
 0x442   :  { %v5489_v30 = vadd.f32 %v3496_v35, %v2772_v22 }
 0x443   :  { %3875 = vst [vmem:[#allocation11 + $0xa0] sm:$0xff] %v5488_v6 }
 0x444   :  { %3876 = vst [vmem:[#allocation11 + $0xa8] sm:$0xff] %v5489_v30  ;;  %3849 = vmatmul.mubr.f32.gmra.mrb[30].mxu0 %v6269_v25 }
 0x50b   :  { %v3832_v1 = vpop.f32.mrb[24].mxu0 }
 0x50c   :  { %v5490_v19 = vadd.f32 %v3832_v1, %v2776_v41  ;;  %v3834_v61 = vpop.f32.mrb[25].mxu0 }
 0x50d   :  { %v5491_v26 = vadd.f32 %v3834_v61, %v2780_v15 }
 0x50e   :  { %3859 = vst [vmem:[#allocation11 + $0x20] sm:$0xff] %v5490_v19 }
 0x50f   :  { %3860 = vst [vmem:[#allocation11 + $0x28] sm:$0xff] %v5491_v26  ;;  %v3838_v60 = vpop.f32.mrb[26].mxu0 }
 0x510   :  { %v5492_v11 = vadd.f32 %v3838_v60, %v2776_v41  ;;  %v3840_v32 = vpop.f32.mrb[27].mxu0 }
 0x511   :  { %v5493_v5 = vadd.f32 %v3840_v32, %v2780_v15 }
 0x512   :  { %3865 = vst [vmem:[#allocation11 + $0x50] sm:$0xff] %v5492_v11 }
 0x513   :  { %3866 = vst [vmem:[#allocation11 + $0x58] sm:$0xff] %v5493_v5  ;;  %v3844_v25 = vpop.f32.mrb[28].mxu0 }
 0x514   :  { %v5494_v45 = vadd.f32 %v3844_v25, %v2776_v41  ;;  %v3846_v50 = vpop.f32.mrb[29].mxu0 }
 0x515   :  { %v5495_v10 = vadd.f32 %v3846_v50, %v2780_v15 }
 0x516   :  { %3871 = vst [vmem:[#allocation11 + $0x80] sm:$0xff] %v5494_v45 }
 0x517   :  { %3872 = vst [vmem:[#allocation11 + $0x88] sm:$0xff] %v5495_v10  ;;  %v3850_v36 = vpop.f32.mrb[30].mxu0 }
 0x518   :  { %v5496_v20 = vadd.f32 %v3850_v36, %v2776_v41  ;;  %v3852_v16 = vpop.f32.mrb[31].mxu0 }
 0x519   :  { %v5497_v62 = vadd.f32 %v3852_v16, %v2780_v15 }
 0x51a   :  { %3877 = vst [vmem:[#allocation11 + $0xb0] sm:$0xff] %v5496_v20 }
 0x51b   :  { %3878 = vst [vmem:[#allocation11 + $0xb8] sm:$0xff] %v5497_v62 }
 0x51c   :  { %5806 = shalt.err (!%p5803_p2)
}
 0x51d   :  { %s5807_s7 = scalar_lea.hbm %s6352_s5, 3072 }
 0x51e   :  { %p5808_p3 = scmp.ne.s32.totalorder %s6352_s5, %s5807_s7  ;;  %p5811_p4 = scmp.lt.u32.totalorder %s5807_s7, %s6352_s5 }
 0x520   :  { %p5813_p5 = pnand %p5811_p4, %p5808_p3 }
 0x522   :  { %5816 = shalt.err (!%p5813_p5)
}
 0x523   :  { %3890 = dma.vmem_to_hbm [thread:$0]  %s3885_s29, 3072, %s6352_s5, [#allocation4], %s5830_s18, %s5830_s18, %s5831_s19  }
 0x524   :  { %5823 = dma.done.wait [#allocation4], 3072  }
 0x525   :  { %5824 = vsyncadd [#allocation4], 4294964224 }
 0x526   :  { %3894 = vsyncpa [#allocation3], 1 }
 0x527   :  { %3895 = vsyncpa [#allocation6], 1 }
 0x528   :  { %3896 = vsyncpa [#allocation9], 1 }
 0x529   :  { %3897 = vsyncpa [#allocation4], 1 }

</bundles_post_ra>
